<compile_context>
chip_gen: v5e
topology: v5e:2x2
jax: 0.10.0
libtpu: 0.0.40
codegen_flags: <defaults>
</compile_context>

<pallas_src>
import jax
import jax.numpy as jnp
from jax import lax
from jax.experimental import pallas as pl
from jax.experimental.pallas import tpu as pltpu

FEAT_DIM = 512
NUM_CLASSES = 440
N_PAD = 512            # class dim padded to a lane-dense multiple of 128
SCALE = 64.0
EPS = 1e-12            # F.normalize clamp_min
TK_MAX = 2048          # max K (d_in) tile; safe on v5e's scoped VMEM with 32 MiB limit


def _k_tiling(d_in):
    """Pick the K tile and padded d_in (d_in_pad is always a multiple of tk)."""
    base = -(-d_in // 512) * 512
    tk = min(TK_MAX, base)
    d_in_pad = -(-d_in // tk) * tk
    return tk, d_in_pad


def _face_recognition_kernel(x_ref, wfe_ref, bfe_ref, what_ref, out_ref, acc_ref):
    # x_ref:    (TM, TK)        bf16 flattened-input tile
    # wfe_ref:  (TK, 512)       bf16 feature-extractor weight tile
    # bfe_ref:  (1, 512)        f32 feature-extractor bias
    # what_ref: (512, N_PAD)    bf16 pre-normalized MagLinear weight (col-normalized, padded)
    # out_ref:  (TM, N_PAD)     f32 fused output: cols [0,440) = logits, col 440 = x_norm
    # acc_ref:  (TM, 512)       f32 feature accumulator (scratch)
    k = pl.program_id(1)
    nk = pl.num_programs(1)

    @pl.when(k == 0)
    def _():
        acc_ref[...] = jnp.zeros_like(acc_ref)

    # ---- feature extractor: accumulate Linear over K tiles (MXU, bf16 in / f32 acc) ----
    acc_ref[...] += jnp.dot(x_ref[...], wfe_ref[...],
                            preferred_element_type=jnp.float32)

    @pl.when(k == nk - 1)
    def _():
        feats = jnp.maximum(acc_ref[...] + bfe_ref[...], 0.0)        # (TM, 512) f32, ReLU

        # ---- MagLinear head ----
        ss = jnp.sum(feats * feats, axis=1, keepdims=True)           # (TM, 1)
        x_norm = jnp.sqrt(ss)                                        # exact ||x||_2 (EUP)
        inv_norm = lax.rsqrt(jnp.maximum(ss, EPS * EPS))             # 1 / max(||x||, eps)
        x_hat = feats * inv_norm                                     # F.normalize(x)

        # weight already column-normalized outside the kernel (static at inference)
        cos_theta = jnp.dot(x_hat.astype(jnp.bfloat16), what_ref[...],
                            preferred_element_type=jnp.float32)      # (TM, N_PAD)
        cos_theta = jnp.clip(cos_theta, -1.0, 1.0)
        out = SCALE * cos_theta

        # Stash x_norm in padded column 440 -> one lane-dense output, no masked stores.
        col = lax.broadcasted_iota(jnp.int32, out.shape, 1)
        out_ref[...] = jnp.where(col < NUM_CLASSES, out, x_norm)


def face_recognition_forward(x, target, params):
    """x: (B, C, H, W) float NCHW; `target` is unused by the forward pass
    (only threaded through for the loss in the original module)."""
    del target
    wfe, bfe, w_hat = params                      # prepared: padded, normalized, bf16
    d_in_pad = wfe.shape[0]
    tk = min(TK_MAX, d_in_pad)
    assert d_in_pad % tk == 0

    B = x.shape[0]
    d_in = x.shape[1] * x.shape[2] * x.shape[3]
    x_flat = x.reshape(B, d_in).astype(jnp.bfloat16)

    # Batch tiling: one big M tile up to 512 rows; tm=512 tiles beyond that so the
    # dominant wfe stream is re-fetched as few times as possible.
    if B <= 512:
        tm = max(16, ((B + 15) // 16) * 16)
        b_pad = tm
    else:
        tm = 512
        b_pad = ((B + tm - 1) // tm) * tm

    x_p = jnp.pad(x_flat, ((0, b_pad - B), (0, d_in_pad - d_in)))

    grid = (b_pad // tm, d_in_pad // tk)
    m_tiles = grid[0]

    cost = pl.CostEstimate(
        flops=2 * b_pad * d_in_pad * FEAT_DIM + 2 * b_pad * FEAT_DIM * N_PAD,
        transcendentals=2 * b_pad,
        bytes_accessed=(x_p.size * 2 + wfe.size * 2 * m_tiles + w_hat.size * 2
                        + bfe.size * 4 + b_pad * N_PAD * 4),
    )

    fused = pl.pallas_call(
        _face_recognition_kernel,
        grid=grid,
        in_specs=[
            pl.BlockSpec((tm, tk), lambda i, k: (i, k)),            # x
            pl.BlockSpec((tk, FEAT_DIM), lambda i, k: (k, 0)),      # wfe
            pl.BlockSpec((1, FEAT_DIM), lambda i, k: (0, 0)),       # bfe
            pl.BlockSpec((FEAT_DIM, N_PAD), lambda i, k: (0, 0)),   # w_hat (resident)
        ],
        out_specs=pl.BlockSpec((tm, N_PAD), lambda i, k: (i, 0)),   # fused logits + x_norm
        out_shape=jax.ShapeDtypeStruct((b_pad, N_PAD), jnp.float32),
        scratch_shapes=[pltpu.VMEM((tm, FEAT_DIM), jnp.float32)],
        compiler_params=pltpu.CompilerParams(
            dimension_semantics=("parallel", "arbitrary"),
            vmem_limit_bytes=32 * 1024 * 1024),
        cost_estimate=cost,
    )(x_p, wfe, bfe, w_hat)

    logits = fused[:B, :NUM_CLASSES]
    x_norm = fused[:B, NUM_CLASSES:NUM_CLASSES + 1]
    return logits, x_norm


def init_params(key, d_in):
    """Build prepared (padded, pre-normalized, bf16) parameters."""
    k1, k2 = jax.random.split(key)
    _, d_in_pad = _k_tiling(d_in)

    # feature-extractor stand-in (Linear weight/bias); shipped bf16, zero-padded along d_in
    wfe = jax.random.normal(k1, (d_in, FEAT_DIM), jnp.float32) * (1.0 / jnp.sqrt(d_in))
    wfe = jnp.pad(wfe, ((0, d_in_pad - d_in), (0, 0))).astype(jnp.bfloat16)
    bfe = jnp.zeros((1, FEAT_DIM), jnp.float32)

    # MagLinear weight: uniform(-1, 1), (in_features, out_features).
    # Column-normalize once (static at inference), pad classes 440 -> 512, cast bf16.
    wcls = jax.random.uniform(k2, (FEAT_DIM, NUM_CLASSES), jnp.float32,
                              minval=-1.0, maxval=1.0)
    w_norm = jnp.sqrt(jnp.sum(wcls * wcls, axis=0, keepdims=True))
    w_hat = wcls / jnp.maximum(w_norm, EPS)
    w_hat = jnp.pad(w_hat, ((0, 0), (0, N_PAD - NUM_CLASSES))).astype(jnp.bfloat16)

    return wfe, bfe, w_hat


def _reference_forward(x, params):
    """Pure-JAX reference mirroring the kernel's bf16 casts (for a tolerance check)."""
    wfe, bfe, w_hat = params
    B = x.shape[0]
    d_in = x.shape[1] * x.shape[2] * x.shape[3]
    x_flat = x.reshape(B, d_in).astype(jnp.bfloat16).astype(jnp.float32)
    wfe_f = wfe[:d_in].astype(jnp.float32)
    feats = jnp.maximum(x_flat @ wfe_f + bfe, 0.0)
    norm = jnp.sqrt(jnp.sum(feats * feats, axis=1, keepdims=True))
    x_hat = feats / jnp.maximum(norm, EPS)
    w_f = w_hat[:, :NUM_CLASSES].astype(jnp.float32)
    cos = jnp.clip(x_hat.astype(jnp.bfloat16).astype(jnp.float32) @ w_f, -1.0, 1.0)
    return SCALE * cos, norm


if __name__ == "__main__":
    key = jax.random.PRNGKey(0)
    kx, kt, kp = jax.random.split(key, 3)

    B, C, H, W = 2, 4, 16, 16
    x = jax.random.normal(kx, (B, C, H, W), jnp.float32)
    target = jax.random.randint(kt, (B,), 0, NUM_CLASSES)

    params = init_params(kp, C * H * W)

    logits, x_norm = face_recognition_forward(x, target, params)
    logits, x_norm = jax.block_until_ready((logits, x_norm))

    assert logits.shape == (B, NUM_CLASSES) and x_norm.shape == (B, 1)
    assert bool(jnp.all(jnp.isfinite(logits))) and bool(jnp.all(jnp.isfinite(x_norm)))
    assert bool(jnp.all(jnp.abs(logits) <= SCALE + 1e-3))   # |cos| <= 1 after clamp

    ref_logits, ref_norm = _reference_forward(x, params)
    assert bool(jnp.max(jnp.abs(logits - ref_logits)) < 0.5)
    assert bool(jnp.max(jnp.abs(x_norm - ref_norm) / jnp.maximum(ref_norm, 1e-6)) < 1e-2)

    print("KERNEL_OK")
</pallas_src>

<mosaic_0001>
module attributes {stable_mosaic.version = 11 : i64} {
  func.func @_face_recognition_kernel(%arg0: i32, %arg1: i32, %arg2: memref<16x1024xbf16, #tpu.memory_space<vmem>>, %arg3: memref<1024x512xbf16, #tpu.memory_space<vmem>>, %arg4: memref<1x512xf32, #tpu.memory_space<vmem>>, %arg5: memref<512x512xbf16, #tpu.memory_space<vmem>>, %arg6: memref<16x512xf32, #tpu.memory_space<vmem>>, %arg7: memref<16x512xf32, #tpu.memory_space<vmem>>) attributes {dimension_semantics = [#tpu.dimension_semantics<parallel>, #tpu.dimension_semantics<arbitrary>], iteration_bounds = array<i64: 1, 1>, scalar_prefetch = 0 : i64, scratch_operands = 1 : i64, tpu.core_type = #tpu.core_type<tc>, window_params = [{transform_indices = @transform_0, window_bounds = array<i64: 16, 1024>}, {transform_indices = @transform_1, window_bounds = array<i64: 1024, 512>}, {pipeline_mode = #tpu.pipeline_mode<synchronous>, transform_indices = @transform_2, window_bounds = array<i64: 1, 512>}, {pipeline_mode = #tpu.pipeline_mode<synchronous>, transform_indices = @transform_3, window_bounds = array<i64: 512, 512>}, {transform_indices = @transform_4, window_bounds = array<i64: 16, 512>}]} {
    %c0_i32 = arith.constant 0 : i32
    %0 = arith.cmpi eq, %arg1, %c0_i32 : i32
    %1 = arith.extui %0 : i1 to i32
    %c0_i32_0 = arith.constant 0 : i32
    %2 = arith.cmpi ne, %1, %c0_i32_0 : i32
    scf.if %2 {
      %cst_10 = arith.constant 0.000000e+00 : f32
      %12 = vector.broadcast %cst_10 : f32 to vector<16x512xf32>
      %c0_11 = arith.constant 0 : index
      %c0_12 = arith.constant 0 : index
      %13 = vector.load %arg7[%c0_11, %c0_12] : memref<16x512xf32, #tpu.memory_space<vmem>>, vector<16x512xf32>
      tpu.vector_store %arg7[%c0_11, %c0_12], %12 {strides = array<i32>} : memref<16x512xf32, #tpu.memory_space<vmem>>, vector<16x512xf32>,
    } else {
    }
    %c0 = arith.constant 0 : index
    %c0_1 = arith.constant 0 : index
    %3 = vector.load %arg7[%c0, %c0_1] : memref<16x512xf32, #tpu.memory_space<vmem>>, vector<16x512xf32>
    %c0_2 = arith.constant 0 : index
    %c0_3 = arith.constant 0 : index
    %4 = vector.load %arg2[%c0_2, %c0_3] : memref<16x1024xbf16, #tpu.memory_space<vmem>>, vector<16x1024xbf16>
    %c0_4 = arith.constant 0 : index
    %c0_5 = arith.constant 0 : index
    %5 = vector.load %arg3[%c0_4, %c0_5] : memref<1024x512xbf16, #tpu.memory_space<vmem>>, vector<1024x512xbf16>
    %cst = arith.constant dense<0.000000e+00> : vector<16x512xf32>
    %6 = tpu.matmul %4, %5, %cst {dimension_numbers = #tpu.dot_dimension_numbers<[1], [0], [0], [1], [0, 0, 1, 1], [], []>} : vector<16x1024xbf16>, vector<1024x512xbf16>, vector<16x512xf32> -> vector<16x512xf32>
    %7 = arith.addf %3, %6 : vector<16x512xf32>
    %c0_6 = arith.constant 0 : index
    %c0_7 = arith.constant 0 : index
    %8 = vector.load %arg7[%c0_6, %c0_7] : memref<16x512xf32, #tpu.memory_space<vmem>>, vector<16x512xf32>
    tpu.vector_store %arg7[%c0_6, %c0_7], %7 {strides = array<i32>} : memref<16x512xf32, #tpu.memory_space<vmem>>, vector<16x512xf32>,
    %c0_i32_8 = arith.constant 0 : i32
    %9 = arith.cmpi eq, %arg1, %c0_i32_8 : i32
    %10 = arith.extui %9 : i1 to i32
    %c0_i32_9 = arith.constant 0 : i32
    %11 = arith.cmpi ne, %10, %c0_i32_9 : i32
    scf.if %11 {
      %c0_10 = arith.constant 0 : index
      %c0_11 = arith.constant 0 : index
      %12 = vector.load %arg7[%c0_10, %c0_11] : memref<16x512xf32, #tpu.memory_space<vmem>>, vector<16x512xf32>
      %c0_12 = arith.constant 0 : index
      %c0_13 = arith.constant 0 : index
      %13 = vector.load %arg4[%c0_12, %c0_13] : memref<1x512xf32, #tpu.memory_space<vmem>>, vector<1x512xf32>
      %14 = vector.broadcast %13 : vector<1x512xf32> to vector<16x512xf32>
      %15 = arith.addf %12, %14 : vector<16x512xf32>
      %cst_14 = arith.constant 0.000000e+00 : f32
      %16 = vector.broadcast %cst_14 : f32 to vector<16x512xf32>
      %17 = arith.maximumf %15, %16 : vector<16x512xf32>
      %18 = arith.mulf %17, %17 : vector<16x512xf32>
      %cst_15 = arith.constant dense<0.000000e+00> : vector<16xf32>
      %19 = vector.multi_reduction <add>, %18, %cst_15 [1] : vector<16x512xf32> to vector<16xf32>
      %20 = vector.shape_cast %19 : vector<16xf32> to vector<16x1xf32>
      %21 = math.sqrt %20 : vector<16x1xf32>
      %cst_16 = arith.constant 1.000000e-24 : f32
      %22 = vector.broadcast %cst_16 : f32 to vector<16x1xf32>
      %23 = arith.maximumf %20, %22 : vector<16x1xf32>
      %24 = math.rsqrt %23 : vector<16x1xf32>
      %25 = vector.broadcast %24 : vector<16x1xf32> to vector<16x512xf32>
      %26 = arith.mulf %17, %25 : vector<16x512xf32>
      %27 = arith.truncf %26 : vector<16x512xf32> to vector<16x512xbf16>
      %c0_17 = arith.constant 0 : index
      %c0_18 = arith.constant 0 : index
      %28 = vector.load %arg5[%c0_17, %c0_18] : memref<512x512xbf16, #tpu.memory_space<vmem>>, vector<512x512xbf16>
      %cst_19 = arith.constant dense<0.000000e+00> : vector<16x512xf32>
      %29 = tpu.matmul %27, %28, %cst_19 {dimension_numbers = #tpu.dot_dimension_numbers<[1], [0], [0], [1], [0, 0, 1, 1], [], []>} : vector<16x512xbf16>, vector<512x512xbf16>, vector<16x512xf32> -> vector<16x512xf32>
      %cst_20 = arith.constant -1.000000e+00 : f32
      %cst_21 = arith.constant 1.000000e+00 : f32
      %30 = vector.broadcast %cst_20 : f32 to vector<16x512xf32>
      %31 = arith.maximumf %30, %29 : vector<16x512xf32>
      %32 = vector.broadcast %cst_21 : f32 to vector<16x512xf32>
      %33 = arith.minimumf %32, %31 : vector<16x512xf32>
      %cst_22 = arith.constant 6.400000e+01 : f32
      %34 = vector.broadcast %cst_22 : f32 to vector<16x512xf32>
      %35 = arith.mulf %34, %33 : vector<16x512xf32>
      %36 = tpu.iota {dimensions = array<i32: 1>} : vector<16x512xi32>
      %c440_i32 = arith.constant 440 : i32
      %37 = vector.broadcast %c440_i32 : i32 to vector<16x512xi32>
      %38 = arith.cmpi slt, %36, %37 : vector<16x512xi32>
      %39 = vector.shape_cast %21 : vector<16x1xf32> to vector<16x1xf32>
      %40 = vector.broadcast %39 : vector<16x1xf32> to vector<16x512xf32>
      %41 = arith.select %38, %35, %40 : vector<16x512xi1>, vector<16x512xf32>
      %c0_23 = arith.constant 0 : index
      %c0_24 = arith.constant 0 : index
      %42 = vector.load %arg6[%c0_23, %c0_24] : memref<16x512xf32, #tpu.memory_space<vmem>>, vector<16x512xf32>
      tpu.vector_store %arg6[%c0_23, %c0_24], %41 {strides = array<i32>} : memref<16x512xf32, #tpu.memory_space<vmem>>, vector<16x512xf32>,
    } else {
    }
    return
  }
  func.func @transform_0(%arg0: i32, %arg1: i32) -> (i32, i32) {
    %c0_i32 = arith.constant 0 : i32
    return %arg0, %arg1 : i32, i32
  }
  func.func @transform_1(%arg0: i32, %arg1: i32) -> (i32, i32) {
    %c0_i32 = arith.constant 0 : i32
    %c0_i32_0 = arith.constant 0 : i32
    return %arg1, %c0_i32 : i32, i32
  }
  func.func @transform_2(%arg0: i32, %arg1: i32) -> (i32, i32) {
    %c0_i32 = arith.constant 0 : i32
    %c0_i32_0 = arith.constant 0 : i32
    %c0_i32_1 = arith.constant 0 : i32
    return %c0_i32, %c0_i32_0 : i32, i32
  }
  func.func @transform_3(%arg0: i32, %arg1: i32) -> (i32, i32) {
    %c0_i32 = arith.constant 0 : i32
    %c0_i32_0 = arith.constant 0 : i32
    %c0_i32_1 = arith.constant 0 : i32
    return %c0_i32, %c0_i32_0 : i32, i32
  }
  func.func @transform_4(%arg0: i32, %arg1: i32) -> (i32, i32) {
    %c0_i32 = arith.constant 0 : i32
    %c0_i32_0 = arith.constant 0 : i32
    return %arg0, %c0_i32 : i32, i32
  }
}

</mosaic_0001>

<bundles_post_ra>
// kernel: tpu_custom_call.1
= control target key start
LH: loop header
LB: loop body
LE: loop exit
PB: predicated region body
PF: predicated region fallthrough
CT: control target
= control target key end

     0   :  { %9 = vsyncpa [#allocation4], 0  ;;  %s5673_s0 = inlined_call_operand.hbm [shape: bf16[16,1024], index: 0, kind: input, shape index: {}]   ;;  %s5674_s1 = inlined_call_operand.hbm [shape: bf16[1024,512], index: 1, kind: input, shape index: {}]   ;;  %s5675_s2 = inlined_call_operand.hbm [shape: f32[1,512], index: 2, kind: input, shape index: {}]   ;;  %s5676_s3 = inlined_call_operand.hbm [shape: bf16[512,512], index: 3, kind: input, shape index: {}]   ;;  %s5677_s4 = inlined_call_operand.hbm [shape: f32[16,512], index: 4, kind: output, shape index: {}]  }
   0x1   :  { %10 = vsyncpa [#allocation7], 0 }
   0x2   :  { %11 = vsyncpa [#allocation10], 0  ;;  %s30_s17 = sshll.u32 %s5674_s1, 4  ;;  %s31_s17 = int_to_ptr.hbm [resolvable:$true] %s30_s17 }
   0x3   :  { %12 = vsyncpa [#allocation5], 0  ;;  %s5435_s18 = smov [#allocation6]   ;;  %s17_s22 = sshll.u32 %s5673_s0, 4  ;;  %s18_s22 = int_to_ptr.hbm [resolvable:$true] %s17_s22 }
   0x4   :  { %s32_s19 = sshll.u32 %s5435_s18, 4  ;;  %s5436_s23 = smov 256   ;;  %s33_s19 = int_to_ptr.vmem [resolvable:$true] %s32_s19 }
   0x5   :  { %s5437_s24 = smov 16   ;;  %s5438_s25 = smov [#allocation3]  }
   0x6   :  { %38 = dma.hbm_to_vmem [thread:$0]  %s31_s17, 32768, %s33_s19, [#allocation7], %s5436_s23, %s5436_s23, %s5437_s24  }
   0x7   :  { %s19_s26 = sshll.u32 %s5438_s25, 4  ;;  %s5439_s27 = smov 512   ;;  %s20_s26 = int_to_ptr.vmem [resolvable:$true] %s19_s26 }
   0x8   :  { %s5440_s28 = smov 32   ;;  %s44_s30 = sshll.u32 %s5675_s2, 4  ;;  %s45_s30 = int_to_ptr.hbm [resolvable:$true] %s44_s30 }
   0x9   :  { %25 = dma.hbm_to_vmem [thread:$0]  %s18_s22, 1024, %s20_s26, [#allocation4], %s5439_s27, %s5439_s27, %s5440_s28  }
   0xa   :  { %s5441_s5 = smov [#allocation8]   ;;  %s54_s8 = sshll.u32 %s5676_s3, 4  ;;  %s55_s8 = int_to_ptr.hbm [resolvable:$true] %s54_s8 }
   0xb   :  { %s46_s0 = sshll.u32 %s5441_s5, 4  ;;  %s5442_s9 = smov [#allocation9]   ;;  %s47_s0 = int_to_ptr.vmem [resolvable:$true] %s46_s0 }
   0xc   :  { %49 = dma.hbm_to_vmem [thread:$0]  %s45_s30, 64, %s47_s0, [#allocation7]  }
   0xd   :  { %s56_s10 = sshll.u32 %s5442_s9, 4  ;;  %s57_s10 = int_to_ptr.vmem [resolvable:$true] %s56_s10 }
   0xe   :  { %62 = dma.hbm_to_vmem [thread:$0]  %s55_s8, 16384, %s57_s10, [#allocation10], %s5436_s23, %s5436_s23, %s5437_s24  }
   0xf   :  { %5427 = dma.done.wait [#allocation4], 1024  }
  0x10   :  { %5428 = vsyncadd [#allocation4], 4294966272 }
  0x11   :  { %5429 = dma.done.wait [#allocation7], 32832  }
  0x12   :  { %5430 = vsyncadd [#allocation7], 4294934464 }
  0x13   :  { %5431 = dma.done.wait [#allocation10], 16384  }
  0x14   :  { %5432 = vsyncadd [#allocation10], 4294950912  ;;  %v3468_v0 = vld [vmem:[#allocation6 + $0xe0] sm:$0xf]  ;;  %v4936_v1 = vld [vmem:[#allocation6 + $0xec] sm:$0xf0] }
  0x15   :  { %v3596_v2 = vld [vmem:[#allocation6 + $0x1e0] sm:$0xf]  ;;  %v3469_v3 = vor.u32 %v4936_v1, %v3468_v0  ;;  %v4968_v4 = vld [vmem:[#allocation6 + $0x1ec] sm:$0xf0]  ;;  %s5443_s2 = smov [#allocation11]   ;;  %s3307_s13 = sshll.u32 %s5677_s4, 4  ;;  %s3308_s13 = int_to_ptr.hbm [resolvable:$true] %s3307_s13 }
  0x16   :  { %v3724_v5 = vld [vmem:[#allocation6 + $0x2e0] sm:$0xf]  ;;  %v5000_v6 = vld [vmem:[#allocation6 + $0x2ec] sm:$0xf0]  ;;  %v3597_v7 = vor.u32 %v4968_v4, %v3596_v2  ;;  %s3305_s3 = sshll.u32 %s5443_s2, 4  ;;  %s3306_s3 = int_to_ptr.vmem [resolvable:$true] %s3305_s3 }
  0x17   :  { %v3725_v8 = vor.u32 %v5000_v6, %v3724_v5  ;;  %v3852_v9 = vld [vmem:[#allocation6 + $0x3e0] sm:$0xf]  ;;  %v5032_v10 = vld [vmem:[#allocation6 + $0x3ec] sm:$0xf0]  ;;  %1683 = vmatpush.bf16.msra.mxu0 %v3469_v3 }
  0x18   :  { %v3452_v11 = vld [vmem:[#allocation6 + $0xc0] sm:$0xf]  ;;  %v3853_v12 = vor.u32 %v5032_v10, %v3852_v9  ;;  %v4932_v13 = vld [vmem:[#allocation6 + $0xcc] sm:$0xf0]  ;;  %1697 = vmatpush.bf16.msra.mxu1 %v3597_v7 }
  0x19   :  { %v3580_v14 = vld [vmem:[#allocation6 + $0x1c0] sm:$0xf]  ;;  %v4964_v15 = vld [vmem:[#allocation6 + $0x1cc] sm:$0xf0]  ;;  %1711 = vmatpush.bf16.msra.mxu2 %v3725_v8  ;;  %v3453_v16 = vor.u32 %v4932_v13, %v3452_v11 }
  0x1a   :  { %v3581_v17 = vor.u32 %v4964_v15, %v3580_v14  ;;  %v3708_v18 = vld [vmem:[#allocation6 + $0x2c0] sm:$0xf]  ;;  %v4996_v19 = vld [vmem:[#allocation6 + $0x2cc] sm:$0xf0]  ;;  %1725 = vmatpush.bf16.msra.mxu3 %v3853_v12 }
  0x1b   :  { %v3836_v20 = vld [vmem:[#allocation6 + $0x3c0] sm:$0xf]  ;;  %v3709_v21 = vor.u32 %v4996_v19, %v3708_v18  ;;  %v5028_v22 = vld [vmem:[#allocation6 + $0x3cc] sm:$0xf0]  ;;  %1684 = vmatpush.bf16.msra.mxu0 %v3453_v16 }
  0x1c   :  { %v3436_v23 = vld [vmem:[#allocation6 + $0xa0] sm:$0xf]  ;;  %v4928_v24 = vld [vmem:[#allocation6 + $0xac] sm:$0xf0]  ;;  %v3837_v25 = vor.u32 %v5028_v22, %v3836_v20  ;;  %1698 = vmatpush.bf16.msra.mxu1 %v3581_v17 }
  0x1d   :  { %v3564_v26 = vld [vmem:[#allocation6 + $0x1a0] sm:$0xf]  ;;  %v4960_v27 = vld [vmem:[#allocation6 + $0x1ac] sm:$0xf0]  ;;  %v3437_v29 = vor.u32 %v4928_v24, %v3436_v23  ;;  %1712 = vmatpush.bf16.msra.mxu2 %v3709_v21 }
  0x1e   :  { %v3692_v28 = vld [vmem:[#allocation6 + $0x2a0] sm:$0xf]  ;;  %v4992_v30 = vld [vmem:[#allocation6 + $0x2ac] sm:$0xf0]  ;;  %v3565_v33 = vor.u32 %v4960_v27, %v3564_v26  ;;  %1726 = vmatpush.bf16.msra.mxu3 %v3837_v25 }
  0x1f   :  { %v3820_v31 = vld [vmem:[#allocation6 + $0x3a0] sm:$0xf]  ;;  %v5024_v32 = vld [vmem:[#allocation6 + $0x3ac] sm:$0xf0]  ;;  %v3693_v34 = vor.u32 %v4992_v30, %v3692_v28  ;;  %1685 = vmatpush.bf16.msra.mxu0 %v3437_v29 }
  0x20   :  { %v3420_v35 = vld [vmem:[#allocation6 + $0x80] sm:$0xf]  ;;  %v4924_v36 = vld [vmem:[#allocation6 + $0x8c] sm:$0xf0]  ;;  %v3821_v38 = vor.u32 %v5024_v32, %v3820_v31  ;;  %1699 = vmatpush.bf16.msra.mxu1 %v3565_v33 }
  0x21   :  { %v3548_v37 = vld [vmem:[#allocation6 + $0x180] sm:$0xf]  ;;  %v4956_v39 = vld [vmem:[#allocation6 + $0x18c] sm:$0xf0]  ;;  %v3421_v44 = vor.u32 %v4924_v36, %v3420_v35  ;;  %1713 = vmatpush.bf16.msra.mxu2 %v3693_v34 }
  0x22   :  { %v3676_v40 = vld [vmem:[#allocation6 + $0x280] sm:$0xf]  ;;  %v4988_v41 = vld [vmem:[#allocation6 + $0x28c] sm:$0xf0]  ;;  %v3549_v45 = vor.u32 %v4956_v39, %v3548_v37  ;;  %1727 = vmatpush.bf16.msra.mxu3 %v3821_v38 }
  0x23   :  { %v3804_v42 = vld [vmem:[#allocation6 + $0x380] sm:$0xf]  ;;  %v5020_v43 = vld [vmem:[#allocation6 + $0x38c] sm:$0xf0]  ;;  %v3677_v46 = vor.u32 %v4988_v41, %v3676_v40  ;;  %1686 = vmatpush.bf16.msra.mxu0 %v3421_v44 }
  0x24   :  { %v3404_v47 = vld [vmem:[#allocation6 + $0x60] sm:$0xf]  ;;  %v4920_v48 = vld [vmem:[#allocation6 + $0x6c] sm:$0xf0]  ;;  %v3805_v50 = vor.u32 %v5020_v43, %v3804_v42  ;;  %1700 = vmatpush.bf16.msra.mxu1 %v3549_v45 }
  0x25   :  { %v3532_v49 = vld [vmem:[#allocation6 + $0x160] sm:$0xf]  ;;  %v4952_v51 = vld [vmem:[#allocation6 + $0x16c] sm:$0xf0]  ;;  %v3405_v56 = vor.u32 %v4920_v48, %v3404_v47  ;;  %1714 = vmatpush.bf16.msra.mxu2 %v3677_v46 }
  0x26   :  { %v3660_v52 = vld [vmem:[#allocation6 + $0x260] sm:$0xf]  ;;  %v4984_v53 = vld [vmem:[#allocation6 + $0x26c] sm:$0xf0]  ;;  %v3533_v57 = vor.u32 %v4952_v51, %v3532_v49  ;;  %1728 = vmatpush.bf16.msra.mxu3 %v3805_v50 }
  0x27   :  { %v3788_v54 = vld [vmem:[#allocation6 + $0x360] sm:$0xf]  ;;  %v5016_v55 = vld [vmem:[#allocation6 + $0x36c] sm:$0xf0]  ;;  %v3661_v58 = vor.u32 %v4984_v53, %v3660_v52  ;;  %1687 = vmatpush.bf16.msra.mxu0 %v3405_v56 }
  0x28   :  { %v3388_v59 = vld [vmem:[#allocation6 + $0x40] sm:$0xf]  ;;  %v4916_v60 = vld [vmem:[#allocation6 + $0x4c] sm:$0xf0]  ;;  %v3789_v62 = vor.u32 %v5016_v55, %v3788_v54  ;;  %1701 = vmatpush.bf16.msra.mxu1 %v3533_v57  ;;  %v3332_v54 = vld [vmem:[#allocation3 + $0x8] sm:$0xf] }
  0x29   :  { %v3516_v61 = vld [vmem:[#allocation6 + $0x140] sm:$0xf]  ;;  %v4948_v63 = vld [vmem:[#allocation6 + $0x14c] sm:$0xf0]  ;;  %v3389_v4 = vor.u32 %v4916_v60, %v3388_v59  ;;  %1715 = vmatpush.bf16.msra.mxu2 %v3661_v58  ;;  %v4903_v59 = vld [vmem:[#allocation3 + $0x24] sm:$0xf0] }
  0x2a   :  { %v3644_v0 = vld [vmem:[#allocation6 + $0x240] sm:$0xf]  ;;  %v4980_v1 = vld [vmem:[#allocation6 + $0x24c] sm:$0xf0]  ;;  %v3517_v5 = vor.u32 %v4948_v63, %v3516_v61  ;;  %1729 = vmatpush.bf16.msra.mxu3 %v3789_v62 }
  0x2b   :  { %v3772_v2 = vld [vmem:[#allocation6 + $0x340] sm:$0xf]  ;;  %v5012_v3 = vld [vmem:[#allocation6 + $0x34c] sm:$0xf0]  ;;  %v3645_v6 = vor.u32 %v4980_v1, %v3644_v0  ;;  %1688 = vmatpush.bf16.msra.mxu0 %v3389_v4  ;;  %v5486_v1 = vor.u32 %v4903_v59, %v3332_v54 }
  0x2c   :  { %v3372_v7 = vld [vmem:[#allocation6 + $0x20] sm:$0xf]  ;;  %v4912_v8 = vld [vmem:[#allocation6 + $0x2c] sm:$0xf0]  ;;  %v3773_v10 = vor.u32 %v5012_v3, %v3772_v2  ;;  %1702 = vmatpush.bf16.msra.mxu1 %v3517_v5 }
  0x2d   :  { %v3500_v9 = vld [vmem:[#allocation6 + $0x120] sm:$0xf]  ;;  %v4944_v11 = vld [vmem:[#allocation6 + $0x12c] sm:$0xf0]  ;;  %v3373_v16 = vor.u32 %v4912_v8, %v3372_v7  ;;  %1716 = vmatpush.bf16.msra.mxu2 %v3645_v6  ;;  %v4898_v6 = vld [vmem:[#allocation3 + $0x4] sm:$0xf] }
  0x2e   :  { %v3628_v12 = vld [vmem:[#allocation6 + $0x220] sm:$0xf]  ;;  %v4976_v13 = vld [vmem:[#allocation6 + $0x22c] sm:$0xf0]  ;;  %v3501_v19 = vor.u32 %v4944_v11, %v3500_v9  ;;  %1730 = vmatpush.bf16.msra.mxu3 %v3773_v10  ;;  %v3326_v7 = vld [vmem:[#allocation3 + $0x20] sm:$0xf0] }
  0x2f   :  { %v3756_v14 = vld [vmem:[#allocation6 + $0x320] sm:$0xf]  ;;  %v5008_v15 = vld [vmem:[#allocation6 + $0x32c] sm:$0xf0]  ;;  %v3629_v20 = vor.u32 %v4976_v13, %v3628_v12  ;;  %1689 = vmatpush.bf16.msra.mxu0 %v3373_v16  ;;  %v4899_v8 = vld [vmem:[#allocation3 + $0xc] sm:$0xf]  ;;  %v5490_v10 = vor.u32 %v4898_v6, %v3326_v7 }
  0x30   :  { %v3356_v17 = vld [vmem:[#allocation6] sm:$0xf]  ;;  %v4908_v18 = vld [vmem:[#allocation6 + $0xc] sm:$0xf0]  ;;  %v3757_v24 = vor.u32 %v5008_v15, %v3756_v14  ;;  %1703 = vmatpush.bf16.msra.mxu1 %v3501_v19  ;;  %v3334_v11 = vld [vmem:[#allocation3 + $0x28] sm:$0xf0] }
  0x31   :  { %v3484_v21 = vld [vmem:[#allocation6 + $0x100] sm:$0xf]  ;;  %v4940_v22 = vld [vmem:[#allocation6 + $0x10c] sm:$0xf0]  ;;  %v3357_v31 = vor.u32 %v4908_v18, %v3356_v17  ;;  %1717 = vmatpush.bf16.msra.mxu2 %v3629_v20  ;;  %v5492_v17 = vor.u32 %v4899_v8, %v3334_v11 }
  0x32   :  { %v3612_v23 = vld [vmem:[#allocation6 + $0x200] sm:$0xf]  ;;  %v4972_v25 = vld [vmem:[#allocation6 + $0x20c] sm:$0xf0]  ;;  %v3485_v35 = vor.u32 %v4940_v22, %v3484_v21  ;;  %1731 = vmatpush.bf16.msra.mxu3 %v3757_v24 }
  0x33   :  { %v3740_v26 = vld [vmem:[#allocation6 + $0x300] sm:$0xf]  ;;  %v5004_v27 = vld [vmem:[#allocation6 + $0x30c] sm:$0xf0]  ;;  %v3613_v36 = vor.u32 %v4972_v25, %v3612_v23  ;;  %1690 = vmatpush.bf16.msra.mxu0 %v3357_v31 }
  0x34   :  { %v3980_v28 = vld [vmem:[#allocation6 + $0x4e0] sm:$0xf]  ;;  %v5064_v29 = vld [vmem:[#allocation6 + $0x4ec] sm:$0xf0]  ;;  %v3741_v39 = vor.u32 %v5004_v27, %v3740_v26  ;;  %1704 = vmatpush.bf16.msra.mxu1 %v3485_v35 }
  0x35   :  { %v4108_v30 = vld [vmem:[#allocation6 + $0x5e0] sm:$0xf]  ;;  %v5096_v32 = vld [vmem:[#allocation6 + $0x5ec] sm:$0xf0]  ;;  %v3981_v40 = vor.u32 %v5064_v29, %v3980_v28  ;;  %1718 = vmatpush.bf16.msra.mxu2 %v3613_v36 }
  0x36   :  { %v4236_v33 = vld [vmem:[#allocation6 + $0x6e0] sm:$0xf]  ;;  %v5128_v34 = vld [vmem:[#allocation6 + $0x6ec] sm:$0xf0]  ;;  %v4109_v43 = vor.u32 %v5096_v32, %v4108_v30  ;;  %1732 = vmatpush.bf16.msra.mxu3 %v3741_v39 }
  0x37   :  { %v4364_v37 = vld [vmem:[#allocation6 + $0x7e0] sm:$0xf]  ;;  %v5160_v38 = vld [vmem:[#allocation6 + $0x7ec] sm:$0xf0]  ;;  %v4237_v44 = vor.u32 %v5128_v34, %v4236_v33  ;;  %1739 = vmatpush.bf16.msrb.mxu0 %v3981_v40  ;;  %1705 = vmatmul.bf16.vlgmr.msra.gmra.mxu1 %v5490_v10 }
  0x38   :  { %v3964_v41 = vld [vmem:[#allocation6 + $0x4c0] sm:$0xf]  ;;  %v5060_v42 = vld [vmem:[#allocation6 + $0x4cc] sm:$0xf0]  ;;  %v4365_v48 = vor.u32 %v5160_v38, %v4364_v37  ;;  %1753 = vmatpush.bf16.msrb.mxu1 %v4109_v43  ;;  %1719 = vmatmul.bf16.vlgmr.msra.gmra.mxu2 %v5486_v1 }
  0x39   :  { %v4092_v45 = vld [vmem:[#allocation6 + $0x5c0] sm:$0xf]  ;;  %v5092_v46 = vld [vmem:[#allocation6 + $0x5cc] sm:$0xf0]  ;;  %v3965_v55 = vor.u32 %v5060_v42, %v3964_v41  ;;  %1767 = vmatpush.bf16.msrb.mxu2 %v4237_v44  ;;  %1733 = vmatmul.bf16.vlgmr.msra.gmra.mxu3 %v5492_v17 }
  0x3a   :  { %v4220_v47 = vld [vmem:[#allocation6 + $0x6c0] sm:$0xf]  ;;  %v5124_v49 = vld [vmem:[#allocation6 + $0x6cc] sm:$0xf0]  ;;  %v4093_v60 = vor.u32 %v5092_v46, %v4092_v45  ;;  %1781 = vmatpush.bf16.msrb.mxu3 %v4365_v48 }
  0x3b   :  { %v4348_v50 = vld [vmem:[#allocation6 + $0x7c0] sm:$0xf]  ;;  %v5156_v51 = vld [vmem:[#allocation6 + $0x7cc] sm:$0xf0]  ;;  %v4221_v61 = vor.u32 %v5124_v49, %v4220_v47  ;;  %1740 = vmatpush.bf16.msrb.mxu0 %v3965_v55 }
  0x3c   :  { %v3324_v52 = vld [vmem:[#allocation3] sm:$0xf]  ;;  %v5056_v57 = vld [vmem:[#allocation6 + $0x4ac] sm:$0xf0]  ;;  %v4349_v2 = vor.u32 %v5156_v51, %v4348_v50  ;;  %1754 = vmatpush.bf16.msrb.mxu1 %v4093_v60 }
  0x3d   :  { %v4902_v53 = vld [vmem:[#allocation3 + $0x1c] sm:$0xf0]  ;;  %v5088_v63 = vld [vmem:[#allocation6 + $0x5ac] sm:$0xf0]  ;;  %1768 = vmatpush.bf16.msrb.mxu2 %v4221_v61 }
  0x3e   :  { %v3948_v56 = vld [vmem:[#allocation6 + $0x4a0] sm:$0xf]  ;;  %v5484_v58 = vor.u32 %v4902_v53, %v3324_v52  ;;  %v5120_v3 = vld [vmem:[#allocation6 + $0x6ac] sm:$0xf0]  ;;  %1782 = vmatpush.bf16.msrb.mxu3 %v4349_v2 }
  0x3f   :  { %v4076_v62 = vld [vmem:[#allocation6 + $0x5a0] sm:$0xf]  ;;  %v5152_v5 = vld [vmem:[#allocation6 + $0x7ac] sm:$0xf0]  ;;  %v3949_v9 = vor.u32 %v5056_v57, %v3948_v56 }
  0x40   :  { %v4204_v0 = vld [vmem:[#allocation6 + $0x6a0] sm:$0xf]  ;;  %1691 = vmatmul.bf16.vlgmr.msra.gmra.mxu0 %v5484_v58  ;;  %v4077_v12 = vor.u32 %v5088_v63, %v4076_v62  ;;  %v5052_v15 = vld [vmem:[#allocation6 + $0x48c] sm:$0xf0] }
  0x41   :  { %v4332_v4 = vld [vmem:[#allocation6 + $0x7a0] sm:$0xf]  ;;  %v4205_v13 = vor.u32 %v5120_v3, %v4204_v0  ;;  %v5084_v19 = vld [vmem:[#allocation6 + $0x58c] sm:$0xf0]  ;;  %1741 = vmatpush.bf16.msrb.mxu0 %v3949_v9  ;;  %v4934_v9 = vld [vmem:[#allocation6 + $0xe4] sm:$0xf] }
  0x42   :  { %v3932_v14 = vld [vmem:[#allocation6 + $0x480] sm:$0xf]  ;;  %v4333_v18 = vor.u32 %v5152_v5, %v4332_v4  ;;  %v5116_v21 = vld [vmem:[#allocation6 + $0x68c] sm:$0xf0]  ;;  %1755 = vmatpush.bf16.msrb.mxu1 %v4077_v12  ;;  %v3470_v12 = vld [vmem:[#allocation6 + $0xf0] sm:$0xf0] }
  0x43   :  { %v4060_v16 = vld [vmem:[#allocation6 + $0x580] sm:$0xf]  ;;  %v5148_v23 = vld [vmem:[#allocation6 + $0x78c] sm:$0xf0]  ;;  %v3933_v24 = vor.u32 %v5052_v15, %v3932_v14  ;;  %1769 = vmatpush.bf16.msrb.mxu2 %v4205_v13  ;;  %v4966_v13 = vld [vmem:[#allocation6 + $0x1e4] sm:$0xf] }
  0x44   :  { %v4188_v20 = vld [vmem:[#allocation6 + $0x680] sm:$0xf]  ;;  %v4061_v25 = vor.u32 %v5084_v19, %v4060_v16  ;;  %v5048_v28 = vld [vmem:[#allocation6 + $0x46c] sm:$0xf0]  ;;  %1783 = vmatpush.bf16.msrb.mxu3 %v4333_v18  ;;  %v3598_v14 = vld [vmem:[#allocation6 + $0x1f0] sm:$0xf0] }
  0x45   :  { %v4316_v22 = vld [vmem:[#allocation6 + $0x780] sm:$0xf]  ;;  %v4189_v26 = vor.u32 %v5116_v21, %v4188_v20  ;;  %v5080_v31 = vld [vmem:[#allocation6 + $0x56c] sm:$0xf0]  ;;  %1742 = vmatpush.bf16.msrb.mxu0 %v3933_v24  ;;  %v4998_v15 = vld [vmem:[#allocation6 + $0x2e4] sm:$0xf] }
  0x46   :  { %v3916_v27 = vld [vmem:[#allocation6 + $0x460] sm:$0xf]  ;;  %v4317_v30 = vor.u32 %v5148_v23, %v4316_v22  ;;  %v5112_v33 = vld [vmem:[#allocation6 + $0x66c] sm:$0xf0]  ;;  %1756 = vmatpush.bf16.msrb.mxu1 %v4061_v25  ;;  %v3726_v16 = vld [vmem:[#allocation6 + $0x2f0] sm:$0xf0] }
  0x47   :  { %v4044_v29 = vld [vmem:[#allocation6 + $0x560] sm:$0xf]  ;;  %v5144_v35 = vld [vmem:[#allocation6 + $0x76c] sm:$0xf0]  ;;  %v3917_v36 = vor.u32 %v5048_v28, %v3916_v27  ;;  %1770 = vmatpush.bf16.msrb.mxu2 %v4189_v26  ;;  %v5030_v18 = vld [vmem:[#allocation6 + $0x3e4] sm:$0xf] }
  0x48   :  { %v4172_v32 = vld [vmem:[#allocation6 + $0x660] sm:$0xf]  ;;  %v4045_v37 = vor.u32 %v5080_v31, %v4044_v29  ;;  %v5044_v40 = vld [vmem:[#allocation6 + $0x44c] sm:$0xf0]  ;;  %1784 = vmatpush.bf16.msrb.mxu3 %v4317_v30  ;;  %v3854_v20 = vld [vmem:[#allocation6 + $0x3f0] sm:$0xf0]  ;;  %v3473_v29 = vor.u32 %v4934_v9, %v3470_v12 }
  0x49   :  { %v4300_v34 = vld [vmem:[#allocation6 + $0x760] sm:$0xf]  ;;  %v4173_v38 = vor.u32 %v5112_v33, %v4172_v32  ;;  %v5076_v43 = vld [vmem:[#allocation6 + $0x54c] sm:$0xf0]  ;;  %1743 = vmatpush.bf16.msrb.mxu0 %v3917_v36  ;;  %v3348_v25 = vld [vmem:[#allocation3 + $0x18] sm:$0xf]  ;;  %v3601_v33 = vor.u32 %v4966_v13, %v3598_v14 }
  0x4a   :  { %v3900_v39 = vld [vmem:[#allocation6 + $0x440] sm:$0xf]  ;;  %v4301_v42 = vor.u32 %v5144_v35, %v4300_v34  ;;  %v5108_v45 = vld [vmem:[#allocation6 + $0x64c] sm:$0xf0]  ;;  %1757 = vmatpush.bf16.msrb.mxu1 %v4045_v37  ;;  %v4905_v26 = vld [vmem:[#allocation3 + $0x34] sm:$0xf0]  ;;  %v3729_v34 = vor.u32 %v4998_v15, %v3726_v16 }
  0x4b   :  { %v4028_v41 = vld [vmem:[#allocation6 + $0x540] sm:$0xf]  ;;  %v5140_v47 = vld [vmem:[#allocation6 + $0x74c] sm:$0xf0]  ;;  %v3901_v48 = vor.u32 %v5044_v40, %v3900_v39  ;;  %1771 = vmatpush.bf16.msrb.mxu2 %v4173_v38  ;;  %v4900_v27 = vld [vmem:[#allocation3 + $0x14] sm:$0xf]  ;;  %v3857_v38 = vor.u32 %v5030_v18, %v3854_v20 }
  0x4c   :  { %v4156_v44 = vld [vmem:[#allocation6 + $0x640] sm:$0xf]  ;;  %v4029_v50 = vor.u32 %v5076_v43, %v4028_v41  ;;  %v5040_v52 = vld [vmem:[#allocation6 + $0x42c] sm:$0xf0]  ;;  %1785 = vmatpush.bf16.msrb.mxu3 %v4301_v42  ;;  %v3342_v30 = vld [vmem:[#allocation3 + $0x30] sm:$0xf0]  ;;  %v5498_v43 = vor.u32 %v4905_v26, %v3348_v25 }
  0x4d   :  { %v4284_v46 = vld [vmem:[#allocation6 + $0x740] sm:$0xf]  ;;  %v4157_v51 = vor.u32 %v5108_v45, %v4156_v44  ;;  %v5072_v54 = vld [vmem:[#allocation6 + $0x52c] sm:$0xf0]  ;;  %1744 = vmatpush.bf16.msrb.mxu0 %v3901_v48  ;;  %v4901_v31 = vld [vmem:[#allocation3 + $0x1c] sm:$0xf]  ;;  %v5500_v44 = vor.u32 %v4900_v27, %v3342_v30 }
  0x4e   :  { %v3884_v49 = vld [vmem:[#allocation6 + $0x420] sm:$0xf]  ;;  %v4285_v55 = vor.u32 %v5140_v47, %v4284_v46  ;;  %v5104_v57 = vld [vmem:[#allocation6 + $0x62c] sm:$0xf0]  ;;  %1758 = vmatpush.bf16.msrb.mxu1 %v4029_v50  ;;  %v3350_v32 = vld [vmem:[#allocation3 + $0x38] sm:$0xf0] }
  0x4f   :  { %v4012_v53 = vld [vmem:[#allocation6 + $0x520] sm:$0xf]  ;;  %v5136_v60 = vld [vmem:[#allocation6 + $0x72c] sm:$0xf0]  ;;  %v3885_v63 = vor.u32 %v5040_v52, %v3884_v49  ;;  %1772 = vmatpush.bf16.msrb.mxu2 %v4157_v51  ;;  %v4930_v35 = vld [vmem:[#allocation6 + $0xc4] sm:$0xf]  ;;  %v5502_v47 = vor.u32 %v4901_v31, %v3350_v32 }
  0x50   :  { %v4140_v56 = vld [vmem:[#allocation6 + $0x620] sm:$0xf]  ;;  %v5036_v62 = vld [vmem:[#allocation6 + $0x40c] sm:$0xf0]  ;;  %v4013_v5 = vor.u32 %v5072_v54, %v4012_v53  ;;  %1786 = vmatpush.bf16.msrb.mxu3 %v4285_v55  ;;  %v3454_v36 = vld [vmem:[#allocation6 + $0xd0] sm:$0xf0] }
  0x51   :  { %v4268_v59 = vld [vmem:[#allocation6 + $0x720] sm:$0xf]  ;;  %v5068_v2 = vld [vmem:[#allocation6 + $0x50c] sm:$0xf0]  ;;  %v4141_v6 = vor.u32 %v5104_v57, %v4140_v56  ;;  %1745 = vmatpush.bf16.msrb.mxu0 %v3885_v63  ;;  %v4962_v37 = vld [vmem:[#allocation6 + $0x1c4] sm:$0xf]  ;;  %v3457_v48 = vor.u32 %v4930_v35, %v3454_v36 }
  0x52   :  { %v3868_v61 = vld [vmem:[#allocation6 + $0x400] sm:$0xf]  ;;  %v5100_v4 = vld [vmem:[#allocation6 + $0x60c] sm:$0xf0]  ;;  %v4269_v11 = vor.u32 %v5136_v60, %v4268_v59  ;;  %1759 = vmatpush.bf16.msrb.mxu1 %v4013_v5  ;;  %v3582_v40 = vld [vmem:[#allocation6 + $0x1d0] sm:$0xf0] }
  0x53   :  { %v3996_v0 = vld [vmem:[#allocation6 + $0x500] sm:$0xf]  ;;  %v5132_v8 = vld [vmem:[#allocation6 + $0x70c] sm:$0xf0]  ;;  %v3869_v19 = vor.u32 %v5036_v62, %v3868_v61  ;;  %1773 = vmatpush.bf16.msrb.mxu2 %v4141_v6  ;;  %v4994_v41 = vld [vmem:[#allocation6 + $0x2c4] sm:$0xf]  ;;  %v3585_v49 = vor.u32 %v4962_v37, %v3582_v40 }
  0x54   :  { %v4124_v3 = vld [vmem:[#allocation6 + $0x600] sm:$0xf]  ;;  %v3340_v21 = vld [vmem:[#allocation3 + $0x10] sm:$0xf]  ;;  %v3997_v23 = vor.u32 %v5068_v2, %v3996_v0  ;;  %1787 = vmatpush.bf16.msrb.mxu3 %v4269_v11  ;;  %v3710_v42 = vld [vmem:[#allocation6 + $0x2d0] sm:$0xf0] }
  0x55   :  { %v4252_v7 = vld [vmem:[#allocation6 + $0x700] sm:$0xf]  ;;  %v4904_v22 = vld [vmem:[#allocation3 + $0x2c] sm:$0xf0]  ;;  %v4125_v24 = vor.u32 %v5100_v4, %v4124_v3  ;;  %1746 = vmatpush.bf16.msrb.mxu0 %v3869_v19  ;;  %v5026_v45 = vld [vmem:[#allocation6 + $0x3c4] sm:$0xf]  ;;  %v3713_v50 = vor.u32 %v4994_v41, %v3710_v42 }
  0x56   :  { %v4253_v28 = vor.u32 %v5132_v8, %v4252_v7  ;;  %v5496_v39 = vor.u32 %v4904_v22, %v3340_v21  ;;  %1760 = vmatpush.bf16.msrb.mxu1 %v3997_v23  ;;  %v3838_v46 = vld [vmem:[#allocation6 + $0x3d0] sm:$0xf0]  ;;  %v4926_v51 = vld [vmem:[#allocation6 + $0xa4] sm:$0xf] }
  0x57   :  { %1774 = vmatpush.bf16.msrb.mxu2 %v4125_v24  ;;  %v3438_v52 = vld [vmem:[#allocation6 + $0xb0] sm:$0xf0]  ;;  %v4958_v53 = vld [vmem:[#allocation6 + $0x1a4] sm:$0xf]  ;;  %v3841_v54 = vor.u32 %v5026_v45, %v3838_v46 }
  0x58   :  { %1788 = vmatpush.bf16.msrb.mxu3 %v4253_v28  ;;  %1747 = vmatmul.bf16.vlgmr.msrb.gmra.mxu0 %v5496_v39  ;;  %v3566_v55 = vld [vmem:[#allocation6 + $0x1b0] sm:$0xf0]  ;;  %v4990_v56 = vld [vmem:[#allocation6 + $0x2a4] sm:$0xf]  ;;  %v3441_v61 = vor.u32 %v4926_v51, %v3438_v52 }
  0x59   :  { %1795 = vmatpush.bf16.msra.mxu0 %v3473_v29  ;;  %v3694_v57 = vld [vmem:[#allocation6 + $0x2b0] sm:$0xf0]  ;;  %1761 = vmatmul.bf16.vlgmr.msrb.gmra.mxu1 %v5500_v44  ;;  %v5022_v59 = vld [vmem:[#allocation6 + $0x3a4] sm:$0xf]  ;;  %v3569_v62 = vor.u32 %v4958_v53, %v3566_v55 }
  0x5a   :  { %1809 = vmatpush.bf16.msra.mxu1 %v3601_v33  ;;  %1775 = vmatmul.bf16.vlgmr.msrb.gmra.mxu2 %v5498_v43  ;;  %v3822_v60 = vld [vmem:[#allocation6 + $0x3b0] sm:$0xf0]  ;;  %v3697_v63 = vor.u32 %v4990_v56, %v3694_v57  ;;  %v4922_v0 = vld [vmem:[#allocation6 + $0x84] sm:$0xf] }
  0x5b   :  { %1823 = vmatpush.bf16.msra.mxu2 %v3729_v34  ;;  %1789 = vmatmul.bf16.vlgmr.msrb.gmra.mxu3 %v5502_v47  ;;  %v3422_v2 = vld [vmem:[#allocation6 + $0x90] sm:$0xf0]  ;;  %v4954_v3 = vld [vmem:[#allocation6 + $0x184] sm:$0xf]  ;;  %v3825_v4 = vor.u32 %v5022_v59, %v3822_v60 }
  0x5c   :  { %1837 = vmatpush.bf16.msra.mxu3 %v3857_v38  ;;  %v3550_v5 = vld [vmem:[#allocation6 + $0x190] sm:$0xf0]  ;;  %v4986_v6 = vld [vmem:[#allocation6 + $0x284] sm:$0xf]  ;;  %v3425_v11 = vor.u32 %v4922_v0, %v3422_v2 }
  0x5d   :  { %1796 = vmatpush.bf16.msra.mxu0 %v3457_v48  ;;  %v3678_v7 = vld [vmem:[#allocation6 + $0x290] sm:$0xf0]  ;;  %v5018_v8 = vld [vmem:[#allocation6 + $0x384] sm:$0xf]  ;;  %v3553_v12 = vor.u32 %v4954_v3, %v3550_v5 }
  0x5e   :  { %1810 = vmatpush.bf16.msra.mxu1 %v3585_v49  ;;  %v3806_v9 = vld [vmem:[#allocation6 + $0x390] sm:$0xf0]  ;;  %v3681_v13 = vor.u32 %v4986_v6, %v3678_v7  ;;  %v4918_v14 = vld [vmem:[#allocation6 + $0x64] sm:$0xf] }
  0x5f   :  { %1824 = vmatpush.bf16.msra.mxu2 %v3713_v50  ;;  %v3406_v15 = vld [vmem:[#allocation6 + $0x70] sm:$0xf0]  ;;  %v4950_v16 = vld [vmem:[#allocation6 + $0x164] sm:$0xf]  ;;  %v3809_v18 = vor.u32 %v5018_v8, %v3806_v9 }
  0x60   :  { %1838 = vmatpush.bf16.msra.mxu3 %v3841_v54  ;;  %v3534_v19 = vld [vmem:[#allocation6 + $0x170] sm:$0xf0]  ;;  %v4982_v20 = vld [vmem:[#allocation6 + $0x264] sm:$0xf]  ;;  %v3409_v24 = vor.u32 %v4918_v14, %v3406_v15 }
  0x61   :  { %1797 = vmatpush.bf16.msra.mxu0 %v3441_v61  ;;  %v3662_v21 = vld [vmem:[#allocation6 + $0x270] sm:$0xf0]  ;;  %v5014_v22 = vld [vmem:[#allocation6 + $0x364] sm:$0xf]  ;;  %v3537_v25 = vor.u32 %v4950_v16, %v3534_v19 }
  0x62   :  { %1811 = vmatpush.bf16.msra.mxu1 %v3569_v62  ;;  %v3790_v23 = vld [vmem:[#allocation6 + $0x370] sm:$0xf0]  ;;  %v3665_v26 = vor.u32 %v4982_v20, %v3662_v21  ;;  %v4914_v27 = vld [vmem:[#allocation6 + $0x44] sm:$0xf] }
  0x63   :  { %1825 = vmatpush.bf16.msra.mxu2 %v3697_v63  ;;  %v3390_v28 = vld [vmem:[#allocation6 + $0x50] sm:$0xf0]  ;;  %v4946_v29 = vld [vmem:[#allocation6 + $0x144] sm:$0xf]  ;;  %v3793_v30 = vor.u32 %v5014_v22, %v3790_v23 }
  0x64   :  { %1839 = vmatpush.bf16.msra.mxu3 %v3825_v4  ;;  %v3518_v31 = vld [vmem:[#allocation6 + $0x150] sm:$0xf0]  ;;  %v4978_v32 = vld [vmem:[#allocation6 + $0x244] sm:$0xf]  ;;  %v3393_v36 = vor.u32 %v4914_v27, %v3390_v28 }
  0x65   :  { %1798 = vmatpush.bf16.msra.mxu0 %v3425_v11  ;;  %v3646_v33 = vld [vmem:[#allocation6 + $0x250] sm:$0xf0]  ;;  %v5010_v34 = vld [vmem:[#allocation6 + $0x344] sm:$0xf]  ;;  %v3521_v37 = vor.u32 %v4946_v29, %v3518_v31 }
  0x66   :  { %1812 = vmatpush.bf16.msra.mxu1 %v3553_v12  ;;  %v3774_v35 = vld [vmem:[#allocation6 + $0x350] sm:$0xf0]  ;;  %v3649_v38 = vor.u32 %v4978_v32, %v3646_v33  ;;  %v4910_v40 = vld [vmem:[#allocation6 + $0x24] sm:$0xf] }
  0x67   :  { %1826 = vmatpush.bf16.msra.mxu2 %v3681_v13  ;;  %v3374_v41 = vld [vmem:[#allocation6 + $0x30] sm:$0xf0]  ;;  %v4942_v42 = vld [vmem:[#allocation6 + $0x124] sm:$0xf]  ;;  %v3777_v45 = vor.u32 %v5010_v34, %v3774_v35 }
  0x68   :  { %1840 = vmatpush.bf16.msra.mxu3 %v3809_v18  ;;  %v3502_v46 = vld [vmem:[#allocation6 + $0x130] sm:$0xf0]  ;;  %v4974_v48 = vld [vmem:[#allocation6 + $0x224] sm:$0xf]  ;;  %v3377_v52 = vor.u32 %v4910_v40, %v3374_v41 }
  0x69   :  { %1799 = vmatpush.bf16.msra.mxu0 %v3409_v24  ;;  %v3630_v49 = vld [vmem:[#allocation6 + $0x230] sm:$0xf0]  ;;  %v5006_v50 = vld [vmem:[#allocation6 + $0x324] sm:$0xf]  ;;  %v3505_v55 = vor.u32 %v4942_v42, %v3502_v46 }
  0x6a   :  { %1813 = vmatpush.bf16.msra.mxu1 %v3537_v25  ;;  %v3758_v51 = vld [vmem:[#allocation6 + $0x330] sm:$0xf0]  ;;  %v4906_v53 = vld [vmem:[#allocation6 + $0x4] sm:$0xf]  ;;  %v3633_v56 = vor.u32 %v4974_v48, %v3630_v49 }
  0x6b   :  { %1827 = vmatpush.bf16.msra.mxu2 %v3665_v26  ;;  %v3358_v54 = vld [vmem:[#allocation6 + $0x10] sm:$0xf0]  ;;  %v4938_v57 = vld [vmem:[#allocation6 + $0x104] sm:$0xf]  ;;  %v3761_v61 = vor.u32 %v5006_v50, %v3758_v51 }
  0x6c   :  { %1841 = vmatpush.bf16.msra.mxu3 %v3793_v30  ;;  %v3486_v59 = vld [vmem:[#allocation6 + $0x110] sm:$0xf0]  ;;  %v4970_v60 = vld [vmem:[#allocation6 + $0x204] sm:$0xf]  ;;  %v3361_v5 = vor.u32 %v4906_v53, %v3358_v54 }
  0x6d   :  { %1800 = vmatpush.bf16.msra.mxu0 %v3393_v36  ;;  %v3614_v62 = vld [vmem:[#allocation6 + $0x210] sm:$0xf0]  ;;  %v5002_v63 = vld [vmem:[#allocation6 + $0x304] sm:$0xf]  ;;  %v3489_v9 = vor.u32 %v4938_v57, %v3486_v59 }
  0x6e   :  { %1814 = vmatpush.bf16.msra.mxu1 %v3521_v37  ;;  %v3742_v0 = vld [vmem:[#allocation6 + $0x310] sm:$0xf0]  ;;  %v5062_v2 = vld [vmem:[#allocation6 + $0x4e4] sm:$0xf]  ;;  %v3617_v11 = vor.u32 %v4970_v60, %v3614_v62 }
  0x6f   :  { %1828 = vmatpush.bf16.msra.mxu2 %v3649_v38  ;;  %v3982_v3 = vld [vmem:[#allocation6 + $0x4f0] sm:$0xf0]  ;;  %v5094_v4 = vld [vmem:[#allocation6 + $0x5e4] sm:$0xf]  ;;  %v3745_v14 = vor.u32 %v5002_v63, %v3742_v0 }
  0x70   :  { %1842 = vmatpush.bf16.msra.mxu3 %v3777_v45  ;;  %v4110_v6 = vld [vmem:[#allocation6 + $0x5f0] sm:$0xf0]  ;;  %v5126_v7 = vld [vmem:[#allocation6 + $0x6e4] sm:$0xf]  ;;  %v3985_v15 = vor.u32 %v5062_v2, %v3982_v3 }
  0x71   :  { %1801 = vmatpush.bf16.msra.mxu0 %v3377_v52  ;;  %v4238_v8 = vld [vmem:[#allocation6 + $0x6f0] sm:$0xf0]  ;;  %v5158_v12 = vld [vmem:[#allocation6 + $0x7e4] sm:$0xf]  ;;  %v4113_v16 = vor.u32 %v5094_v4, %v4110_v6 }
  0x72   :  { %1815 = vmatpush.bf16.msra.mxu1 %v3505_v55  ;;  %v4366_v13 = vld [vmem:[#allocation6 + $0x7f0] sm:$0xf0]  ;;  %v4241_v18 = vor.u32 %v5126_v7, %v4238_v8  ;;  %v5058_v19 = vld [vmem:[#allocation6 + $0x4c4] sm:$0xf] }
  0x73   :  { %1829 = vmatpush.bf16.msra.mxu2 %v3633_v56  ;;  %v3966_v20 = vld [vmem:[#allocation6 + $0x4d0] sm:$0xf0]  ;;  %v5090_v21 = vld [vmem:[#allocation6 + $0x5c4] sm:$0xf]  ;;  %v4369_v22 = vor.u32 %v5158_v12, %v4366_v13 }
  0x74   :  { %1843 = vmatpush.bf16.msra.mxu3 %v3761_v61  ;;  %v4094_v23 = vld [vmem:[#allocation6 + $0x5d0] sm:$0xf0]  ;;  %v5122_v24 = vld [vmem:[#allocation6 + $0x6c4] sm:$0xf]  ;;  %v3969_v28 = vor.u32 %v5058_v19, %v3966_v20 }
  0x75   :  { %1802 = vmatpush.bf16.msra.mxu0 %v3361_v5  ;;  %v4222_v25 = vld [vmem:[#allocation6 + $0x6d0] sm:$0xf0]  ;;  %v5154_v26 = vld [vmem:[#allocation6 + $0x7c4] sm:$0xf]  ;;  %v4097_v29 = vor.u32 %v5090_v21, %v4094_v23 }
  0x76   :  { %1816 = vmatpush.bf16.msra.mxu1 %v3489_v9  ;;  %v4350_v27 = vld [vmem:[#allocation6 + $0x7d0] sm:$0xf0]  ;;  %v4225_v30 = vor.u32 %v5122_v24, %v4222_v25  ;;  %v5054_v31 = vld [vmem:[#allocation6 + $0x4a4] sm:$0xf] }
  0x77   :  { %1830 = vmatpush.bf16.msra.mxu2 %v3617_v11  ;;  %v3950_v32 = vld [vmem:[#allocation6 + $0x4b0] sm:$0xf0]  ;;  %v5086_v33 = vld [vmem:[#allocation6 + $0x5a4] sm:$0xf]  ;;  %v4353_v34 = vor.u32 %v5154_v26, %v4350_v27 }
  0x78   :  { %1844 = vmatpush.bf16.msra.mxu3 %v3745_v14  ;;  %v4078_v35 = vld [vmem:[#allocation6 + $0x5b0] sm:$0xf0]  ;;  %v5118_v36 = vld [vmem:[#allocation6 + $0x6a4] sm:$0xf]  ;;  %1803 = vmatmul.bf16.vlgmr.msra.gmra.mxu0 %v5484_v58  ;;  %v3953_v41 = vor.u32 %v5054_v31, %v3950_v32 }
  0x79   :  { %1851 = vmatpush.bf16.msrb.mxu0 %v3985_v15  ;;  %v4206_v37 = vld [vmem:[#allocation6 + $0x6b0] sm:$0xf0]  ;;  %v5150_v38 = vld [vmem:[#allocation6 + $0x7a4] sm:$0xf]  ;;  %1817 = vmatmul.bf16.vlgmr.msra.gmra.mxu1 %v5490_v10  ;;  %v4081_v42 = vor.u32 %v5086_v33, %v4078_v35 }
  0x7a   :  { %1865 = vmatpush.bf16.msrb.mxu1 %v4113_v16  ;;  %v4334_v40 = vld [vmem:[#allocation6 + $0x7b0] sm:$0xf0]  ;;  %1831 = vmatmul.bf16.vlgmr.msra.gmra.mxu2 %v5486_v1  ;;  %v4209_v45 = vor.u32 %v5118_v36, %v4206_v37  ;;  %v5050_v46 = vld [vmem:[#allocation6 + $0x484] sm:$0xf] }
  0x7b   :  { %1879 = vmatpush.bf16.msrb.mxu2 %v4241_v18  ;;  %1845 = vmatmul.bf16.vlgmr.msra.gmra.mxu3 %v5492_v17  ;;  %v3934_v48 = vld [vmem:[#allocation6 + $0x490] sm:$0xf0]  ;;  %v5082_v49 = vld [vmem:[#allocation6 + $0x584] sm:$0xf]  ;;  %v4337_v50 = vor.u32 %v5150_v38, %v4334_v40 }
  0x7c   :  { %1893 = vmatpush.bf16.msrb.mxu3 %v4369_v22  ;;  %v4062_v51 = vld [vmem:[#allocation6 + $0x590] sm:$0xf0]  ;;  %v5114_v52 = vld [vmem:[#allocation6 + $0x684] sm:$0xf]  ;;  %v3937_v56 = vor.u32 %v5050_v46, %v3934_v48  ;;  %v3476_v48 = vld [vmem:[#allocation6 + $0xe8] sm:$0xf] }
  0x7d   :  { %1852 = vmatpush.bf16.msrb.mxu0 %v3969_v28  ;;  %v4190_v53 = vld [vmem:[#allocation6 + $0x690] sm:$0xf0]  ;;  %v5146_v54 = vld [vmem:[#allocation6 + $0x784] sm:$0xf]  ;;  %v4065_v57 = vor.u32 %v5082_v49, %v4062_v51  ;;  %v4937_v49 = vld [vmem:[#allocation6 + $0xf4] sm:$0xf0] }
  0x7e   :  { %1866 = vmatpush.bf16.msrb.mxu1 %v4097_v29  ;;  %v4318_v55 = vld [vmem:[#allocation6 + $0x790] sm:$0xf0]  ;;  %v4193_v59 = vor.u32 %v5114_v52, %v4190_v53  ;;  %v5046_v60 = vld [vmem:[#allocation6 + $0x464] sm:$0xf]  ;;  %v4969_v52 = vld [vmem:[#allocation6 + $0x1f4] sm:$0xf0] }
  0x7f   :  { %1880 = vmatpush.bf16.msrb.mxu2 %v4225_v30  ;;  %v3918_v61 = vld [vmem:[#allocation6 + $0x470] sm:$0xf0]  ;;  %v5078_v62 = vld [vmem:[#allocation6 + $0x564] sm:$0xf]  ;;  %v4321_v63 = vor.u32 %v5146_v54, %v4318_v55  ;;  %v3732_v53 = vld [vmem:[#allocation6 + $0x2e8] sm:$0xf] }
  0x80   :  { %1894 = vmatpush.bf16.msrb.mxu3 %v4353_v34  ;;  %v4046_v0 = vld [vmem:[#allocation6 + $0x570] sm:$0xf0]  ;;  %v5110_v2 = vld [vmem:[#allocation6 + $0x664] sm:$0xf]  ;;  %v3921_v6 = vor.u32 %v5046_v60, %v3918_v61  ;;  %v5001_v54 = vld [vmem:[#allocation6 + $0x2f4] sm:$0xf0]  ;;  %v3477_v61 = vor.u32 %v4937_v49, %v3476_v48 }
  0x81   :  { %1853 = vmatpush.bf16.msrb.mxu0 %v3953_v41  ;;  %v4174_v3 = vld [vmem:[#allocation6 + $0x670] sm:$0xf0]  ;;  %v5142_v4 = vld [vmem:[#allocation6 + $0x764] sm:$0xf]  ;;  %v4049_v7 = vor.u32 %v5078_v62, %v4046_v0  ;;  %v3460_v0 = vld [vmem:[#allocation6 + $0xc8] sm:$0xf] }
  0x82   :  { %1867 = vmatpush.bf16.msrb.mxu1 %v4081_v42  ;;  %v4302_v5 = vld [vmem:[#allocation6 + $0x770] sm:$0xf0]  ;;  %v4177_v8 = vor.u32 %v5110_v2, %v4174_v3  ;;  %v5042_v9 = vld [vmem:[#allocation6 + $0x444] sm:$0xf]  ;;  %v4933_v2 = vld [vmem:[#allocation6 + $0xd4] sm:$0xf0] }
  0x83   :  { %1881 = vmatpush.bf16.msrb.mxu2 %v4209_v45  ;;  %v3902_v11 = vld [vmem:[#allocation6 + $0x450] sm:$0xf0]  ;;  %v5074_v12 = vld [vmem:[#allocation6 + $0x544] sm:$0xf]  ;;  %v4305_v13 = vor.u32 %v5142_v4, %v4302_v5  ;;  %v3588_v3 = vld [vmem:[#allocation6 + $0x1c8] sm:$0xf] }
  0x84   :  { %1895 = vmatpush.bf16.msrb.mxu3 %v4337_v50  ;;  %v4030_v14 = vld [vmem:[#allocation6 + $0x550] sm:$0xf0]  ;;  %v5106_v15 = vld [vmem:[#allocation6 + $0x644] sm:$0xf]  ;;  %v3905_v20 = vor.u32 %v5042_v9, %v3902_v11  ;;  %v3604_v50 = vld [vmem:[#allocation6 + $0x1e8] sm:$0xf]  ;;  %v3461_v11 = vor.u32 %v4933_v2, %v3460_v0 }
  0x85   :  { %1854 = vmatpush.bf16.msrb.mxu0 %v3937_v56  ;;  %v4158_v16 = vld [vmem:[#allocation6 + $0x650] sm:$0xf0]  ;;  %v5138_v18 = vld [vmem:[#allocation6 + $0x744] sm:$0xf]  ;;  %v4033_v21 = vor.u32 %v5074_v12, %v4030_v14  ;;  %v3605_v62 = vor.u32 %v4969_v52, %v3604_v50  ;;  %v4965_v5 = vld [vmem:[#allocation6 + $0x1d4] sm:$0xf0] }
  0x86   :  { %1868 = vmatpush.bf16.msrb.mxu1 %v4065_v57  ;;  %v4286_v19 = vld [vmem:[#allocation6 + $0x750] sm:$0xf0]  ;;  %v4161_v22 = vor.u32 %v5106_v15, %v4158_v16  ;;  %v5038_v23 = vld [vmem:[#allocation6 + $0x424] sm:$0xf]  ;;  %v3860_v57 = vld [vmem:[#allocation6 + $0x3e8] sm:$0xf]  ;;  %v3589_v12 = vor.u32 %v4965_v5, %v3588_v3 }
  0x87   :  { %1882 = vmatpush.bf16.msrb.mxu2 %v4193_v59  ;;  %v3886_v24 = vld [vmem:[#allocation6 + $0x430] sm:$0xf0]  ;;  %v5070_v25 = vld [vmem:[#allocation6 + $0x524] sm:$0xf]  ;;  %v4289_v26 = vor.u32 %v5138_v18, %v4286_v19  ;;  %v5033_v59 = vld [vmem:[#allocation6 + $0x3f4] sm:$0xf0] }
  0x88   :  { %1896 = vmatpush.bf16.msrb.mxu3 %v4321_v63  ;;  %v4014_v27 = vld [vmem:[#allocation6 + $0x530] sm:$0xf0]  ;;  %v5102_v28 = vld [vmem:[#allocation6 + $0x624] sm:$0xf]  ;;  %v3889_v32 = vor.u32 %v5038_v23, %v3886_v24  ;;  %v3733_v63 = vor.u32 %v5001_v54, %v3732_v53  ;;  %v3861_v4 = vor.u32 %v5033_v59, %v3860_v57  ;;  %v5029_v9 = vld [vmem:[#allocation6 + $0x3d4] sm:$0xf0] }
  0x89   :  { %1855 = vmatpush.bf16.msrb.mxu0 %v3921_v6  ;;  %v4142_v29 = vld [vmem:[#allocation6 + $0x630] sm:$0xf0]  ;;  %v5134_v30 = vld [vmem:[#allocation6 + $0x724] sm:$0xf]  ;;  %v4017_v35 = vor.u32 %v5070_v25, %v4014_v27  ;;  %v3716_v6 = vld [vmem:[#allocation6 + $0x2c8] sm:$0xf] }
  0x8a   :  { %1869 = vmatpush.bf16.msrb.mxu1 %v4049_v7  ;;  %v4270_v31 = vld [vmem:[#allocation6 + $0x730] sm:$0xf0]  ;;  %v5034_v33 = vld [vmem:[#allocation6 + $0x404] sm:$0xf]  ;;  %v4145_v36 = vor.u32 %v5102_v28, %v4142_v29  ;;  %v4997_v7 = vld [vmem:[#allocation6 + $0x2d4] sm:$0xf0] }
  0x8b   :  { %1883 = vmatpush.bf16.msrb.mxu2 %v4177_v8  ;;  %v3870_v34 = vld [vmem:[#allocation6 + $0x410] sm:$0xf0]  ;;  %v5066_v37 = vld [vmem:[#allocation6 + $0x504] sm:$0xf]  ;;  %v4273_v41 = vor.u32 %v5134_v30, %v4270_v31  ;;  %v3844_v8 = vld [vmem:[#allocation6 + $0x3c8] sm:$0xf] }
  0x8c   :  { %1897 = vmatpush.bf16.msrb.mxu3 %v4305_v13  ;;  %v3998_v38 = vld [vmem:[#allocation6 + $0x510] sm:$0xf0]  ;;  %v5098_v40 = vld [vmem:[#allocation6 + $0x604] sm:$0xf]  ;;  %v3873_v51 = vor.u32 %v5034_v33, %v3870_v34  ;;  %v3717_v13 = vor.u32 %v4997_v7, %v3716_v6  ;;  %v3444_v14 = vld [vmem:[#allocation6 + $0xa8] sm:$0xf]  ;;  %v3845_v18 = vor.u32 %v5029_v9, %v3844_v8 }
  0x8d   :  { %1856 = vmatpush.bf16.msrb.mxu0 %v3905_v20  ;;  %v4126_v42 = vld [vmem:[#allocation6 + $0x610] sm:$0xf0]  ;;  %v5130_v45 = vld [vmem:[#allocation6 + $0x704] sm:$0xf]  ;;  %v4001_v55 = vor.u32 %v5066_v37, %v3998_v38  ;;  %v4929_v15 = vld [vmem:[#allocation6 + $0xb4] sm:$0xf0] }
  0x8e   :  { %1870 = vmatpush.bf16.msrb.mxu1 %v4033_v21  ;;  %v4254_v46 = vld [vmem:[#allocation6 + $0x710] sm:$0xf0]  ;;  %v4129_v56 = vor.u32 %v5098_v40, %v4126_v42  ;;  %v3572_v16 = vld [vmem:[#allocation6 + $0x1a8] sm:$0xf]  ;;  %v4961_v19 = vld [vmem:[#allocation6 + $0x1b4] sm:$0xf0]  ;;  %v3445_v24 = vor.u32 %v4929_v15, %v3444_v14 }
  0x8f   :  { %1884 = vmatpush.bf16.msrb.mxu2 %v4161_v22  ;;  %v4257_v60 = vor.u32 %v5130_v45, %v4254_v46  ;;  %v3700_v20 = vld [vmem:[#allocation6 + $0x2a8] sm:$0xf]  ;;  %v4993_v21 = vld [vmem:[#allocation6 + $0x2b4] sm:$0xf0]  ;;  %v3573_v25 = vor.u32 %v4961_v19, %v3572_v16 }
  0x90   :  { %1898 = vmatpush.bf16.msrb.mxu3 %v4289_v26  ;;  %v3828_v22 = vld [vmem:[#allocation6 + $0x3a8] sm:$0xf]  ;;  %v5025_v23 = vld [vmem:[#allocation6 + $0x3b4] sm:$0xf0]  ;;  %v3701_v26 = vor.u32 %v4993_v21, %v3700_v20 }
  0x91   :  { %1857 = vmatpush.bf16.msrb.mxu0 %v3889_v32  ;;  %v3428_v27 = vld [vmem:[#allocation6 + $0x88] sm:$0xf]  ;;  %v4925_v28 = vld [vmem:[#allocation6 + $0x94] sm:$0xf0]  ;;  %v3829_v30 = vor.u32 %v5025_v23, %v3828_v22 }
  0x92   :  { %1871 = vmatpush.bf16.msrb.mxu1 %v4017_v35  ;;  %v3556_v29 = vld [vmem:[#allocation6 + $0x188] sm:$0xf]  ;;  %v4957_v31 = vld [vmem:[#allocation6 + $0x194] sm:$0xf0] }
  0x93   :  { %1885 = vmatpush.bf16.msrb.mxu2 %v4145_v36  ;;  %v3684_v32 = vld [vmem:[#allocation6 + $0x288] sm:$0xf]  ;;  %v4989_v33 = vld [vmem:[#allocation6 + $0x294] sm:$0xf0]  ;;  %v3429_v36 = vor.u32 %v4925_v28, %v3428_v27  ;;  %v3557_v37 = vor.u32 %v4957_v31, %v3556_v29 }
  0x94   :  { %1899 = vmatpush.bf16.msrb.mxu3 %v4273_v41  ;;  %v3812_v34 = vld [vmem:[#allocation6 + $0x388] sm:$0xf]  ;;  %v5021_v35 = vld [vmem:[#allocation6 + $0x394] sm:$0xf0]  ;;  %v3685_v38 = vor.u32 %v4989_v33, %v3684_v32 }
  0x95   :  { %1858 = vmatpush.bf16.msrb.mxu0 %v3873_v51  ;;  %v3412_v40 = vld [vmem:[#allocation6 + $0x68] sm:$0xf]  ;;  %v4921_v41 = vld [vmem:[#allocation6 + $0x74] sm:$0xf0]  ;;  %v3813_v45 = vor.u32 %v5021_v35, %v3812_v34 }
  0x96   :  { %1872 = vmatpush.bf16.msrb.mxu1 %v4001_v55  ;;  %v3540_v42 = vld [vmem:[#allocation6 + $0x168] sm:$0xf]  ;;  %v4953_v46 = vld [vmem:[#allocation6 + $0x174] sm:$0xf0]  ;;  %v3413_v52 = vor.u32 %v4921_v41, %v3412_v40 }
  0x97   :  { %1886 = vmatpush.bf16.msrb.mxu2 %v4129_v56  ;;  %v3668_v48 = vld [vmem:[#allocation6 + $0x268] sm:$0xf]  ;;  %v4985_v49 = vld [vmem:[#allocation6 + $0x274] sm:$0xf0]  ;;  %v3541_v53 = vor.u32 %v4953_v46, %v3540_v42 }
  0x98   :  { %1900 = vmatpush.bf16.msrb.mxu3 %v4257_v60  ;;  %1859 = vmatmul.bf16.vlgmr.msrb.gmra.mxu0 %v5496_v39  ;;  %v3796_v50 = vld [vmem:[#allocation6 + $0x368] sm:$0xf]  ;;  %v5017_v51 = vld [vmem:[#allocation6 + $0x374] sm:$0xf0]  ;;  %v3669_v54 = vor.u32 %v4985_v49, %v3668_v48 }
  0x99   :  { %1907 = vmatpush.bf16.msra.mxu0 %v3477_v61  ;;  %1873 = vmatmul.bf16.vlgmr.msrb.gmra.mxu1 %v5500_v44  ;;  %v3396_v55 = vld [vmem:[#allocation6 + $0x48] sm:$0xf]  ;;  %v4917_v56 = vld [vmem:[#allocation6 + $0x54] sm:$0xf0]  ;;  %v3797_v59 = vor.u32 %v5017_v51, %v3796_v50 }
  0x9a   :  { %1921 = vmatpush.bf16.msra.mxu1 %v3605_v62  ;;  %1887 = vmatmul.bf16.vlgmr.msrb.gmra.mxu2 %v5498_v43  ;;  %v3524_v57 = vld [vmem:[#allocation6 + $0x148] sm:$0xf]  ;;  %v4949_v60 = vld [vmem:[#allocation6 + $0x154] sm:$0xf0]  ;;  %v3397_v2 = vor.u32 %v4917_v56, %v3396_v55 }
  0x9b   :  { %1935 = vmatpush.bf16.msra.mxu2 %v3733_v63  ;;  %1901 = vmatmul.bf16.vlgmr.msrb.gmra.mxu3 %v5502_v47  ;;  %v3652_v61 = vld [vmem:[#allocation6 + $0x248] sm:$0xf]  ;;  %v4981_v62 = vld [vmem:[#allocation6 + $0x254] sm:$0xf0]  ;;  %v3525_v3 = vor.u32 %v4949_v60, %v3524_v57 }
  0x9c   :  { %1949 = vmatpush.bf16.msra.mxu3 %v3861_v4  ;;  %v3780_v63 = vld [vmem:[#allocation6 + $0x348] sm:$0xf]  ;;  %v5013_v0 = vld [vmem:[#allocation6 + $0x354] sm:$0xf0]  ;;  %v3653_v4 = vor.u32 %v4981_v62, %v3652_v61 }
  0x9d   :  { %1908 = vmatpush.bf16.msra.mxu0 %v3461_v11  ;;  %v3380_v5 = vld [vmem:[#allocation6 + $0x28] sm:$0xf]  ;;  %v4913_v6 = vld [vmem:[#allocation6 + $0x34] sm:$0xf0]  ;;  %v3781_v8 = vor.u32 %v5013_v0, %v3780_v63 }
  0x9e   :  { %1922 = vmatpush.bf16.msra.mxu1 %v3589_v12  ;;  %v3508_v7 = vld [vmem:[#allocation6 + $0x128] sm:$0xf]  ;;  %v4945_v9 = vld [vmem:[#allocation6 + $0x134] sm:$0xf0]  ;;  %v3381_v15 = vor.u32 %v4913_v6, %v3380_v5 }
  0x9f   :  { %1936 = vmatpush.bf16.msra.mxu2 %v3717_v13  ;;  %v3636_v11 = vld [vmem:[#allocation6 + $0x228] sm:$0xf]  ;;  %v4977_v12 = vld [vmem:[#allocation6 + $0x234] sm:$0xf0]  ;;  %v3509_v19 = vor.u32 %v4945_v9, %v3508_v7 }
  0xa0   :  { %1950 = vmatpush.bf16.msra.mxu3 %v3845_v18  ;;  %v3764_v13 = vld [vmem:[#allocation6 + $0x328] sm:$0xf]  ;;  %v5009_v14 = vld [vmem:[#allocation6 + $0x334] sm:$0xf0]  ;;  %v3637_v20 = vor.u32 %v4977_v12, %v3636_v11 }
  0xa1   :  { %1909 = vmatpush.bf16.msra.mxu0 %v3445_v24  ;;  %v3364_v16 = vld [vmem:[#allocation6 + $0x8] sm:$0xf]  ;;  %v4909_v18 = vld [vmem:[#allocation6 + $0x14] sm:$0xf0]  ;;  %v3765_v24 = vor.u32 %v5009_v14, %v3764_v13 }
  0xa2   :  { %1923 = vmatpush.bf16.msra.mxu1 %v3573_v25  ;;  %v3492_v21 = vld [vmem:[#allocation6 + $0x108] sm:$0xf]  ;;  %v4941_v22 = vld [vmem:[#allocation6 + $0x114] sm:$0xf0]  ;;  %v3365_v31 = vor.u32 %v4909_v18, %v3364_v16 }
  0xa3   :  { %1937 = vmatpush.bf16.msra.mxu2 %v3701_v26  ;;  %v3620_v23 = vld [vmem:[#allocation6 + $0x208] sm:$0xf]  ;;  %v4973_v25 = vld [vmem:[#allocation6 + $0x214] sm:$0xf0]  ;;  %v3493_v35 = vor.u32 %v4941_v22, %v3492_v21 }
  0xa4   :  { %1951 = vmatpush.bf16.msra.mxu3 %v3829_v30  ;;  %v3748_v26 = vld [vmem:[#allocation6 + $0x308] sm:$0xf]  ;;  %v5005_v27 = vld [vmem:[#allocation6 + $0x314] sm:$0xf0] }
  0xa5   :  { %1910 = vmatpush.bf16.msra.mxu0 %v3429_v36  ;;  %v3988_v28 = vld [vmem:[#allocation6 + $0x4e8] sm:$0xf]  ;;  %v5065_v29 = vld [vmem:[#allocation6 + $0x4f4] sm:$0xf0]  ;;  %v3621_v36 = vor.u32 %v4973_v25, %v3620_v23  ;;  %v3749_v40 = vor.u32 %v5005_v27, %v3748_v26 }
  0xa6   :  { %1924 = vmatpush.bf16.msra.mxu1 %v3557_v37  ;;  %v4116_v30 = vld [vmem:[#allocation6 + $0x5e8] sm:$0xf]  ;;  %v5097_v32 = vld [vmem:[#allocation6 + $0x5f4] sm:$0xf0]  ;;  %v3989_v41 = vor.u32 %v5065_v29, %v3988_v28 }
  0xa7   :  { %1938 = vmatpush.bf16.msra.mxu2 %v3685_v38  ;;  %v4244_v33 = vld [vmem:[#allocation6 + $0x6e8] sm:$0xf]  ;;  %v5129_v34 = vld [vmem:[#allocation6 + $0x6f4] sm:$0xf0]  ;;  %v4117_v42 = vor.u32 %v5097_v32, %v4116_v30 }
  0xa8   :  { %1952 = vmatpush.bf16.msra.mxu3 %v3813_v45  ;;  %v4372_v37 = vld [vmem:[#allocation6 + $0x7e8] sm:$0xf]  ;;  %v5161_v38 = vld [vmem:[#allocation6 + $0x7f4] sm:$0xf0]  ;;  %v4245_v45 = vor.u32 %v5129_v34, %v4244_v33 }
  0xa9   :  { %1911 = vmatpush.bf16.msra.mxu0 %v3413_v52  ;;  %v3972_v46 = vld [vmem:[#allocation6 + $0x4c8] sm:$0xf]  ;;  %v5061_v48 = vld [vmem:[#allocation6 + $0x4d4] sm:$0xf0]  ;;  %v4373_v50 = vor.u32 %v5161_v38, %v4372_v37 }
  0xaa   :  { %1925 = vmatpush.bf16.msra.mxu1 %v3541_v53  ;;  %v4100_v49 = vld [vmem:[#allocation6 + $0x5c8] sm:$0xf]  ;;  %v5093_v51 = vld [vmem:[#allocation6 + $0x5d4] sm:$0xf0]  ;;  %v3973_v56 = vor.u32 %v5061_v48, %v3972_v46 }
  0xab   :  { %1939 = vmatpush.bf16.msra.mxu2 %v3669_v54  ;;  %v4228_v52 = vld [vmem:[#allocation6 + $0x6c8] sm:$0xf]  ;;  %v5125_v53 = vld [vmem:[#allocation6 + $0x6d4] sm:$0xf0]  ;;  %v4101_v57 = vor.u32 %v5093_v51, %v4100_v49 }
  0xac   :  { %1953 = vmatpush.bf16.msra.mxu3 %v3797_v59  ;;  %v4356_v54 = vld [vmem:[#allocation6 + $0x7c8] sm:$0xf]  ;;  %v5157_v55 = vld [vmem:[#allocation6 + $0x7d4] sm:$0xf0]  ;;  %v4229_v59 = vor.u32 %v5125_v53, %v4228_v52 }
  0xad   :  { %1912 = vmatpush.bf16.msra.mxu0 %v3397_v2  ;;  %v3956_v60 = vld [vmem:[#allocation6 + $0x4a8] sm:$0xf]  ;;  %v5057_v61 = vld [vmem:[#allocation6 + $0x4b4] sm:$0xf0]  ;;  %v4357_v63 = vor.u32 %v5157_v55, %v4356_v54 }
  0xae   :  { %1926 = vmatpush.bf16.msra.mxu1 %v3525_v3  ;;  %v4084_v62 = vld [vmem:[#allocation6 + $0x5a8] sm:$0xf]  ;;  %v5089_v0 = vld [vmem:[#allocation6 + $0x5b4] sm:$0xf0]  ;;  %v3957_v6 = vor.u32 %v5057_v61, %v3956_v60 }
  0xaf   :  { %1940 = vmatpush.bf16.msra.mxu2 %v3653_v4  ;;  %v4212_v2 = vld [vmem:[#allocation6 + $0x6a8] sm:$0xf]  ;;  %v5121_v3 = vld [vmem:[#allocation6 + $0x6b4] sm:$0xf0]  ;;  %v4085_v7 = vor.u32 %v5089_v0, %v4084_v62 }
  0xb0   :  { %1954 = vmatpush.bf16.msra.mxu3 %v3781_v8  ;;  %v4340_v4 = vld [vmem:[#allocation6 + $0x7a8] sm:$0xf]  ;;  %v5153_v5 = vld [vmem:[#allocation6 + $0x7b4] sm:$0xf0]  ;;  %v4213_v8 = vor.u32 %v5121_v3, %v4212_v2 }
  0xb1   :  { %1913 = vmatpush.bf16.msra.mxu0 %v3381_v15  ;;  %v3940_v9 = vld [vmem:[#allocation6 + $0x488] sm:$0xf]  ;;  %v5053_v11 = vld [vmem:[#allocation6 + $0x494] sm:$0xf0]  ;;  %v4341_v13 = vor.u32 %v5153_v5, %v4340_v4 }
  0xb2   :  { %1927 = vmatpush.bf16.msra.mxu1 %v3509_v19  ;;  %v4068_v12 = vld [vmem:[#allocation6 + $0x588] sm:$0xf]  ;;  %v5085_v14 = vld [vmem:[#allocation6 + $0x594] sm:$0xf0] }
  0xb3   :  { %1941 = vmatpush.bf16.msra.mxu2 %v3637_v20  ;;  %v4196_v15 = vld [vmem:[#allocation6 + $0x688] sm:$0xf]  ;;  %v5117_v16 = vld [vmem:[#allocation6 + $0x694] sm:$0xf0]  ;;  %v3941_v20 = vor.u32 %v5053_v11, %v3940_v9  ;;  %v4069_v21 = vor.u32 %v5085_v14, %v4068_v12 }
  0xb4   :  { %1955 = vmatpush.bf16.msra.mxu3 %v3765_v24  ;;  %v4324_v18 = vld [vmem:[#allocation6 + $0x788] sm:$0xf]  ;;  %v5149_v19 = vld [vmem:[#allocation6 + $0x794] sm:$0xf0]  ;;  %v4197_v22 = vor.u32 %v5117_v16, %v4196_v15  ;;  %v1706_v33 = vpop.f32.mrf.mxu1 }
  0xb5   :  { %1914 = vmatpush.bf16.msra.mxu0 %v3365_v31  ;;  %v3924_v23 = vld [vmem:[#allocation6 + $0x468] sm:$0xf]  ;;  %v5049_v24 = vld [vmem:[#allocation6 + $0x474] sm:$0xf0]  ;;  %v4325_v27 = vor.u32 %v5149_v19, %v4324_v18 }
  0xb6   :  { %1928 = vmatpush.bf16.msra.mxu1 %v3493_v35  ;;  %v4052_v25 = vld [vmem:[#allocation6 + $0x568] sm:$0xf]  ;;  %v5081_v28 = vld [vmem:[#allocation6 + $0x574] sm:$0xf0]  ;;  %v3925_v34 = vor.u32 %v5049_v24, %v3924_v23  ;;  %v4935_v23 = vld [vmem:[#allocation6 + $0xec] sm:$0xf] }
  0xb7   :  { %1942 = vmatpush.bf16.msra.mxu2 %v3621_v36  ;;  %v4180_v29 = vld [vmem:[#allocation6 + $0x668] sm:$0xf]  ;;  %v5113_v30 = vld [vmem:[#allocation6 + $0x674] sm:$0xf0]  ;;  %v4053_v36 = vor.u32 %v5081_v28, %v4052_v25  ;;  %v3478_v24 = vld [vmem:[#allocation6 + $0xf8] sm:$0xf0] }
  0xb8   :  { %1956 = vmatpush.bf16.msra.mxu3 %v3749_v40  ;;  %1915 = vmatmul.bf16.vlgmr.msra.gmra.mxu0 %v5484_v58  ;;  %v4308_v31 = vld [vmem:[#allocation6 + $0x768] sm:$0xf]  ;;  %v5145_v32 = vld [vmem:[#allocation6 + $0x774] sm:$0xf0]  ;;  %v4181_v37 = vor.u32 %v5113_v30, %v4180_v29  ;;  %v4967_v25 = vld [vmem:[#allocation6 + $0x1ec] sm:$0xf] }
  0xb9   :  { %1963 = vmatpush.bf16.msrb.mxu0 %v3989_v41  ;;  %1929 = vmatmul.bf16.vlgmr.msra.gmra.mxu1 %v5490_v10  ;;  %v3908_v38 = vld [vmem:[#allocation6 + $0x448] sm:$0xf]  ;;  %v5045_v40 = vld [vmem:[#allocation6 + $0x454] sm:$0xf0]  ;;  %v3606_v28 = vld [vmem:[#allocation6 + $0x1f8] sm:$0xf0] }
  0xba   :  { %1977 = vmatpush.bf16.msrb.mxu1 %v4117_v42  ;;  %1943 = vmatmul.bf16.vlgmr.msra.gmra.mxu2 %v5486_v1  ;;  %v4036_v41 = vld [vmem:[#allocation6 + $0x548] sm:$0xf]  ;;  %v4309_v42 = vor.u32 %v5145_v32, %v4308_v31  ;;  %v5109_v48 = vld [vmem:[#allocation6 + $0x654] sm:$0xf0]  ;;  %v3909_v53 = vor.u32 %v5045_v40, %v3908_v38  ;;  %v4999_v29 = vld [vmem:[#allocation6 + $0x2ec] sm:$0xf]  ;;  %v3609_v38 = vor.u32 %v4967_v25, %v3606_v28 }
  0xbb   :  { %1991 = vmatpush.bf16.msrb.mxu2 %v4245_v45  ;;  %1957 = vmatmul.bf16.vlgmr.msra.gmra.mxu3 %v5492_v17  ;;  %v5077_v45 = vld [vmem:[#allocation6 + $0x554] sm:$0xf0]  ;;  %v4164_v46 = vld [vmem:[#allocation6 + $0x648] sm:$0xf]  ;;  %v1720_v49 = vpop.f32.mrf.mxu2  ;;  %v3734_v30 = vld [vmem:[#allocation6 + $0x2f8] sm:$0xf0] }
  0xbc   :  { %2005 = vmatpush.bf16.msrb.mxu3 %v4373_v50  ;;  %v4292_v50 = vld [vmem:[#allocation6 + $0x748] sm:$0xf]  ;;  %v5141_v51 = vld [vmem:[#allocation6 + $0x754] sm:$0xf0]  ;;  %v4037_v54 = vor.u32 %v5077_v45, %v4036_v41  ;;  %v4165_v55 = vor.u32 %v5109_v48, %v4164_v46  ;;  %v1734_v0 = vpop.f32.mrf.mxu3  ;;  %v3737_v40 = vor.u32 %v4999_v29, %v3734_v30  ;;  %v4931_v41 = vld [vmem:[#allocation6 + $0xcc] sm:$0xf] }
  0xbd   :  { %1964 = vmatpush.bf16.msrb.mxu0 %v3973_v56  ;;  %v1692_v26 = vpop.f32.mrf.mxu0  ;;  %v3892_v56 = vld [vmem:[#allocation6 + $0x428] sm:$0xf]  ;;  %v4293_v60 = vor.u32 %v5141_v51, %v4292_v50  ;;  %v5073_v61 = vld [vmem:[#allocation6 + $0x534] sm:$0xf0]  ;;  %v4963_v45 = vld [vmem:[#allocation6 + $0x1cc] sm:$0xf] }
  0xbe   :  { %1978 = vmatpush.bf16.msrb.mxu1 %v4101_v57  ;;  %v1707_v35 = vadd.f32 %v1706_v33, %v1692_v26  ;;  %v5041_v57 = vld [vmem:[#allocation6 + $0x434] sm:$0xf0]  ;;  %v4148_v62 = vld [vmem:[#allocation6 + $0x628] sm:$0xf]  ;;  %v5031_v33 = vld [vmem:[#allocation6 + $0x3ec] sm:$0xf] }
  0xbf   :  { %1992 = vmatpush.bf16.msrb.mxu2 %v4229_v59  ;;  %v4020_v59 = vld [vmem:[#allocation6 + $0x528] sm:$0xf]  ;;  %v5137_v3 = vld [vmem:[#allocation6 + $0x734] sm:$0xf0]  ;;  %v4995_v50 = vld [vmem:[#allocation6 + $0x2cc] sm:$0xf] }
  0xc0   :  { %2006 = vmatpush.bf16.msrb.mxu3 %v4357_v63  ;;  %v1721_v52 = vadd.f32 %v1720_v49, %v1707_v35  ;;  %v5105_v63 = vld [vmem:[#allocation6 + $0x634] sm:$0xf0]  ;;  %v4276_v2 = vld [vmem:[#allocation6 + $0x728] sm:$0xf]  ;;  %v4021_v12 = vor.u32 %v5073_v61, %v4020_v59  ;;  %v3590_v49 = vld [vmem:[#allocation6 + $0x1d8] sm:$0xf0] }
  0xc1   :  { %1965 = vmatpush.bf16.msrb.mxu0 %v3957_v6  ;;  %v1708_v6 = vpop.f32.mrf.mxu1  ;;  %v5037_v9 = vld [vmem:[#allocation6 + $0x414] sm:$0xf0]  ;;  %v4004_v14 = vld [vmem:[#allocation6 + $0x508] sm:$0xf]  ;;  %v4277_v18 = vor.u32 %v5137_v3, %v4276_v2  ;;  %v3718_v51 = vld [vmem:[#allocation6 + $0x2d8] sm:$0xf0] }
  0xc2   :  { %1979 = vmatpush.bf16.msrb.mxu1 %v4085_v7  ;;  %v5520_v5 = vadd.f32 %v1734_v0, %v1721_v52  ;;  %v3893_v7 = vor.u32 %v5041_v57, %v3892_v56  ;;  %v5069_v15 = vld [vmem:[#allocation6 + $0x514] sm:$0xf0]  ;;  %v4132_v16 = vld [vmem:[#allocation6 + $0x608] sm:$0xf]  ;;  %v5027_v52 = vld [vmem:[#allocation6 + $0x3cc] sm:$0xf]  ;;  %v3721_v56 = vor.u32 %v4995_v50, %v3718_v51 }
  0xc3   :  { %1993 = vmatpush.bf16.msrb.mxu2 %v4213_v8  ;;  %v3876_v8 = vld [vmem:[#allocation6 + $0x408] sm:$0xf]  ;;  %v5101_v19 = vld [vmem:[#allocation6 + $0x614] sm:$0xf0]  ;;  %v4005_v31 = vor.u32 %v5069_v15, %v4004_v14  ;;  %v4927_v57 = vld [vmem:[#allocation6 + $0xac] sm:$0xf] }
  0xc4   :  { %2007 = vmatpush.bf16.msrb.mxu3 %v4341_v13  ;;  %v4149_v13 = vor.u32 %v5105_v63, %v4148_v62  ;;  %v4133_v32 = vor.u32 %v5101_v19, %v4132_v16  ;;  %v3446_v59 = vld [vmem:[#allocation6 + $0xb8] sm:$0xf0]  ;;  %v4991_v63 = vld [vmem:[#allocation6 + $0x2ac] sm:$0xf] }
  0xc5   :  { %1966 = vmatpush.bf16.msrb.mxu0 %v3941_v20  ;;  %v1694_v4 = vpop.f32.mrf.mxu0  ;;  %v4260_v20 = vld [vmem:[#allocation6 + $0x708] sm:$0xf]  ;;  %v3574_v62 = vld [vmem:[#allocation6 + $0x1b8] sm:$0xf0]  ;;  %v5023_v2 = vld [vmem:[#allocation6 + $0x3ac] sm:$0xf] }
  0xc6   :  { %1980 = vmatpush.bf16.msrb.mxu1 %v4069_v21  ;;  %v1709_v11 = vadd.f32 %v1708_v6, %v1694_v4  ;;  %v5133_v21 = vld [vmem:[#allocation6 + $0x714] sm:$0xf0]  ;;  %v3702_v0 = vld [vmem:[#allocation6 + $0x2b8] sm:$0xf0]  ;;  %v3449_v4 = vor.u32 %v4927_v57, %v3446_v59  ;;  %v4987_v14 = vld [vmem:[#allocation6 + $0x28c] sm:$0xf] }
  0xc7   :  { %1994 = vmatpush.bf16.msrb.mxu2 %v4197_v22  ;;  %v1722_v22 = vpop.f32.mrf.mxu2  ;;  %v4261_v35 = vor.u32 %v5133_v21, %v4260_v20  ;;  %v3830_v3 = vld [vmem:[#allocation6 + $0x3b8] sm:$0xf0]  ;;  %v4919_v25 = vld [vmem:[#allocation6 + $0x6c] sm:$0xf] }
  0xc8   :  { %2008 = vmatpush.bf16.msrb.mxu3 %v4325_v27  ;;  %v1723_v26 = vadd.f32 %v1722_v22, %v1709_v11  ;;  %v3877_v27 = vor.u32 %v5037_v9, %v3876_v8  ;;  %v4923_v8 = vld [vmem:[#allocation6 + $0x8c] sm:$0xf]  ;;  %v3430_v9 = vld [vmem:[#allocation6 + $0x98] sm:$0xf0] }
  0xc9   :  { %1967 = vmatpush.bf16.msrb.mxu0 %v3925_v34  ;;  %v3862_v34 = vld [vmem:[#allocation6 + $0x3f8] sm:$0xf0]  ;;  %v4955_v11 = vld [vmem:[#allocation6 + $0x18c] sm:$0xf]  ;;  %v3433_v21 = vor.u32 %v4923_v8, %v3430_v9 }
  0xca   :  { %1981 = vmatpush.bf16.msrb.mxu1 %v4053_v36  ;;  %v3481_v36 = vor.u32 %v4935_v23, %v3478_v24  ;;  %v3865_v48 = vor.u32 %v5031_v33, %v3862_v34  ;;  %v3686_v15 = vld [vmem:[#allocation6 + $0x298] sm:$0xf0]  ;;  %v5015_v33 = vld [vmem:[#allocation6 + $0x36c] sm:$0xf] }
  0xcb   :  { %1995 = vmatpush.bf16.msrb.mxu2 %v4181_v37  ;;  %v1736_v37 = vpop.f32.mrf.mxu3  ;;  %v3814_v19 = vld [vmem:[#allocation6 + $0x398] sm:$0xf0]  ;;  %v3689_v24 = vor.u32 %v4987_v14, %v3686_v15  ;;  %v5007_v8 = vld [vmem:[#allocation6 + $0x32c] sm:$0xf] }
  0xcc   :  { %2009 = vmatpush.bf16.msrb.mxu3 %v4309_v42  ;;  %v3462_v42 = vld [vmem:[#allocation6 + $0xd8] sm:$0xf0]  ;;  %v5522_v46 = vadd.f32 %v1736_v37, %v1723_v26  ;;  %v4915_v37 = vld [vmem:[#allocation6 + $0x4c] sm:$0xf] }
  0xcd   :  { %1968 = vmatpush.bf16.msrb.mxu0 %v3909_v53  ;;  %v3846_v53 = vld [vmem:[#allocation6 + $0x3d8] sm:$0xf0]  ;;  %v4939_v15 = vld [vmem:[#allocation6 + $0x10c] sm:$0xf] }
  0xce   :  { %1982 = vmatpush.bf16.msrb.mxu1 %v4037_v54  ;;  %v3465_v54 = vor.u32 %v4931_v41, %v3462_v42  ;;  %v3849_v61 = vor.u32 %v5027_v52, %v3846_v53  ;;  %v3414_v26 = vld [vmem:[#allocation6 + $0x78] sm:$0xf0]  ;;  %v5011_v53 = vld [vmem:[#allocation6 + $0x34c] sm:$0xf] }
  0xcf   :  { %1996 = vmatpush.bf16.msrb.mxu2 %v4165_v55  ;;  %v3593_v55 = vor.u32 %v4963_v45, %v3590_v49  ;;  %v3542_v30 = vld [vmem:[#allocation6 + $0x178] sm:$0xf0] }
  0xd0   :  { %2010 = vmatpush.bf16.msrb.mxu3 %v4293_v60  ;;  %v4959_v60 = vld [vmem:[#allocation6 + $0x1ac] sm:$0xf]  ;;  %v3798_v34 = vld [vmem:[#allocation6 + $0x378] sm:$0xf0] }
  0xd1   :  { %1969 = vmatpush.bf16.msrb.mxu0 %v3893_v7  ;;  %v3577_v6 = vor.u32 %v4959_v60, %v3574_v62  ;;  %v3705_v7 = vor.u32 %v4991_v63, %v3702_v0  ;;  %v3801_v41 = vor.u32 %v5015_v33, %v3798_v34  ;;  %v3526_v45 = vld [vmem:[#allocation6 + $0x158] sm:$0xf0]  ;;  %v4911_v62 = vld [vmem:[#allocation6 + $0x2c] sm:$0xf] }
  0xd2   :  { %1983 = vmatpush.bf16.msrb.mxu1 %v4021_v12  ;;  %v3833_v12 = vor.u32 %v5023_v2, %v3830_v3  ;;  %v3654_v49 = vld [vmem:[#allocation6 + $0x258] sm:$0xf0]  ;;  %v4943_v0 = vld [vmem:[#allocation6 + $0x12c] sm:$0xf] }
  0xd3   :  { %1997 = vmatpush.bf16.msrb.mxu2 %v4149_v13  ;;  %v3558_v13 = vld [vmem:[#allocation6 + $0x198] sm:$0xf0] }
  0xd4   :  { %2011 = vmatpush.bf16.msrb.mxu3 %v4277_v18  ;;  %v5019_v18 = vld [vmem:[#allocation6 + $0x38c] sm:$0xf]  ;;  %v3561_v23 = vor.u32 %v4955_v11, %v3558_v13  ;;  %v3382_v63 = vld [vmem:[#allocation6 + $0x38] sm:$0xf0] }
  0xd5   :  { %1970 = vmatpush.bf16.msrb.mxu0 %v3877_v27  ;;  %v1748_v16 = vpop.f32.mrf.mxu0  ;;  %v4951_v27 = vld [vmem:[#allocation6 + $0x16c] sm:$0xf]  ;;  %v3817_v28 = vor.u32 %v5019_v18, %v3814_v19  ;;  %v3766_v9 = vld [vmem:[#allocation6 + $0x338] sm:$0xf0] }
  0xd6   :  { %1984 = vmatpush.bf16.msrb.mxu1 %v4005_v31  ;;  %v1749_v20 = vadd.f32 %v1748_v16, %v5520_v5  ;;  %v1762_v22 = vpop.f32.mrf.mxu1  ;;  %v4983_v31 = vld [vmem:[#allocation6 + $0x26c] sm:$0xf]  ;;  %v3545_v5 = vor.u32 %v4951_v27, %v3542_v30  ;;  %v3494_v16 = vld [vmem:[#allocation6 + $0x118] sm:$0xf0]  ;;  %v3769_v19 = vor.u32 %v5007_v8, %v3766_v9 }
  0xd7   :  { %1998 = vmatpush.bf16.msrb.mxu2 %v4133_v32  ;;  %v3670_v32 = vld [vmem:[#allocation6 + $0x278] sm:$0xf0]  ;;  %v4907_v11 = vld [vmem:[#allocation6 + $0xc] sm:$0xf]  ;;  %v3497_v34 = vor.u32 %v4939_v15, %v3494_v16 }
  0xd8   :  { %2012 = vmatpush.bf16.msrb.mxu3 %v4261_v35  ;;  %1971 = vmatmul.bf16.vlgmr.msrb.gmra.mxu0 %v5496_v39  ;;  %v1763_v29 = vadd.f32 %v1762_v22, %v1749_v20  ;;  %v3417_v35 = vor.u32 %v4919_v25, %v3414_v26  ;;  %v4971_v18 = vld [vmem:[#allocation6 + $0x20c] sm:$0xf]  ;;  %v3990_v27 = vld [vmem:[#allocation6 + $0x4f8] sm:$0xf0] }
  0xd9   :  { %2019 = vmatpush.bf16.msra.mxu0 %v3481_v36  ;;  %1985 = vmatmul.bf16.vlgmr.msrb.gmra.mxu1 %v5500_v44  ;;  %v3673_v36 = vor.u32 %v4983_v31, %v3670_v32  ;;  %v5003_v22 = vld [vmem:[#allocation6 + $0x30c] sm:$0xf]  ;;  %v4118_v30 = vld [vmem:[#allocation6 + $0x5f8] sm:$0xf0] }
  0xda   :  { %2033 = vmatpush.bf16.msra.mxu1 %v3609_v38  ;;  %1999 = vmatmul.bf16.vlgmr.msrb.gmra.mxu2 %v5498_v43  ;;  %v3398_v38 = vld [vmem:[#allocation6 + $0x58] sm:$0xf0]  ;;  %v5063_v26 = vld [vmem:[#allocation6 + $0x4ec] sm:$0xf] }
  0xdb   :  { %2047 = vmatpush.bf16.msra.mxu2 %v3737_v40  ;;  %2013 = vmatmul.bf16.vlgmr.msrb.gmra.mxu3 %v5502_v47  ;;  %v4947_v40 = vld [vmem:[#allocation6 + $0x14c] sm:$0xf]  ;;  %v4246_v32 = vld [vmem:[#allocation6 + $0x6f8] sm:$0xf0] }
  0xdc   :  { %2061 = vmatpush.bf16.msra.mxu3 %v3865_v48  ;;  %v4979_v48 = vld [vmem:[#allocation6 + $0x24c] sm:$0xf]  ;;  %v3529_v60 = vor.u32 %v4947_v40, %v3526_v45  ;;  %v3974_v45 = vld [vmem:[#allocation6 + $0x4d8] sm:$0xf0] }
  0xdd   :  { %2020 = vmatpush.bf16.msra.mxu0 %v3465_v54  ;;  %v1776_v42 = vpop.f32.mrf.mxu2  ;;  %v1750_v51 = vpop.f32.mrf.mxu0  ;;  %v3782_v54 = vld [vmem:[#allocation6 + $0x358] sm:$0xf0]  ;;  %v5127_v31 = vld [vmem:[#allocation6 + $0x6ec] sm:$0xf] }
  0xde   :  { %2034 = vmatpush.bf16.msra.mxu1 %v3593_v55  ;;  %v1777_v50 = vadd.f32 %v1776_v42, %v1763_v29  ;;  %v1790_v52 = vpop.f32.mrf.mxu3  ;;  %v1751_v55 = vadd.f32 %v1750_v51, %v5522_v46  ;;  %v1764_v57 = vpop.f32.mrf.mxu1  ;;  %v3785_v2 = vor.u32 %v5011_v53, %v3782_v54  ;;  %v3385_v46 = vor.u32 %v4911_v62, %v3382_v63  ;;  %v5059_v42 = vld [vmem:[#allocation6 + $0x4cc] sm:$0xf]  ;;  %v4358_v54 = vld [vmem:[#allocation6 + $0x7d8] sm:$0xf0] }
  0xdf   :  { %2048 = vmatpush.bf16.msra.mxu2 %v3721_v56  ;;  %v3401_v56 = vor.u32 %v4915_v37, %v3398_v38  ;;  %v3993_v38 = vor.u32 %v5063_v26, %v3990_v27  ;;  %v5123_v51 = vld [vmem:[#allocation6 + $0x6cc] sm:$0xf]  ;;  %v4326_v16 = vld [vmem:[#allocation6 + $0x798] sm:$0xf0] }
  0xe0   :  { %2062 = vmatpush.bf16.msra.mxu3 %v3849_v61  ;;  %v5530_v59 = vadd.f32 %v1790_v52, %v1777_v50  ;;  %v3657_v61 = vor.u32 %v4979_v48, %v3654_v49  ;;  %v1765_v3 = vadd.f32 %v1764_v57, %v1751_v55  ;;  %v5091_v48 = vld [vmem:[#allocation6 + $0x5cc] sm:$0xf]  ;;  %v4102_v50 = vld [vmem:[#allocation6 + $0x5d8] sm:$0xf0]  ;;  %v3977_v55 = vor.u32 %v5059_v42, %v3974_v45 }
  0xe1   :  { %2021 = vmatpush.bf16.msra.mxu0 %v3449_v4  ;;  %v3510_v4 = vld [vmem:[#allocation6 + $0x138] sm:$0xf0]  ;;  %v5155_v53 = vld [vmem:[#allocation6 + $0x7cc] sm:$0xf] }
  0xe2   :  { %2035 = vmatpush.bf16.msra.mxu1 %v3577_v6  ;;  %v4975_v6 = vld [vmem:[#allocation6 + $0x22c] sm:$0xf]  ;;  %v3513_v13 = vor.u32 %v4943_v0, %v3510_v4  ;;  %v4230_v52 = vld [vmem:[#allocation6 + $0x6d8] sm:$0xf0]  ;;  %v4361_v63 = vor.u32 %v5155_v53, %v4358_v54 }
  0xe3   :  { %2049 = vmatpush.bf16.msra.mxu2 %v3705_v7  ;;  %v3638_v7 = vld [vmem:[#allocation6 + $0x238] sm:$0xf0]  ;;  %v4233_v57 = vor.u32 %v5123_v51, %v4230_v52  ;;  %v5087_v62 = vld [vmem:[#allocation6 + $0x5ac] sm:$0xf] }
  0xe4   :  { %2063 = vmatpush.bf16.msra.mxu3 %v3833_v12  ;;  %v3366_v12 = vld [vmem:[#allocation6 + $0x18] sm:$0xf0]  ;;  %v3641_v14 = vor.u32 %v4975_v6, %v3638_v7  ;;  %v5151_v4 = vld [vmem:[#allocation6 + $0x7ac] sm:$0xf] }
  0xe5   :  { %2022 = vmatpush.bf16.msra.mxu0 %v3433_v21  ;;  %v1778_v20 = vpop.f32.mrf.mxu2  ;;  %v3622_v21 = vld [vmem:[#allocation6 + $0x218] sm:$0xf0]  ;;  %v3369_v29 = vor.u32 %v4907_v11, %v3366_v12  ;;  %v5147_v15 = vld [vmem:[#allocation6 + $0x78c] sm:$0xf] }
  0xe6   :  { %2036 = vmatpush.bf16.msra.mxu1 %v3561_v23  ;;  %v3750_v23 = vld [vmem:[#allocation6 + $0x318] sm:$0xf0]  ;;  %v1792_v25 = vpop.f32.mrf.mxu3  ;;  %v5111_v27 = vld [vmem:[#allocation6 + $0x66c] sm:$0xf] }
  0xe7   :  { %2050 = vmatpush.bf16.msra.mxu2 %v3689_v24  ;;  %v1779_v24 = vadd.f32 %v1778_v20, %v1765_v3  ;;  %v3753_v37 = vor.u32 %v5003_v22, %v3750_v23  ;;  %v4086_v0 = vld [vmem:[#allocation6 + $0x5b8] sm:$0xf0]  ;;  %v5079_v23 = vld [vmem:[#allocation6 + $0x56c] sm:$0xf] }
  0xe8   :  { %2064 = vmatpush.bf16.msra.mxu3 %v3817_v28  ;;  %v5095_v28 = vld [vmem:[#allocation6 + $0x5ec] sm:$0xf]  ;;  %v4214_v3 = vld [vmem:[#allocation6 + $0x6b8] sm:$0xf0]  ;;  %v4089_v8 = vor.u32 %v5087_v62, %v4086_v0 }
  0xe9   :  { %2023 = vmatpush.bf16.msra.mxu0 %v3417_v35  ;;  %v5532_v33 = vadd.f32 %v1792_v25, %v1779_v24  ;;  %v3625_v35 = vor.u32 %v4971_v18, %v3622_v21  ;;  %v4121_v40 = vor.u32 %v5095_v28, %v4118_v30  ;;  %v4342_v6 = vld [vmem:[#allocation6 + $0x7b8] sm:$0xf0]  ;;  %v5047_v21 = vld [vmem:[#allocation6 + $0x46c] sm:$0xf]  ;;  %v4329_v25 = vor.u32 %v5147_v15, %v4326_v16 }
  0xea   :  { %2037 = vmatpush.bf16.msra.mxu1 %v3545_v5  ;;  %v5159_v5 = vld [vmem:[#allocation6 + $0x7ec] sm:$0xf]  ;;  %v3942_v11 = vld [vmem:[#allocation6 + $0x498] sm:$0xf0]  ;;  %v4345_v12 = vor.u32 %v5151_v4, %v4342_v6 }
  0xeb   :  { %2051 = vmatpush.bf16.msra.mxu2 %v3673_v36  ;;  %v4374_v36 = vld [vmem:[#allocation6 + $0x7f8] sm:$0xf0]  ;;  %v5139_v45 = vld [vmem:[#allocation6 + $0x74c] sm:$0xf] }
  0xec   :  { %2065 = vmatpush.bf16.msra.mxu3 %v3801_v41  ;;  %v4249_v41 = vor.u32 %v5127_v31, %v4246_v32  ;;  %v4377_v49 = vor.u32 %v5159_v5, %v4374_v36  ;;  %v3926_v22 = vld [vmem:[#allocation6 + $0x478] sm:$0xf0]  ;;  %v5043_v32 = vld [vmem:[#allocation6 + $0x44c] sm:$0xf] }
  0xed   :  { %2024 = vmatpush.bf16.msra.mxu0 %v3401_v56  ;;  %v4105_v56 = vor.u32 %v5091_v48, %v4102_v50  ;;  %v4054_v26 = vld [vmem:[#allocation6 + $0x578] sm:$0xf0]  ;;  %v3929_v31 = vor.u32 %v5047_v21, %v3926_v22  ;;  %v5075_v36 = vld [vmem:[#allocation6 + $0x54c] sm:$0xf] }
  0xee   :  { %2038 = vmatpush.bf16.msra.mxu1 %v3529_v60  ;;  %v5055_v60 = vld [vmem:[#allocation6 + $0x4ac] sm:$0xf]  ;;  %v4182_v28 = vld [vmem:[#allocation6 + $0x678] sm:$0xf0] }
  0xef   :  { %2052 = vmatpush.bf16.msra.mxu2 %v3657_v61  ;;  %v3958_v61 = vld [vmem:[#allocation6 + $0x4b8] sm:$0xf0]  ;;  %v5135_v4 = vld [vmem:[#allocation6 + $0x72c] sm:$0xf] }
  0xf0   :  { %2066 = vmatpush.bf16.msra.mxu3 %v3785_v2  ;;  %v5119_v2 = vld [vmem:[#allocation6 + $0x6ac] sm:$0xf]  ;;  %v3961_v7 = vor.u32 %v5055_v60, %v3958_v61  ;;  %v4310_v30 = vld [vmem:[#allocation6 + $0x778] sm:$0xf0] }
  0xf1   :  { %2025 = vmatpush.bf16.msra.mxu0 %v3385_v46  ;;  %v4217_v9 = vor.u32 %v5119_v2, %v4214_v3  ;;  %v5051_v46 = vld [vmem:[#allocation6 + $0x48c] sm:$0xf]  ;;  %v3910_v5 = vld [vmem:[#allocation6 + $0x458] sm:$0xf0] }
  0xf2   :  { %2039 = vmatpush.bf16.msra.mxu1 %v3513_v13  ;;  %v4070_v13 = vld [vmem:[#allocation6 + $0x598] sm:$0xf0]  ;;  %v3913_v51 = vor.u32 %v5043_v32, %v3910_v5  ;;  %v5071_v60 = vld [vmem:[#allocation6 + $0x52c] sm:$0xf] }
  0xf3   :  { %2053 = vmatpush.bf16.msra.mxu2 %v3641_v14  ;;  %v5115_v14 = vld [vmem:[#allocation6 + $0x68c] sm:$0xf]  ;;  %v4294_v48 = vld [vmem:[#allocation6 + $0x758] sm:$0xf0] }
  0xf4   :  { %2067 = vmatpush.bf16.msra.mxu3 %v3769_v19  ;;  %v4022_v0 = vld [vmem:[#allocation6 + $0x538] sm:$0xf0]  ;;  %v5103_v2 = vld [vmem:[#allocation6 + $0x62c] sm:$0xf] }
  0xf5   :  { %2026 = vmatpush.bf16.msra.mxu0 %v3369_v29  ;;  %v1804_v18 = vpop.f32.mrf.mxu0  ;;  %v5143_v29 = vld [vmem:[#allocation6 + $0x76c] sm:$0xf]  ;;  %v4150_v3 = vld [vmem:[#allocation6 + $0x638] sm:$0xf0] }
  0xf6   :  { %2040 = vmatpush.bf16.msra.mxu1 %v3497_v34  ;;  %v1818_v19 = vpop.f32.mrf.mxu1  ;;  %v4057_v34 = vor.u32 %v5079_v23, %v4054_v26  ;;  %v4278_v6 = vld [vmem:[#allocation6 + $0x738] sm:$0xf0]  ;;  %v5131_v16 = vld [vmem:[#allocation6 + $0x70c] sm:$0xf] }
  0xf7   :  { %2054 = vmatpush.bf16.msra.mxu2 %v3625_v35  ;;  %v1819_v24 = vadd.f32 %v1818_v19, %v1804_v18  ;;  %v4185_v35 = vor.u32 %v5111_v27, %v4182_v28  ;;  %v4262_v18 = vld [vmem:[#allocation6 + $0x718] sm:$0xf0] }
  0xf8   :  { %2068 = vmatpush.bf16.msra.mxu3 %v3753_v37  ;;  %2027 = vmatmul.bf16.vlgmr.msra.gmra.mxu0 %v5484_v58  ;;  %v3945_v58 = vor.u32 %v5051_v46, %v3942_v11  ;;  %v4038_v37 = vld [vmem:[#allocation6 + $0x558] sm:$0xf0]  ;;  %v5035_v46 = vld [vmem:[#allocation6 + $0x40c] sm:$0xf]  ;;  %v4265_v23 = vor.u32 %v5131_v16, %v4262_v18  ;;  %v5192_v16 = vld [vmem:[#allocation9 + $0xec] sm:$0xf0] }
  0xf9   :  { %2075 = vmatpush.bf16.msrb.mxu0 %v3993_v38  ;;  %2041 = vmatmul.bf16.vlgmr.msra.gmra.mxu1 %v5490_v10  ;;  %v4313_v38 = vor.u32 %v5143_v29, %v4310_v30  ;;  %v4041_v52 = vor.u32 %v5075_v36, %v4038_v37  ;;  %v3878_v11 = vld [vmem:[#allocation6 + $0x418] sm:$0xf0]  ;;  %v4620_v18 = vld [vmem:[#allocation9 + $0x1e0] sm:$0xf] }
  0xfa   :  { %2089 = vmatpush.bf16.msrb.mxu1 %v4121_v40  ;;  %2055 = vmatmul.bf16.vlgmr.msra.gmra.mxu2 %v5486_v1  ;;  %v5083_v1 = vld [vmem:[#allocation6 + $0x58c] sm:$0xf]  ;;  %v3881_v19 = vor.u32 %v5035_v46, %v3878_v11 }
  0xfb   :  { %2103 = vmatpush.bf16.msrb.mxu2 %v4249_v41  ;;  %2069 = vmatmul.bf16.vlgmr.msra.gmra.mxu3 %v5492_v17  ;;  %v4198_v17 = vld [vmem:[#allocation6 + $0x698] sm:$0xf0]  ;;  %v4073_v10 = vor.u32 %v5083_v1, %v4070_v13  ;;  %v5107_v40 = vld [vmem:[#allocation6 + $0x64c] sm:$0xf] }
  0xfc   :  { %2117 = vmatpush.bf16.msrb.mxu3 %v4377_v49  ;;  %v4201_v20 = vor.u32 %v5115_v14, %v4198_v17  ;;  %v4166_v41 = vld [vmem:[#allocation6 + $0x658] sm:$0xf0]  ;;  %v5067_v1 = vld [vmem:[#allocation6 + $0x50c] sm:$0xf] }
  0xfd   :  { %2076 = vmatpush.bf16.msrb.mxu0 %v3977_v55  ;;  %v1832_v42 = vpop.f32.mrf.mxu2  ;;  %v1806_v53 = vpop.f32.mrf.mxu0  ;;  %v4169_v55 = vor.u32 %v5107_v40, %v4166_v41  ;;  %v4006_v13 = vld [vmem:[#allocation6 + $0x518] sm:$0xf0]  ;;  %v5099_v14 = vld [vmem:[#allocation6 + $0x60c] sm:$0xf] }
  0xfe   :  { %2090 = vmatpush.bf16.msrb.mxu1 %v4105_v56  ;;  %v1833_v49 = vadd.f32 %v1832_v42, %v1819_v24  ;;  %v1846_v50 = vpop.f32.mrf.mxu3  ;;  %v1820_v54 = vpop.f32.mrf.mxu1  ;;  %v5039_v56 = vld [vmem:[#allocation6 + $0x42c] sm:$0xf]  ;;  %v4134_v17 = vld [vmem:[#allocation6 + $0x618] sm:$0xf0] }
  0xff   :  { %2104 = vmatpush.bf16.msrb.mxu2 %v4233_v57  ;;  %v3894_v57 = vld [vmem:[#allocation6 + $0x438] sm:$0xf0]  ;;  %v1821_v62 = vadd.f32 %v1820_v54, %v1806_v53  ;;  %v4137_v21 = vor.u32 %v5099_v14, %v4134_v17 }
 0x100   :  { %2118 = vmatpush.bf16.msrb.mxu3 %v4361_v63  ;;  %v5538_v61 = vadd.f32 %v1846_v50, %v1833_v49  ;;  %v4297_v63 = vor.u32 %v5139_v45, %v4294_v48 }
 0x101   :  { %2077 = vmatpush.bf16.msrb.mxu0 %v3961_v7  ;;  %v3897_v7 = vor.u32 %v5039_v56, %v3894_v57  ;;  %v5553_v57 = vld [vmem:[#allocation8] sm:$0xf] }
 0x102   :  { %2091 = vmatpush.bf16.msrb.mxu1 %v4089_v8  ;;  %v4025_v8 = vor.u32 %v5071_v60, %v4022_v0 }
 0x103   :  { %2105 = vmatpush.bf16.msrb.mxu2 %v4217_v9  ;;  %v4153_v9 = vor.u32 %v5103_v2, %v4150_v3 }
 0x104   :  { %2119 = vmatpush.bf16.msrb.mxu3 %v4345_v12  ;;  %v4281_v12 = vor.u32 %v5135_v4, %v4278_v6 }
 0x105   :  { %2078 = vmatpush.bf16.msrb.mxu0 %v3945_v58  ;;  %v1834_v15 = vpop.f32.mrf.mxu2 }
 0x106   :  { %2092 = vmatpush.bf16.msrb.mxu1 %v4073_v10  ;;  %v1835_v58 = vadd.f32 %v1834_v15, %v1821_v62  ;;  %v1848_v10 = vpop.f32.mrf.mxu3  ;;  %v4492_v15 = vld [vmem:[#allocation9 + $0xe0] sm:$0xf] }
 0x107   :  { %2106 = vmatpush.bf16.msrb.mxu2 %v4201_v20  ;;  %v4009_v20 = vor.u32 %v5067_v1, %v4006_v13  ;;  %v2162_v13 = vperm.slane %v5553_v57, 2 }
 0x108   :  { %2120 = vmatpush.bf16.msrb.mxu3 %v4329_v25  ;;  %v1849_v22 = vadd.f32 %v1848_v10, %v1835_v58  ;;  %v5224_v10 = vld [vmem:[#allocation9 + $0x1ec] sm:$0xf0] }
 0x109   :  { %2079 = vmatpush.bf16.msrb.mxu0 %v3929_v31 }
 0x10a   :  { %2093 = vmatpush.bf16.msrb.mxu1 %v4057_v34 }
 0x10b   :  { %2107 = vmatpush.bf16.msrb.mxu2 %v4185_v35 }
 0x10c   :  { %2121 = vmatpush.bf16.msrb.mxu3 %v4313_v38 }
 0x10d   :  { %2080 = vmatpush.bf16.msrb.mxu0 %v3913_v51 }
 0x10e   :  { %2094 = vmatpush.bf16.msrb.mxu1 %v4041_v52 }
 0x10f   :  { %2108 = vmatpush.bf16.msrb.mxu2 %v4169_v55 }
 0x110   :  { %2122 = vmatpush.bf16.msrb.mxu3 %v4297_v63  ;;  %v2161_v63 = vperm.slane %v5553_v57, 1 }
 0x111   :  { %2081 = vmatpush.bf16.msrb.mxu0 %v3897_v7 }
 0x112   :  { %2095 = vmatpush.bf16.msrb.mxu1 %v4025_v8 }
 0x113   :  { %2109 = vmatpush.bf16.msrb.mxu2 %v4153_v9  ;;  %v2160_v9 = vperm.slane %v5553_v57, 0 }
 0x114   :  { %2123 = vmatpush.bf16.msrb.mxu3 %v4281_v12 }
 0x115   :  { %2082 = vmatpush.bf16.msrb.mxu0 %v3881_v19  ;;  %v1860_v24 = vpop.f32.mrf.mxu0  ;;  %v4493_v19 = vor.u32 %v5192_v16, %v4492_v15  ;;  %v5212_v15 = vld [vmem:[#allocation9 + $0x18c] sm:$0xf0]  ;;  %v4700_v16 = vld [vmem:[#allocation9 + $0x280] sm:$0xf] }
 0x116   :  { %2096 = vmatpush.bf16.msrb.mxu1 %v4009_v20  ;;  %v1874_v25 = vpop.f32.mrf.mxu1  ;;  %v1861_v45 = vadd.f32 %v1860_v24, %v5538_v61  ;;  %v4748_v20 = vld [vmem:[#allocation9 + $0x2e0] sm:$0xf]  ;;  %v4621_v24 = vor.u32 %v5224_v10, %v4620_v18  ;;  %v5244_v18 = vld [vmem:[#allocation9 + $0x28c] sm:$0xf0] }
 0x117   :  { %2110 = vmatpush.bf16.msrb.mxu2 %v4137_v21  ;;  %v5256_v21 = vld [vmem:[#allocation9 + $0x2ec] sm:$0xf0] }
 0x118   :  { %2124 = vmatpush.bf16.msrb.mxu3 %v4265_v23  ;;  %2083 = vmatmul.bf16.vlgmr.msrb.gmra.mxu0 %v5496_v39  ;;  %v1875_v50 = vadd.f32 %v1874_v25, %v1861_v45  ;;  %v4749_v25 = vor.u32 %v5256_v21, %v4748_v20  ;;  %v4828_v20 = vld [vmem:[#allocation9 + $0x380] sm:$0xf]  ;;  %v5276_v21 = vld [vmem:[#allocation9 + $0x38c] sm:$0xf0] }
 0x119   :  { %2097 = vmatmul.bf16.vlgmr.msrb.gmra.mxu1 %v5500_v44  ;;  %3028 = vmatpush.bf16.msra.mxu0 %v4493_v19 }
 0x11a   :  { %2111 = vmatmul.bf16.vlgmr.msrb.gmra.mxu2 %v5498_v43  ;;  %3042 = vmatpush.bf16.msra.mxu1 %v4621_v24 }
 0x11b   :  { %2125 = vmatmul.bf16.vlgmr.msrb.gmra.mxu3 %v5502_v47  ;;  %3056 = vmatpush.bf16.msra.mxu2 %v4749_v25 }
 0x11d   :  { %v1888_v26 = vpop.f32.mrf.mxu2  ;;  %v1862_v28 = vpop.f32.mrf.mxu0 }
 0x11e   :  { %v1902_v27 = vpop.f32.mrf.mxu3  ;;  %v1876_v29 = vpop.f32.mrf.mxu1  ;;  %v1889_v55 = vadd.f32 %v1888_v26, %v1875_v50  ;;  %v1863_v11 = vadd.f32 %v1862_v28, %v1849_v22  ;;  %v4876_v26 = vld [vmem:[#allocation9 + $0x3e0] sm:$0xf]  ;;  %v5288_v22 = vld [vmem:[#allocation9 + $0x3ec] sm:$0xf0] }
 0x11f   :  { %v5284_v50 = vld [vmem:[#allocation9 + $0x3cc] sm:$0xf0] }
 0x120   :  { %v1903_v62 = vadd.f32 %v1902_v27, %v1889_v55  ;;  %v4476_v27 = vld [vmem:[#allocation9 + $0xc0] sm:$0xf]  ;;  %v1877_v28 = vadd.f32 %v1876_v29, %v1863_v11  ;;  %v2168_v29 = vadd.f32 %v2160_v9, %v5530_v59 }
 0x121   :  { %v4444_v11 = vld [vmem:[#allocation9 + $0x80] sm:$0xf] }
 0x122   :  { %v2169_v4 = vadd.f32 %v2161_v63, %v1903_v62 }
 0x124   :  { %v5559_v1 = vmax.f32 %v2169_v4, 0.0 }
 0x125   :  { %v5544_v30 = vpop.f32.mrf.mxu2 }
 0x126   :  { %v5546_v31 = vpop.f32.mrf.mxu3  ;;  %v1891_v55 = vadd.f32 %v5544_v30, %v1877_v28 }
 0x135   :  { %v1916_v32 = vpop.f32.mrf.mxu0 }
 0x136   :  { %v1930_v34 = vpop.f32.mrf.mxu1 }
 0x137   :  { %v1931_v41 = vadd.f32 %v1930_v34, %v1916_v32 }
 0x13d   :  { %v1944_v35 = vpop.f32.mrf.mxu2  ;;  %v1918_v5 = vpop.f32.mrf.mxu0 }
 0x13e   :  { %v1958_v39 = vpop.f32.mrf.mxu3  ;;  %v1932_v44 = vpop.f32.mrf.mxu1  ;;  %v1945_v49 = vadd.f32 %v1944_v35, %v1931_v41  ;;  %v4877_v35 = vor.u32 %v5288_v22, %v4876_v26  ;;  %v5252_v41 = vld [vmem:[#allocation9 + $0x2cc] sm:$0xf0]  ;;  %v2163_v26 = vperm.slane %v5553_v57, 3 }
 0x13f   :  { %v1933_v0 = vadd.f32 %v1932_v44, %v1918_v5  ;;  %v4604_v5 = vld [vmem:[#allocation9 + $0x1c0] sm:$0xf]  ;;  %v5220_v44 = vld [vmem:[#allocation9 + $0x1cc] sm:$0xf0] }
 0x140   :  { %v1959_v52 = vadd.f32 %v1958_v39, %v1945_v49  ;;  %v5188_v39 = vld [vmem:[#allocation9 + $0xcc] sm:$0xf0]  ;;  %3070 = vmatpush.bf16.msra.mxu3 %v4877_v35  ;;  %v4428_v35 = vld [vmem:[#allocation9 + $0x60] sm:$0xf] }
 0x145   :  { %v1946_v36 = vpop.f32.mrf.mxu2 }
 0x146   :  { %v1960_v43 = vpop.f32.mrf.mxu3  ;;  %v1947_v6 = vadd.f32 %v1946_v36, %v1933_v0  ;;  %v4588_v0 = vld [vmem:[#allocation9 + $0x1a0] sm:$0xf] }
 0x148   :  { %v1961_v12 = vadd.f32 %v1960_v43, %v1947_v6  ;;  %v5248_v6 = vld [vmem:[#allocation9 + $0x2ac] sm:$0xf0] }
 0x155   :  { %v1972_v37 = vpop.f32.mrf.mxu0 }
 0x156   :  { %v1986_v47 = vpop.f32.mrf.mxu1  ;;  %v1973_v60 = vadd.f32 %v1972_v37, %v1959_v52  ;;  %v4460_v52 = vld [vmem:[#allocation9 + $0xa0] sm:$0xf] }
 0x158   :  { %v1987_v61 = vadd.f32 %v1986_v47, %v1973_v60  ;;  %v4477_v47 = vor.u32 %v5188_v39, %v4476_v27  ;;  %v5176_v39 = vld [vmem:[#allocation9 + $0x6c] sm:$0xf0] }
 0x15a   :  { %3029 = vmatpush.bf16.msra.mxu0 %v4477_v47 }
 0x15d   :  { %v2000_v38 = vpop.f32.mrf.mxu2  ;;  %v1974_v42 = vpop.f32.mrf.mxu0 }
 0x15e   :  { %v2014_v40 = vpop.f32.mrf.mxu3  ;;  %v1988_v48 = vpop.f32.mrf.mxu1  ;;  %v2001_v46 = vadd.f32 %v2000_v38, %v1987_v61  ;;  %v1975_v58 = vadd.f32 %v1974_v42, %v1961_v12  ;;  %v4605_v38 = vor.u32 %v5220_v44, %v4604_v5  ;;  %v4860_v42 = vld [vmem:[#allocation9 + $0x3c0] sm:$0xf]  ;;  %v5180_v12 = vld [vmem:[#allocation9 + $0x8c] sm:$0xf0]  ;;  %v2185_v44 = vmul.f32 %v5559_v1, %v5559_v1 }
 0x15f   :  { %v4861_v62 = vor.u32 %v5284_v50, %v4860_v42  ;;  %v4716_v61 = vld [vmem:[#allocation9 + $0x2a0] sm:$0xf]  ;;  %v4445_v22 = vor.u32 %v5180_v12, %v4444_v11 }
 0x160   :  { %v2015_v23 = vadd.f32 %v2014_v40, %v2001_v46  ;;  %v4732_v40 = vld [vmem:[#allocation9 + $0x2c0] sm:$0xf]  ;;  %v1989_v45 = vadd.f32 %v1988_v48, %v1975_v58  ;;  %3043 = vmatpush.bf16.msra.mxu1 %v4605_v38  ;;  %v4717_v46 = vor.u32 %v5248_v6, %v4716_v61  ;;  %v1905_v58 = vadd.f32 %v5546_v31, %v1891_v55  ;;  %v5236_v61 = vld [vmem:[#allocation9 + $0x24c] sm:$0xf0] }
 0x161   :  { %v4733_v49 = vor.u32 %v5252_v41, %v4732_v40  ;;  %3071 = vmatpush.bf16.msra.mxu3 %v4861_v62  ;;  %v4701_v31 = vor.u32 %v5244_v18, %v4700_v16  ;;  %v4556_v5 = vld [vmem:[#allocation9 + $0x160] sm:$0xf]  ;;  %v5268_v6 = vld [vmem:[#allocation9 + $0x34c] sm:$0xf0] }
 0x162   :  { %v2173_v38 = vadd.f32 %v2161_v63, %v1905_v58  ;;  %v4812_v42 = vld [vmem:[#allocation9 + $0x360] sm:$0xf]  ;;  %v5168_v16 = vld [vmem:[#allocation9 + $0x2c] sm:$0xf0] }
 0x163   :  { %3057 = vmatpush.bf16.msra.mxu2 %v4733_v49  ;;  %v4540_v62 = vld [vmem:[#allocation9 + $0x140] sm:$0xf] }
 0x165   :  { %v5549_v51 = vpop.f32.mrf.mxu2 }
 0x166   :  { %v5551_v53 = vpop.f32.mrf.mxu3 }
 0x167   :  { %3058 = vmatpush.bf16.msra.mxu2 %v4717_v46 }
 0x16b   :  { %3059 = vmatpush.bf16.msra.mxu2 %v4701_v31 }
 0x175   :  { %v2028_v54 = vpop.f32.mrf.mxu0 }
 0x176   :  { %v2042_v56 = vpop.f32.mrf.mxu1 }
 0x177   :  { %v2043_v7 = vadd.f32 %v2042_v56, %v2028_v54  ;;  %v5184_v54 = vld [vmem:[#allocation9 + $0xac] sm:$0xf0]  ;;  %v2170_v56 = vadd.f32 %v2162_v13, %v2015_v23 }
 0x178   :  { %v4461_v48 = vor.u32 %v5184_v54, %v4460_v52  ;;  %v4429_v52 = vor.u32 %v5176_v39, %v4428_v35 }
 0x179   :  { %v5572_v19 = vmax.f32 %v2170_v56, 0.0  ;;  %v4412_v56 = vld [vmem:[#allocation9 + $0x40] sm:$0xf] }
 0x17a   :  { %3030 = vmatpush.bf16.msra.mxu0 %v4461_v48  ;;  %v4796_v48 = vld [vmem:[#allocation9 + $0x340] sm:$0xf] }
 0x17b   :  { %v2186_v50 = vmul.f32 %v5572_v19, %v5572_v19 }
 0x17d   :  { %v2056_v2 = vpop.f32.mrf.mxu2  ;;  %v2030_v8 = vpop.f32.mrf.mxu0 }
 0x17e   :  { %v2070_v3 = vpop.f32.mrf.mxu3  ;;  %v2044_v14 = vpop.f32.mrf.mxu1  ;;  %v2057_v17 = vadd.f32 %v2056_v2, %v2043_v7  ;;  %v5216_v2 = vld [vmem:[#allocation9 + $0x1ac] sm:$0xf0]  ;;  %v4844_v7 = vld [vmem:[#allocation9 + $0x3a0] sm:$0xf]  ;;  %3031 = vmatpush.bf16.msra.mxu0 %v4445_v22 }
 0x17f   :  { %v2045_v32 = vadd.f32 %v2044_v14, %v2030_v8  ;;  %v5280_v8 = vld [vmem:[#allocation9 + $0x3ac] sm:$0xf0]  ;;  %v4589_v30 = vor.u32 %v5216_v2, %v4588_v0  ;;  %v4572_v14 = vld [vmem:[#allocation9 + $0x180] sm:$0xf] }
 0x180   :  { %v2071_v36 = vadd.f32 %v2070_v3, %v2057_v17  ;;  %v2003_v3 = vadd.f32 %v5549_v51, %v1989_v45  ;;  %v4845_v17 = vor.u32 %v5280_v8, %v4844_v7  ;;  %v5569_v51 = vmax.f32 %v2168_v29, 0.0  ;;  %v5272_v29 = vld [vmem:[#allocation9 + $0x36c] sm:$0xf0]  ;;  %v4668_v2 = vld [vmem:[#allocation9 + $0x240] sm:$0xf] }
 0x181   :  { %3044 = vmatpush.bf16.msra.mxu1 %v4589_v30  ;;  %v2172_v45 = vadd.f32 %v2160_v9, %v5532_v33  ;;  %v4813_v9 = vor.u32 %v5272_v29, %v4812_v42  ;;  %v4669_v58 = vor.u32 %v5236_v61, %v4668_v2  ;;  %v5196_v42 = vld [vmem:[#allocation9 + $0x10c] sm:$0xf0]  ;;  %v4636_v29 = vld [vmem:[#allocation9 + $0x200] sm:$0xf]  ;;  %v5286_v2 = vld [vmem:[#allocation9 + $0x3e4] sm:$0xf] }
 0x182   :  { %v2017_v23 = vadd.f32 %v5551_v53, %v2003_v3  ;;  %3072 = vmatpush.bf16.msra.mxu3 %v4845_v17  ;;  %v4829_v53 = vor.u32 %v5276_v21, %v4828_v20  ;;  %v2184_v47 = vmul.f32 %v5569_v51, %v5569_v51  ;;  %v5591_v3 = vmax.f32 %v2173_v38, 0.0  ;;  %3032 = vmatpush.bf16.msra.mxu0 %v4429_v52  ;;  %v4524_v20 = vld [vmem:[#allocation9 + $0x120] sm:$0xf]  ;;  %v5200_v21 = vld [vmem:[#allocation9 + $0x12c] sm:$0xf0] }
 0x183   :  { %v5595_v7 = vmax.f32 %v2172_v45, 0.0  ;;  %v5164_v38 = vld [vmem:[#allocation9 + $0xc] sm:$0xf0]  ;;  %v4764_v52 = vld [vmem:[#allocation9 + $0x300] sm:$0xf] }
 0x184   :  { %v2174_v49 = vadd.f32 %v2162_v13, %v2017_v23  ;;  %v2192_v33 = vadd.f32 %v2185_v44, %v2184_v47  ;;  %v5204_v13 = vld [vmem:[#allocation9 + $0x14c] sm:$0xf0]  ;;  %v4652_v23 = vld [vmem:[#allocation9 + $0x220] sm:$0xf] }
 0x185   :  { %v2058_v34 = vpop.f32.mrf.mxu2  ;;  %v4541_v17 = vor.u32 %v5204_v13, %v4540_v62  ;;  %v5228_v45 = vld [vmem:[#allocation9 + $0x20c] sm:$0xf0]  ;;  %v4622_v62 = vld [vmem:[#allocation9 + $0x1f0] sm:$0xf0] }
 0x186   :  { %v2072_v43 = vpop.f32.mrf.mxu3  ;;  %v2059_v4 = vadd.f32 %v2058_v34, %v2045_v32  ;;  %v4573_v34 = vor.u32 %v5212_v15, %v4572_v14  ;;  %3073 = vmatpush.bf16.msra.mxu3 %v4829_v53  ;;  %v2193_v30 = vadd.f32 %v2192_v33, %v2186_v50  ;;  %v5597_v11 = vmax.f32 %v2174_v49, 0.0  ;;  %v4396_v15 = vld [vmem:[#allocation9 + $0x20] sm:$0xf]  ;;  %v4750_v13 = vld [vmem:[#allocation9 + $0x2f0] sm:$0xf0] }
 0x187   :  { %v4397_v31 = vor.u32 %v5168_v16, %v4396_v15  ;;  %v4637_v50 = vor.u32 %v5228_v45, %v4636_v29  ;;  %v4734_v15 = vld [vmem:[#allocation9 + $0x2d0] sm:$0xf0]  ;;  %v5282_v16 = vld [vmem:[#allocation9 + $0x3c4] sm:$0xf] }
 0x188   :  { %v2073_v24 = vadd.f32 %v2072_v43, %v2059_v4  ;;  %v4684_v43 = vld [vmem:[#allocation9 + $0x260] sm:$0xf]  ;;  %3045 = vmatpush.bf16.msra.mxu1 %v4573_v34  ;;  %v2188_v34 = vmul.f32 %v5595_v7, %v5595_v7  ;;  %v2190_v35 = vmul.f32 %v5597_v11, %v5597_v11  ;;  %v4430_v29 = vld [vmem:[#allocation9 + $0x70] sm:$0xf0]  ;;  %v5206_v45 = vld [vmem:[#allocation9 + $0x164] sm:$0xf] }
 0x18a   :  { %3074 = vmatpush.bf16.msra.mxu3 %v4813_v9  ;;  %v5254_v9 = vld [vmem:[#allocation9 + $0x2e4] sm:$0xf] }
 0x18b   :  { %v4753_v61 = vor.u32 %v5254_v9, %v4750_v13  ;;  %v5202_v9 = vld [vmem:[#allocation9 + $0x144] sm:$0xf] }
 0x195   :  { %v2084_v37 = vpop.f32.mrf.mxu0 }
 0x196   :  { %v2085_v60 = vadd.f32 %v2084_v37, %v2071_v36  ;;  %v2098_v59 = vpop.f32.mrf.mxu1  ;;  %v5208_v36 = vld [vmem:[#allocation9 + $0x16c] sm:$0xf0] }
 0x197   :  { %v5240_v37 = vld [vmem:[#allocation9 + $0x26c] sm:$0xf0]  ;;  %v4557_v63 = vor.u32 %v5208_v36, %v4556_v5  ;;  %v4525_v5 = vor.u32 %v5200_v21, %v4524_v20  ;;  %v5182_v20 = vld [vmem:[#allocation9 + $0xa4] sm:$0xf]  ;;  %v4462_v21 = vld [vmem:[#allocation9 + $0xb0] sm:$0xf0] }
 0x198   :  { %v2099_v10 = vadd.f32 %v2098_v59, %v2085_v60  ;;  %v4685_v55 = vor.u32 %v5240_v37, %v4684_v43  ;;  %v5172_v60 = vld [vmem:[#allocation9 + $0x4c] sm:$0xf0] }
 0x199   :  { %v4413_v46 = vor.u32 %v5172_v60, %v4412_v56  ;;  %3046 = vmatpush.bf16.msra.mxu1 %v4557_v63  ;;  %v5190_v63 = vld [vmem:[#allocation9 + $0xe4] sm:$0xf]  ;;  %v4494_v56 = vld [vmem:[#allocation9 + $0xf0] sm:$0xf0] }
 0x19a   :  { %3060 = vmatpush.bf16.msra.mxu2 %v4685_v55  ;;  %v5222_v60 = vld [vmem:[#allocation9 + $0x1e4] sm:$0xf] }
 0x19b   :  { %3033 = vmatpush.bf16.msra.mxu0 %v4413_v46  ;;  %v4625_v33 = vor.u32 %v5222_v60, %v4622_v62  ;;  %v5218_v46 = vld [vmem:[#allocation9 + $0x1c4] sm:$0xf]  ;;  %v4814_v60 = vld [vmem:[#allocation9 + $0x370] sm:$0xf0] }
 0x19d   :  { %v2112_v25 = vpop.f32.mrf.mxu2  ;;  %v2086_v32 = vpop.f32.mrf.mxu0  ;;  %3047 = vmatpush.bf16.msra.mxu1 %v4541_v17 }
 0x19e   :  { %v2113_v27 = vadd.f32 %v2112_v25, %v2099_v10  ;;  %v2126_v28 = vpop.f32.mrf.mxu3  ;;  %v2087_v41 = vadd.f32 %v2086_v32, %v2073_v24  ;;  %v2100_v0 = vpop.f32.mrf.mxu1  ;;  %v4797_v10 = vor.u32 %v5268_v6, %v4796_v48  ;;  %v2189_v24 = vmul.f32 %v5591_v3, %v5591_v3  ;;  %v5264_v32 = vld [vmem:[#allocation9 + $0x32c] sm:$0xf0]  ;;  %3061 = vmatpush.bf16.msra.mxu2 %v4669_v58  ;;  %v5186_v48 = vld [vmem:[#allocation9 + $0xc4] sm:$0xf]  ;;  %v4478_v6 = vld [vmem:[#allocation9 + $0xd0] sm:$0xf0] }
 0x19f   :  { %3034 = vmatpush.bf16.msra.mxu0 %v4397_v31  ;;  %v4846_v31 = vld [vmem:[#allocation9 + $0x3b0] sm:$0xf0] }
 0x1a0   :  { %v2127_v40 = vadd.f32 %v2126_v28, %v2113_v27  ;;  %v2101_v59 = vadd.f32 %v2100_v0, %v2087_v41  ;;  %v5232_v27 = vld [vmem:[#allocation9 + $0x22c] sm:$0xf0]  ;;  %v4780_v28 = vld [vmem:[#allocation9 + $0x320] sm:$0xf]  ;;  %3075 = vmatpush.bf16.msra.mxu3 %v4797_v10  ;;  %v2197_v43 = vadd.f32 %v2189_v24, %v2188_v34  ;;  %v4497_v0 = vor.u32 %v5190_v63, %v4494_v56  ;;  %v5278_v34 = vld [vmem:[#allocation9 + $0x3a4] sm:$0xf] }
 0x1a1   :  { %v4653_v44 = vor.u32 %v5232_v27, %v4652_v23  ;;  %v4781_v53 = vor.u32 %v5264_v32, %v4780_v28  ;;  %3048 = vmatpush.bf16.msra.mxu1 %v4525_v5  ;;  %v5214_v23 = vld [vmem:[#allocation9 + $0x1a4] sm:$0xf]  ;;  %v4465_v24 = vor.u32 %v5182_v20, %v4462_v21  ;;  %v4718_v27 = vld [vmem:[#allocation9 + $0x2b0] sm:$0xf0] }
 0x1a2   :  { %v2171_v54 = vadd.f32 %v2163_v26, %v2127_v40  ;;  %v2198_v47 = vadd.f32 %v2197_v43, %v2190_v35  ;;  %v4508_v40 = vld [vmem:[#allocation9 + $0x100] sm:$0xf]  ;;  %v4849_v35 = vor.u32 %v5278_v34, %v4846_v31  ;;  %v4446_v5 = vld [vmem:[#allocation9 + $0x90] sm:$0xf0]  ;;  %v5270_v56 = vld [vmem:[#allocation9 + $0x364] sm:$0xf] }
 0x1a3   :  { %3062 = vmatpush.bf16.msra.mxu2 %v4653_v44  ;;  %v4509_v49 = vor.u32 %v5196_v42, %v4508_v40  ;;  %v5210_v44 = vld [vmem:[#allocation9 + $0x184] sm:$0xf]  ;;  %v4574_v43 = vld [vmem:[#allocation9 + $0x190] sm:$0xf0]  ;;  %v4817_v62 = vor.u32 %v5270_v56, %v4814_v60  ;;  %v4500_v56 = vld [vmem:[#allocation9 + $0xe8] sm:$0xf] }
 0x1a4   :  { %v5593_v4 = vmax.f32 %v2171_v54, 0.0  ;;  %3076 = vmatpush.bf16.msra.mxu3 %v4781_v53  ;;  %v5260_v54 = vld [vmem:[#allocation9 + $0x30c] sm:$0xf0]  ;;  %v4830_v40 = vld [vmem:[#allocation9 + $0x390] sm:$0xf0] }
 0x1a5   :  { %v2114_v8 = vpop.f32.mrf.mxu2  ;;  %v4765_v55 = vor.u32 %v5260_v54, %v4764_v52  ;;  %3049 = vmatpush.bf16.msra.mxu1 %v4509_v49  ;;  %v5174_v42 = vld [vmem:[#allocation9 + $0x64] sm:$0xf]  ;;  %v4686_v54 = vld [vmem:[#allocation9 + $0x270] sm:$0xf0]  ;;  %v5193_v60 = vld [vmem:[#allocation9 + $0xf4] sm:$0xf0] }
 0x1a6   :  { %v2115_v12 = vadd.f32 %v2114_v8, %v2101_v59  ;;  %v2187_v14 = vmul.f32 %v5593_v4, %v5593_v4  ;;  %v2128_v18 = vpop.f32.mrf.mxu3  ;;  %v4878_v59 = vld [vmem:[#allocation9 + $0x3f0] sm:$0xf0]  ;;  %v4433_v49 = vor.u32 %v5174_v42, %v4430_v29  ;;  %v5238_v52 = vld [vmem:[#allocation9 + $0x264] sm:$0xf] }
 0x1a7   :  { %3063 = vmatpush.bf16.msra.mxu2 %v4637_v50  ;;  %v4881_v8 = vor.u32 %v5286_v2, %v4878_v59  ;;  %v4558_v50 = vld [vmem:[#allocation9 + $0x170] sm:$0xf0]  ;;  %v5258_v31 = vld [vmem:[#allocation9 + $0x304] sm:$0xf] }
 0x1a8   :  { %v2129_v25 = vadd.f32 %v2128_v18, %v2115_v12  ;;  %v2194_v22 = vadd.f32 %v2193_v30, %v2187_v14  ;;  %3077 = vmatpush.bf16.msra.mxu3 %v4765_v55  ;;  %v4481_v30 = vor.u32 %v5186_v48, %v4478_v6  ;;  %v4606_v12 = vld [vmem:[#allocation9 + $0x1d0] sm:$0xf0]  ;;  %v5250_v14 = vld [vmem:[#allocation9 + $0x2c4] sm:$0xf]  ;;  %v4561_v63 = vor.u32 %v5206_v45, %v4558_v50 }
 0x1a9   :  { %3098 = vmatpush.bf16.msrb.mxu1 %v4625_v33  ;;  %v4609_v17 = vor.u32 %v5218_v46, %v4606_v12  ;;  %v4862_v18 = vld [vmem:[#allocation9 + $0x3d0] sm:$0xf0]  ;;  %v4737_v58 = vor.u32 %v5250_v14, %v4734_v15  ;;  %v4689_v55 = vor.u32 %v5238_v52, %v4686_v54  ;;  %v5166_v46 = vld [vmem:[#allocation9 + $0x24] sm:$0xf] }
 0x1aa   :  { %v2175_v39 = vadd.f32 %v2163_v26, %v2129_v25  ;;  %2195 = vadd.xlane.f32.xlu0 %v2194_v22  ;;  %v4380_v26 = vld [vmem:[#allocation9] sm:$0xf]  ;;  %v4865_v10 = vor.u32 %v5282_v16, %v4862_v18  ;;  %v4590_v25 = vld [vmem:[#allocation9 + $0x1b0] sm:$0xf0]  ;;  %v5246_v22 = vld [vmem:[#allocation9 + $0x2a4] sm:$0xf] }
 0x1ab   :  { %v4381_v41 = vor.u32 %v5164_v38, %v4380_v26  ;;  %3112 = vmatpush.bf16.msrb.mxu2 %v4753_v61  ;;  %v4593_v28 = vor.u32 %v5214_v23, %v4590_v25  ;;  %v4721_v32 = vor.u32 %v5246_v22, %v4718_v27  ;;  %v5274_v38 = vld [vmem:[#allocation9 + $0x384] sm:$0xf]  ;;  %v4414_v33 = vld [vmem:[#allocation9 + $0x50] sm:$0xf0] }
 0x1ac   :  { %v5609_v36 = vmax.f32 %v2175_v39, 0.0  ;;  %3126 = vmatpush.bf16.msrb.mxu3 %v4881_v8  ;;  %v5178_v39 = vld [vmem:[#allocation9 + $0x84] sm:$0xf]  ;;  %v4542_v2 = vld [vmem:[#allocation9 + $0x150] sm:$0xf0] }
 0x1ad   :  { %3035 = vmatpush.bf16.msra.mxu0 %v4381_v41  ;;  %3099 = vmatpush.bf16.msrb.mxu1 %v4609_v17  ;;  %v4449_v53 = vor.u32 %v5178_v39, %v4446_v5  ;;  %v4833_v41 = vor.u32 %v5274_v38, %v4830_v40  ;;  %v5234_v61 = vld [vmem:[#allocation9 + $0x244] sm:$0xf]  ;;  %v4670_v59 = vld [vmem:[#allocation9 + $0x250] sm:$0xf0]  ;;  %v4545_v48 = vor.u32 %v5202_v9, %v4542_v2 }
 0x1ae   :  { %v2191_v37 = vmul.f32 %v5609_v36, %v5609_v36  ;;  %v4673_v6 = vor.u32 %v5234_v61, %v4670_v59  ;;  %v5266_v8 = vld [vmem:[#allocation9 + $0x344] sm:$0xf]  ;;  %v4398_v14 = vld [vmem:[#allocation9 + $0x30] sm:$0xf0]  ;;  %v4756_v59 = vld [vmem:[#allocation9 + $0x2e8] sm:$0xf] }
 0x1af   :  { %3113 = vmatpush.bf16.msrb.mxu2 %v4737_v58  ;;  %v5198_v17 = vld [vmem:[#allocation9 + $0x124] sm:$0xf]  ;;  %v4526_v15 = vld [vmem:[#allocation9 + $0x130] sm:$0xf0] }
 0x1b0   :  { %v2199_v57 = vadd.f32 %v2198_v47, %v2191_v37  ;;  %3127 = vmatpush.bf16.msrb.mxu3 %v4865_v10  ;;  %v5242_v37 = vld [vmem:[#allocation9 + $0x284] sm:$0xf]  ;;  %v4702_v47 = vld [vmem:[#allocation9 + $0x290] sm:$0xf0]  ;;  %v4401_v10 = vor.u32 %v5166_v46, %v4398_v14  ;;  %v4529_v20 = vor.u32 %v5198_v17, %v4526_v15  ;;  %v5257_v46 = vld [vmem:[#allocation9 + $0x2f4] sm:$0xf0]  ;;  %v4501_v14 = vor.u32 %v5193_v60, %v4500_v56 }
 0x1b1   :  { %3084 = vmatpush.bf16.msrb.mxu0 %v4497_v0  ;;  %3100 = vmatpush.bf16.msrb.mxu1 %v4593_v28  ;;  %v4705_v26 = vor.u32 %v5242_v37, %v4702_v47  ;;  %v5170_v0 = vld [vmem:[#allocation9 + $0x44] sm:$0xf]  ;;  %v4654_v18 = vld [vmem:[#allocation9 + $0x230] sm:$0xf0]  ;;  %v4564_v60 = vld [vmem:[#allocation9 + $0x168] sm:$0xf] }
 0x1b2   :  { %2200 = vadd.xlane.f32.xlu0 %v2199_v57  ;;  %v4577_v57 = vor.u32 %v5210_v44, %v4574_v43  ;;  %v4417_v13 = vor.u32 %v5170_v0, %v4414_v33  ;;  %v5230_v16 = vld [vmem:[#allocation9 + $0x224] sm:$0xf]  ;;  %v4782_v21 = vld [vmem:[#allocation9 + $0x330] sm:$0xf0]  ;;  %v4628_v0 = vld [vmem:[#allocation9 + $0x1e8] sm:$0xf] }
 0x1b3   :  { %3114 = vmatpush.bf16.msrb.mxu2 %v4721_v32  ;;  %v5262_v58 = vld [vmem:[#allocation9 + $0x324] sm:$0xf]  ;;  %v4382_v25 = vld [vmem:[#allocation9 + $0x10] sm:$0xf0]  ;;  %v5225_v33 = vld [vmem:[#allocation9 + $0x1f4] sm:$0xf0] }
 0x1b4   :  { %3128 = vmatpush.bf16.msrb.mxu3 %v4849_v35  ;;  %v5162_v23 = vld [vmem:[#allocation9 + $0x4] sm:$0xf]  ;;  %v4510_v27 = vld [vmem:[#allocation9 + $0x110] sm:$0xf0]  ;;  %v4785_v28 = vor.u32 %v5262_v58, %v4782_v21  ;;  %v4629_v17 = vor.u32 %v5225_v33, %v4628_v0  ;;  %v5221_v58 = vld [vmem:[#allocation9 + $0x1d4] sm:$0xf0] }
 0x1b5   :  { %3085 = vmatpush.bf16.msrb.mxu0 %v4481_v30  ;;  %3101 = vmatpush.bf16.msrb.mxu1 %v4577_v57  ;;  %v4798_v30 = vld [vmem:[#allocation9 + $0x350] sm:$0xf0]  ;;  %v5194_v22 = vld [vmem:[#allocation9 + $0x104] sm:$0xf]  ;;  %v4385_v39 = vor.u32 %v5162_v23, %v4382_v25  ;;  %v5285_v21 = vld [vmem:[#allocation9 + $0x3d4] sm:$0xf0] }
 0x1b6   :  { %v4801_v12 = vor.u32 %v5266_v8, %v4798_v30  ;;  %v5226_v32 = vld [vmem:[#allocation9 + $0x204] sm:$0xf]  ;;  %v4638_v34 = vld [vmem:[#allocation9 + $0x210] sm:$0xf0]  ;;  %v4513_v5 = vor.u32 %v5194_v22, %v4510_v27  ;;  %v4468_v25 = vld [vmem:[#allocation9 + $0xa8] sm:$0xf] }
 0x1b7   :  { %3115 = vmatpush.bf16.msrb.mxu2 %v4705_v26  ;;  %v4766_v35 = vld [vmem:[#allocation9 + $0x310] sm:$0xf0]  ;;  %v5185_v22 = vld [vmem:[#allocation9 + $0xb4] sm:$0xf0]  ;;  %v4692_v0 = vld [vmem:[#allocation9 + $0x268] sm:$0xf] }
 0x1b8   :  { %3129 = vmatpush.bf16.msrb.mxu3 %v4833_v41  ;;  %v4769_v37 = vor.u32 %v5258_v31, %v4766_v35  ;;  %v4724_v31 = vld [vmem:[#allocation9 + $0x2a8] sm:$0xf]  ;;  %v5249_v35 = vld [vmem:[#allocation9 + $0x2b4] sm:$0xf0] }
 0x1b9   :  { %3086 = vmatpush.bf16.msrb.mxu0 %v4465_v24  ;;  %3102 = vmatpush.bf16.msrb.mxu1 %v4561_v63  ;;  %v4657_v24 = vor.u32 %v5230_v16, %v4654_v18  ;;  %v5189_v16 = vld [vmem:[#allocation9 + $0xd4] sm:$0xf0] }
 0x1ba   :  { %v5241_v33 = vld [vmem:[#allocation9 + $0x274] sm:$0xf0] }
 0x1bb   :  { %3116 = vmatpush.bf16.msrb.mxu2 %v4689_v55 }
 0x1bc   :  { %3130 = vmatpush.bf16.msrb.mxu3 %v4817_v62 }
 0x1bd   :  { %3087 = vmatpush.bf16.msrb.mxu0 %v4449_v53  ;;  %3103 = vmatpush.bf16.msrb.mxu1 %v4545_v48  ;;  %v4641_v53 = vor.u32 %v5226_v32, %v4638_v34  ;;  %v4596_v32 = vld [vmem:[#allocation9 + $0x1a8] sm:$0xf]  ;;  %v5217_v34 = vld [vmem:[#allocation9 + $0x1b4] sm:$0xf0] }
 0x1bf   :  { %3117 = vmatpush.bf16.msrb.mxu2 %v4673_v6 }
 0x1c0   :  { %3131 = vmatpush.bf16.msrb.mxu3 %v4801_v12  ;;  %v5289_v12 = vld [vmem:[#allocation9 + $0x3f4] sm:$0xf0] }
 0x1c1   :  { %3088 = vmatpush.bf16.msrb.mxu0 %v4433_v49  ;;  %3104 = vmatpush.bf16.msrb.mxu1 %v4529_v20  ;;  %v4868_v20 = vld [vmem:[#allocation9 + $0x3c8] sm:$0xf] }
 0x1c3   :  { %3118 = vmatpush.bf16.msrb.mxu2 %v4657_v24 }
 0x1c4   :  { %3132 = vmatpush.bf16.msrb.mxu3 %v4785_v28  ;;  %v4869_v28 = vor.u32 %v5285_v21, %v4868_v20  ;;  %v4660_v20 = vld [vmem:[#allocation9 + $0x228] sm:$0xf]  ;;  %v5233_v21 = vld [vmem:[#allocation9 + $0x234] sm:$0xf0] }
 0x1c5   :  { %3089 = vmatpush.bf16.msrb.mxu0 %v4417_v13  ;;  %3105 = vmatpush.bf16.msrb.mxu1 %v4513_v5  ;;  %v5281_v5 = vld [vmem:[#allocation9 + $0x3b4] sm:$0xf0] }
 0x1c7   :  { %3119 = vmatpush.bf16.msrb.mxu2 %v4641_v53  ;;  %v4469_v53 = vor.u32 %v5185_v22, %v4468_v25  ;;  %v4388_v25 = vld [vmem:[#allocation9 + $0x8] sm:$0xf] }
 0x1c8   :  { %3133 = vmatpush.bf16.msrb.mxu3 %v4769_v37  ;;  %v4452_v37 = vld [vmem:[#allocation9 + $0x88] sm:$0xf] }
 0x1c9   :  { %3090 = vmatpush.bf16.msrb.mxu0 %v4401_v10  ;;  %v5253_v10 = vld [vmem:[#allocation9 + $0x2d4] sm:$0xf0] }
 0x1cd   :  { %3091 = vmatpush.bf16.msrb.mxu0 %v4385_v39  ;;  %v4852_v39 = vld [vmem:[#allocation9 + $0x3a8] sm:$0xf] }
 0x21d   :  { %v5613_v44 = vpop.xlane.xlu0 %2195 }
 0x21e   :  { %v2226_v43 = vmax.f32 %v5613_v44, 1e-24  ;;  %vm2209_vm6 = vcmp.eq.f32.partialorder %v5613_v44, inf  ;;  %vm2211_vm8 = vcmp.eq.f32.partialorder %v5613_v44, 0.0 }
 0x220   :  { %5299 = vrsqrt.f32 %v2226_v43  ;;  %vm2234_vm1 = vweird.f32 %v2226_v43 }
 0x225   :  { %v5616_v47 = vpop.xlane.xlu0 %2200 }
 0x226   :  { %v5300_v57 = vpop.eup %5299  ;;  %v2227_v26 = vmax.f32 %v5616_v47, 1e-24  ;;  %vm2221_vm9 = vcmp.eq.f32.partialorder %v5616_v47, inf  ;;  %vm2223_vm10 = vcmp.eq.f32.partialorder %v5616_v47, 0.0 }
 0x227   :  { %v2229_v38 = vmul.f32 %v5300_v57, %v2226_v43  ;;  %vm2235_vm0 = vweird.f32 %v5300_v57  ;;  %v4597_v43 = vor.u32 %v5217_v34, %v4596_v32  ;;  %v4516_v32 = vld [vmem:[#allocation9 + $0x108] sm:$0xf]  ;;  %v5197_v34 = vld [vmem:[#allocation9 + $0x114] sm:$0xf0] }
 0x228   :  { %5301 = vrsqrt.f32 %v2227_v26  ;;  %vm2236_vm2 = vmor %vm2234_vm1, %vm2235_vm0  ;;  %vm2244_vm4 = vweird.f32 %v2227_v26 }
 0x229   :  { %v2230_v40 = vmul.f32 %v5300_v57, %v2229_v38  ;;  %v4853_v38 = vor.u32 %v5281_v5, %v4852_v39  ;;  %v4644_v39 = vld [vmem:[#allocation9 + $0x208] sm:$0xf]  ;;  %v5229_v5 = vld [vmem:[#allocation9 + $0x214] sm:$0xf0]  ;;  %5303 = vrsqrt.f32 %v5613_v44 }
 0x22a   :  { %5305 = vrsqrt.f32 %v5616_v47 }
 0x22b   :  { %v2231_v41 = vmul.f32 0.5, %v2230_v40  ;;  %v4580_v40 = vld [vmem:[#allocation9 + $0x188] sm:$0xf] }
 0x22d   :  { %v2232_v42 = vsub.f32 1.5, %v2231_v41  ;;  %v5213_v41 = vld [vmem:[#allocation9 + $0x194] sm:$0xf0] }
 0x22e   :  { %v5302_v29 = vpop.eup %5301 }
 0x22f   :  { %v2239_v45 = vmul.f32 %v5302_v29, %v2227_v26  ;;  %v2233_v49 = vmul.f32 %v5300_v57, %v2232_v42  ;;  %vm2245_vm3 = vweird.f32 %v5302_v29  ;;  %v4725_v26 = vor.u32 %v5249_v35, %v4724_v31  ;;  %v4708_v42 = vld [vmem:[#allocation9 + $0x288] sm:$0xf] }
 0x230   :  { %vm2246_vm5 = vmor %vm2244_vm4, %vm2245_vm3  ;;  %v4661_v31 = vor.u32 %v5233_v21, %v4660_v20  ;;  %v5211_v20 = vld [vmem:[#allocation9 + $0x18c] sm:$0xf]  ;;  %v4582_v21 = vld [vmem:[#allocation9 + $0x198] sm:$0xf0] }
 0x231   :  { %v2240_v50 = vmul.f32 %v5302_v29, %v2239_v45  ;;  %v2237_v54 = vsel %vm2236_vm2, %v5300_v57, %v2233_v49  ;;  %v5181_v57 = vld [vmem:[#allocation9 + $0x94] sm:$0xf0]  ;;  %v4836_v45 = vld [vmem:[#allocation9 + $0x388] sm:$0xf] }
 0x232   :  { %v2248_v62 = vmul.f32 %v2237_v54, %v5569_v51  ;;  %v2249_v13 = vmul.f32 %v2237_v54, %v5559_v1  ;;  %v2250_v2 = vmul.f32 %v2237_v54, %v5572_v19  ;;  %v2251_v61 = vmul.f32 %v2237_v54, %v5593_v4  ;;  %v4884_v51 = vld [vmem:[#allocation9 + $0x3e8] sm:$0xf]  ;;  %v5277_v49 = vld [vmem:[#allocation9 + $0x394] sm:$0xf0] }
 0x233   :  { %v2241_v52 = vmul.f32 0.5, %v2240_v50  ;;  %v4885_v18 = vor.u32 %v5289_v12, %v4884_v51  ;;  %v4453_v50 = vor.u32 %v5181_v57, %v4452_v37  ;;  %v4436_v54 = vld [vmem:[#allocation9 + $0x68] sm:$0xf]  ;;  %v4837_v56 = vor.u32 %v5277_v49, %v4836_v45  ;;  %v5237_v12 = vld [vmem:[#allocation9 + $0x254] sm:$0xf0] }
 0x234   :  { %v4676_v51 = vld [vmem:[#allocation9 + $0x248] sm:$0xf]  ;;  %v5191_v37 = vld [vmem:[#allocation9 + $0xec] sm:$0xf]  ;;  %v4502_v57 = vld [vmem:[#allocation9 + $0xf8] sm:$0xf0] }
 0x235   :  { %v2242_v63 = vsub.f32 1.5, %v2241_v52  ;;  %v4581_v52 = vor.u32 %v5213_v41, %v4580_v40  ;;  %v5255_v40 = vld [vmem:[#allocation9 + $0x2ec] sm:$0xf]  ;;  %v4886_v49 = vld [vmem:[#allocation9 + $0x3f8] sm:$0xf0] }
 0x236   :  { %v5287_v45 = vld [vmem:[#allocation9 + $0x3ec] sm:$0xf] }
 0x237   :  { %v2243_v55 = vmul.f32 %v5302_v29, %v2242_v63  ;;  %v5177_v63 = vld [vmem:[#allocation9 + $0x74] sm:$0xf0] }
 0x239   :  { %v2247_v9 = vsel %vm2246_vm5, %v5302_v29, %v2243_v55  ;;  %v5245_v29 = vld [vmem:[#allocation9 + $0x294] sm:$0xf0] }
 0x23a   :  { %v2252_v48 = vmul.f32 %v2247_v9, %v5595_v7  ;;  %v2253_v6 = vmul.f32 %v2247_v9, %v5591_v3  ;;  %v2254_v8 = vmul.f32 %v2247_v9, %v5597_v11  ;;  %v2255_v30 = vmul.f32 %v2247_v9, %v5609_v36  ;;  %v4484_v7 = vld [vmem:[#allocation9 + $0xc8] sm:$0xf] }
 0x23b   :  { %v4757_v3 = vor.u32 %v5257_v46, %v4756_v59  ;;  %v4612_v11 = vld [vmem:[#allocation9 + $0x1c8] sm:$0xf]  ;;  %v4485_v23 = vor.u32 %v5189_v16, %v4484_v7  ;;  %v4709_v55 = vor.u32 %v5245_v29, %v4708_v42  ;;  %v5205_v46 = vld [vmem:[#allocation9 + $0x154] sm:$0xf0]  ;;  %v4517_v42 = vor.u32 %v5197_v34, %v4516_v32  ;;  %v4758_v29 = vld [vmem:[#allocation9 + $0x2f8] sm:$0xf0] }
 0x23c   :  { %v5627_v15 = vpack.c.bf16 %v2252_v48, %v2248_v62  ;;  %v5629_v1 = vpack.c.bf16 %v2253_v6, %v2249_v13  ;;  %v5631_v19 = vpack.c.bf16 %v2254_v8, %v2250_v2  ;;  %v5633_v4 = vpack.c.bf16 %v2255_v30, %v2251_v61  ;;  %v4740_v36 = vld [vmem:[#allocation9 + $0x2c8] sm:$0xf]  ;;  %v5209_v62 = vld [vmem:[#allocation9 + $0x174] sm:$0xf0]  ;;  %v5175_v32 = vld [vmem:[#allocation9 + $0x6c] sm:$0xf] }
 0x23d   :  { %v4613_v24 = vor.u32 %v5221_v58, %v4612_v11  ;;  %v4741_v27 = vor.u32 %v5253_v10, %v4740_v36  ;;  %v4820_v9 = vld [vmem:[#allocation9 + $0x368] sm:$0xf]  ;;  %v5273_v13 = vld [vmem:[#allocation9 + $0x374] sm:$0xf0]  ;;  %v4437_v2 = vor.u32 %v5177_v63, %v4436_v54  ;;  %v4565_v61 = vor.u32 %v5209_v62, %v4564_v60  ;;  %v4438_v34 = vld [vmem:[#allocation9 + $0x78] sm:$0xf0] }
 0x23e   :  { %3036 = vmatmul.bf16.vlgmr.msra.gmra.mxu0 %v5627_v15  ;;  %3050 = vmatmul.bf16.vlgmr.msra.gmra.mxu1 %v5629_v1  ;;  %v4420_v59 = vld [vmem:[#allocation9 + $0x48] sm:$0xf]  ;;  %v5173_v48 = vld [vmem:[#allocation9 + $0x54] sm:$0xf0]  ;;  %v4693_v6 = vor.u32 %v5241_v33, %v4692_v0  ;;  %v4821_v8 = vor.u32 %v5273_v13, %v4820_v9  ;;  %v4677_v11 = vor.u32 %v5237_v12, %v4676_v51  ;;  %v5219_v0 = vld [vmem:[#allocation9 + $0x1cc] sm:$0xf] }
 0x23f   :  { %3064 = vmatmul.bf16.vlgmr.msra.gmra.mxu2 %v5631_v19  ;;  %3078 = vmatmul.bf16.vlgmr.msra.gmra.mxu3 %v5633_v4  ;;  %v4548_v30 = vld [vmem:[#allocation9 + $0x148] sm:$0xf]  ;;  %v4421_v7 = vor.u32 %v5173_v48, %v4420_v59  ;;  %v5201_v10 = vld [vmem:[#allocation9 + $0x134] sm:$0xf0]  ;;  %v4505_v54 = vor.u32 %v5191_v37, %v4502_v57  ;;  %v4761_v60 = vor.u32 %v5255_v40, %v4758_v29  ;;  %v4614_v33 = vld [vmem:[#allocation9 + $0x1d8] sm:$0xf0] }
 0x240   :  { %3140 = vmatpush.bf16.msra.mxu0 %v4501_v14  ;;  %3154 = vmatpush.bf16.msra.mxu1 %v4629_v17  ;;  %v4804_v14 = vld [vmem:[#allocation9 + $0x348] sm:$0xf]  ;;  %v5269_v17 = vld [vmem:[#allocation9 + $0x354] sm:$0xf0]  ;;  %v4549_v16 = vor.u32 %v5205_v46, %v4548_v30  ;;  %v4889_v62 = vor.u32 %v5287_v45, %v4886_v49  ;;  %v5251_v9 = vld [vmem:[#allocation9 + $0x2cc] sm:$0xf]  ;;  %v4617_v48 = vor.u32 %v5219_v0, %v4614_v33 }
 0x241   :  { %3168 = vmatpush.bf16.msra.mxu2 %v4757_v3  ;;  %3182 = vmatpush.bf16.msra.mxu3 %v4885_v18  ;;  %v4404_v3 = vld [vmem:[#allocation9 + $0x28] sm:$0xf]  ;;  %v5169_v18 = vld [vmem:[#allocation9 + $0x34] sm:$0xf0]  ;;  %v4805_v58 = vor.u32 %v5269_v17, %v4804_v14  ;;  %v4742_v13 = vld [vmem:[#allocation9 + $0x2d8] sm:$0xf0] }
 0x242   :  { %v4532_v36 = vld [vmem:[#allocation9 + $0x128] sm:$0xf]  ;;  %v4405_v22 = vor.u32 %v5169_v18, %v4404_v3  ;;  %v4745_v30 = vor.u32 %v5251_v9, %v4742_v13  ;;  %v5215_v51 = vld [vmem:[#allocation9 + $0x1ac] sm:$0xf]  ;;  %v4598_v12 = vld [vmem:[#allocation9 + $0x1b8] sm:$0xf0] }
 0x243   :  { %v5247_v14 = vld [vmem:[#allocation9 + $0x2ac] sm:$0xf]  ;;  %v4726_v17 = vld [vmem:[#allocation9 + $0x2b8] sm:$0xf0]  ;;  %v4601_v18 = vor.u32 %v5215_v51, %v4598_v12 }
 0x244   :  { %3141 = vmatpush.bf16.msra.mxu0 %v4485_v23  ;;  %3155 = vmatpush.bf16.msra.mxu1 %v4613_v24  ;;  %v4788_v23 = vld [vmem:[#allocation9 + $0x328] sm:$0xf]  ;;  %v5265_v24 = vld [vmem:[#allocation9 + $0x334] sm:$0xf0]  ;;  %v5271_v37 = vld [vmem:[#allocation9 + $0x36c] sm:$0xf] }
 0x245   :  { %3169 = vmatpush.bf16.msra.mxu2 %v4741_v27  ;;  %3183 = vmatpush.bf16.msra.mxu3 %v4869_v28  ;;  %v4533_v27 = vor.u32 %v5201_v10, %v4532_v36  ;;  %v5165_v28 = vld [vmem:[#allocation9 + $0x14] sm:$0xf0]  ;;  %v4789_v35 = vor.u32 %v5265_v24, %v4788_v23  ;;  %v4729_v36 = vor.u32 %v5247_v14, %v4726_v17  ;;  %v5243_v23 = vld [vmem:[#allocation9 + $0x28c] sm:$0xf]  ;;  %v4710_v24 = vld [vmem:[#allocation9 + $0x298] sm:$0xf0] }
 0x246   :  { %v4389_v41 = vor.u32 %v5165_v28, %v4388_v25  ;;  %v5275_v25 = vld [vmem:[#allocation9 + $0x38c] sm:$0xf]  ;;  %v4585_v28 = vor.u32 %v5211_v20, %v4582_v21  ;;  %v4822_v57 = vld [vmem:[#allocation9 + $0x378] sm:$0xf0] }
 0x247   :  { %v5171_v40 = vld [vmem:[#allocation9 + $0x4c] sm:$0xf]  ;;  %v4825_v29 = vor.u32 %v5271_v37, %v4822_v57  ;;  %v4550_v49 = vld [vmem:[#allocation9 + $0x158] sm:$0xf0] }
 0x248   :  { %3142 = vmatpush.bf16.msra.mxu0 %v4469_v53  ;;  %3156 = vmatpush.bf16.msra.mxu1 %v4597_v43  ;;  %v4772_v53 = vld [vmem:[#allocation9 + $0x308] sm:$0xf]  ;;  %v5261_v43 = vld [vmem:[#allocation9 + $0x314] sm:$0xf0]  ;;  %v5203_v45 = vld [vmem:[#allocation9 + $0x14c] sm:$0xf] }
 0x249   :  { %3170 = vmatpush.bf16.msra.mxu2 %v4725_v26  ;;  %3184 = vmatpush.bf16.msra.mxu3 %v4853_v38  ;;  %v5223_v26 = vld [vmem:[#allocation9 + $0x1ec] sm:$0xf]  ;;  %v4630_v38 = vld [vmem:[#allocation9 + $0x1f8] sm:$0xf0] }
 0x24a   :  { %v4633_v63 = vor.u32 %v5223_v26, %v4630_v38  ;;  %v4441_v26 = vor.u32 %v5175_v32, %v4438_v34  ;;  %v5199_v9 = vld [vmem:[#allocation9 + $0x12c] sm:$0xf]  ;;  %v4534_v13 = vld [vmem:[#allocation9 + $0x138] sm:$0xf0] }
 0x24b   :  { %v5195_v14 = vld [vmem:[#allocation9 + $0x10c] sm:$0xf]  ;;  %v4518_v17 = vld [vmem:[#allocation9 + $0x118] sm:$0xf0] }
 0x24c   :  { %3143 = vmatpush.bf16.msra.mxu0 %v4453_v50  ;;  %3157 = vmatpush.bf16.msra.mxu1 %v4581_v52  ;;  %v4645_v50 = vor.u32 %v5229_v5, %v4644_v39  ;;  %v4773_v52 = vor.u32 %v5261_v43, %v4772_v53  ;;  %v5207_v39 = vld [vmem:[#allocation9 + $0x16c] sm:$0xf]  ;;  %v4566_v5 = vld [vmem:[#allocation9 + $0x178] sm:$0xf0] }
 0x24d   :  { %3171 = vmatpush.bf16.msra.mxu2 %v4709_v55  ;;  %3185 = vmatpush.bf16.msra.mxu3 %v4837_v56  ;;  %v5187_v55 = vld [vmem:[#allocation9 + $0xcc] sm:$0xf]  ;;  %v4486_v56 = vld [vmem:[#allocation9 + $0xd8] sm:$0xf0]  ;;  %v4569_v38 = vor.u32 %v5207_v39, %v4566_v5 }
 0x24e   :  { %3092 = vmatmul.bf16.vlgmr.msrb.gmra.mxu0 %v5627_v15  ;;  %3106 = vmatmul.bf16.vlgmr.msrb.gmra.mxu1 %v5629_v1  ;;  %v4489_v59 = vor.u32 %v5187_v55, %v4486_v56  ;;  %v5239_v53 = vld [vmem:[#allocation9 + $0x26c] sm:$0xf]  ;;  %v4694_v43 = vld [vmem:[#allocation9 + $0x278] sm:$0xf0]  ;;  %v4553_v56 = vor.u32 %v5203_v45, %v4550_v49 }
 0x24f   :  { %3120 = vmatmul.bf16.vlgmr.msrb.gmra.mxu2 %v5631_v19  ;;  %3134 = vmatmul.bf16.vlgmr.msrb.gmra.mxu3 %v5633_v4 }
 0x250   :  { %3144 = vmatpush.bf16.msra.mxu0 %v4437_v2  ;;  %3158 = vmatpush.bf16.msra.mxu1 %v4565_v61  ;;  %v5283_v2 = vld [vmem:[#allocation9 + $0x3cc] sm:$0xf]  ;;  %v4870_v61 = vld [vmem:[#allocation9 + $0x3d8] sm:$0xf0] }
 0x251   :  { %3172 = vmatpush.bf16.msra.mxu2 %v4693_v6  ;;  %3186 = vmatpush.bf16.msra.mxu3 %v4821_v8  ;;  %v5183_v6 = vld [vmem:[#allocation9 + $0xac] sm:$0xf]  ;;  %v4470_v8 = vld [vmem:[#allocation9 + $0xb8] sm:$0xf0]  ;;  %v4873_v46 = vor.u32 %v5283_v2, %v4870_v61 }
 0x252   :  { %v4473_v3 = vor.u32 %v5183_v6, %v4470_v8  ;;  %v5231_v2 = vld [vmem:[#allocation9 + $0x22c] sm:$0xf]  ;;  %v4662_v61 = vld [vmem:[#allocation9 + $0x238] sm:$0xf0]  ;;  %v4537_v8 = vor.u32 %v5199_v9, %v4534_v13 }
 0x253   :  { %v4665_v51 = vor.u32 %v5231_v2, %v4662_v61 }
 0x254   :  { %3145 = vmatpush.bf16.msra.mxu0 %v4421_v7  ;;  %3159 = vmatpush.bf16.msra.mxu1 %v4549_v16  ;;  %v5279_v7 = vld [vmem:[#allocation9 + $0x3ac] sm:$0xf]  ;;  %v4854_v16 = vld [vmem:[#allocation9 + $0x3b8] sm:$0xf0] }
 0x255   :  { %3173 = vmatpush.bf16.msra.mxu2 %v4677_v11  ;;  %3187 = vmatpush.bf16.msra.mxu3 %v4805_v58  ;;  %v5179_v11 = vld [vmem:[#allocation9 + $0x8c] sm:$0xf]  ;;  %v4454_v58 = vld [vmem:[#allocation9 + $0x98] sm:$0xf0]  ;;  %v4857_v10 = vor.u32 %v5279_v7, %v4854_v16 }
 0x256   :  { %v5227_v7 = vld [vmem:[#allocation9 + $0x20c] sm:$0xf]  ;;  %v4646_v16 = vld [vmem:[#allocation9 + $0x218] sm:$0xf0] }
 0x258   :  { %3146 = vmatpush.bf16.msra.mxu0 %v4405_v22  ;;  %3160 = vmatpush.bf16.msra.mxu1 %v4533_v27  ;;  %v4838_v22 = vld [vmem:[#allocation9 + $0x398] sm:$0xf0]  ;;  %v4457_v27 = vor.u32 %v5179_v11, %v4454_v58  ;;  %v4521_v58 = vor.u32 %v5195_v14, %v4518_v17 }
 0x259   :  { %3174 = vmatpush.bf16.msra.mxu2 %v4661_v31  ;;  %3188 = vmatpush.bf16.msra.mxu3 %v4789_v35  ;;  %v4713_v31 = vor.u32 %v5243_v23, %v4710_v24  ;;  %v4841_v35 = vor.u32 %v5275_v25, %v4838_v22 }
 0x25c   :  { %3147 = vmatpush.bf16.msra.mxu0 %v4389_v41  ;;  %3161 = vmatpush.bf16.msra.mxu1 %v4517_v42  ;;  %v4422_v41 = vld [vmem:[#allocation9 + $0x58] sm:$0xf0]  ;;  %v4697_v42 = vor.u32 %v5239_v53, %v4694_v43 }
 0x25d   :  { %3175 = vmatpush.bf16.msra.mxu2 %v4645_v50  ;;  %3189 = vmatpush.bf16.msra.mxu3 %v4773_v52  ;;  %v5235_v50 = vld [vmem:[#allocation9 + $0x24c] sm:$0xf]  ;;  %v4678_v52 = vld [vmem:[#allocation9 + $0x258] sm:$0xf0]  ;;  %v4425_v55 = vor.u32 %v5171_v40, %v4422_v41 }
 0x25e   :  { %v4681_v0 = vor.u32 %v5235_v50, %v4678_v52 }
 0x25f   :  { %3148 = vmatmul.bf16.vlgmr.msra.gmra.mxu0 %v5627_v15  ;;  %3162 = vmatmul.bf16.vlgmr.msra.gmra.mxu1 %v5629_v1 }
 0x260   :  { %3196 = vmatpush.bf16.msrb.mxu0 %v4505_v54  ;;  %3210 = vmatpush.bf16.msrb.mxu1 %v4633_v63  ;;  %v5267_v54 = vld [vmem:[#allocation9 + $0x34c] sm:$0xf]  ;;  %v4806_v63 = vld [vmem:[#allocation9 + $0x358] sm:$0xf0] }
 0x261   :  { %3224 = vmatpush.bf16.msrb.mxu2 %v4761_v60  ;;  %3238 = vmatpush.bf16.msrb.mxu3 %v4889_v62  ;;  %v5167_v60 = vld [vmem:[#allocation9 + $0x2c] sm:$0xf]  ;;  %v4406_v62 = vld [vmem:[#allocation9 + $0x38] sm:$0xf0]  ;;  %v4809_v33 = vor.u32 %v5267_v54, %v4806_v63 }
 0x262   :  { %3176 = vmatmul.bf16.vlgmr.msra.gmra.mxu2 %v5631_v19  ;;  %3190 = vmatmul.bf16.vlgmr.msra.gmra.mxu3 %v5633_v4  ;;  %v4409_v6 = vor.u32 %v5167_v60, %v4406_v62 }
 0x264   :  { %3197 = vmatpush.bf16.msrb.mxu0 %v4489_v59  ;;  %3211 = vmatpush.bf16.msrb.mxu1 %v4617_v48  ;;  %v5263_v59 = vld [vmem:[#allocation9 + $0x32c] sm:$0xf]  ;;  %v4790_v48 = vld [vmem:[#allocation9 + $0x338] sm:$0xf0] }
 0x265   :  { %3225 = vmatpush.bf16.msrb.mxu2 %v4745_v30  ;;  %3239 = vmatpush.bf16.msrb.mxu3 %v4873_v46  ;;  %v5163_v30 = vld [vmem:[#allocation9 + $0xc] sm:$0xf]  ;;  %v4390_v46 = vld [vmem:[#allocation9 + $0x18] sm:$0xf0]  ;;  %v4793_v12 = vor.u32 %v5263_v59, %v4790_v48 }
 0x266   :  { %v4393_v11 = vor.u32 %v5163_v30, %v4390_v46 }
 0x268   :  { %3198 = vmatpush.bf16.msrb.mxu0 %v4473_v3  ;;  %3212 = vmatpush.bf16.msrb.mxu1 %v4601_v18  ;;  %v5259_v3 = vld [vmem:[#allocation9 + $0x30c] sm:$0xf]  ;;  %v4774_v18 = vld [vmem:[#allocation9 + $0x318] sm:$0xf0] }
 0x269   :  { %3226 = vmatpush.bf16.msrb.mxu2 %v4729_v36  ;;  %3240 = vmatpush.bf16.msrb.mxu3 %v4857_v10  ;;  %v4649_v36 = vor.u32 %v5227_v7, %v4646_v16  ;;  %v4777_v10 = vor.u32 %v5259_v3, %v4774_v18 }
 0x26c   :  { %3199 = vmatpush.bf16.msrb.mxu0 %v4457_v27  ;;  %3213 = vmatpush.bf16.msrb.mxu1 %v4585_v28 }
 0x26d   :  { %3227 = vmatpush.bf16.msrb.mxu2 %v4713_v31  ;;  %3241 = vmatpush.bf16.msrb.mxu3 %v4841_v35 }
 0x270   :  { %3200 = vmatpush.bf16.msrb.mxu0 %v4441_v26  ;;  %3214 = vmatpush.bf16.msrb.mxu1 %v4569_v38 }
 0x271   :  { %3228 = vmatpush.bf16.msrb.mxu2 %v4697_v42  ;;  %3242 = vmatpush.bf16.msrb.mxu3 %v4825_v29 }
 0x274   :  { %3201 = vmatpush.bf16.msrb.mxu0 %v4425_v55  ;;  %3215 = vmatpush.bf16.msrb.mxu1 %v4553_v56 }
 0x275   :  { %3229 = vmatpush.bf16.msrb.mxu2 %v4681_v0  ;;  %3243 = vmatpush.bf16.msrb.mxu3 %v4809_v33 }
 0x278   :  { %3202 = vmatpush.bf16.msrb.mxu0 %v4409_v6  ;;  %3216 = vmatpush.bf16.msrb.mxu1 %v4537_v8  ;;  %v5304_v6 = vpop.eup %5303 }
 0x279   :  { %3230 = vmatpush.bf16.msrb.mxu2 %v4665_v51  ;;  %3244 = vmatpush.bf16.msrb.mxu3 %v4793_v12  ;;  %v2203_v12 = vmul.f32 %v5304_v6, %v5613_v44  ;;  %v5306_v3 = vpop.eup %5305 }
 0x27b   :  { %v2204_v16 = vmul.f32 %v5304_v6, %v2203_v12 }
 0x27c   :  { %3203 = vmatpush.bf16.msrb.mxu0 %v4393_v11  ;;  %3217 = vmatpush.bf16.msrb.mxu1 %v4521_v58  ;;  %v2215_v11 = vmul.f32 %v5306_v3, %v5616_v47 }
 0x27d   :  { %3231 = vmatpush.bf16.msrb.mxu2 %v4649_v36  ;;  %3245 = vmatpush.bf16.msrb.mxu3 %v4777_v10  ;;  %v2205_v58 = vmul.f32 0.5, %v2204_v16 }
 0x27e   :  { %v2216_v36 = vmul.f32 %v5306_v3, %v2215_v11 }
 0x27f   :  { %3204 = vmatmul.bf16.vlgmr.msrb.gmra.mxu0 %v5627_v15  ;;  %3218 = vmatmul.bf16.vlgmr.msrb.gmra.mxu1 %v5629_v1  ;;  %v2206_v10 = vsub.f32 1.5, %v2205_v58 }
 0x280   :  { %3232 = vmatmul.bf16.vlgmr.msrb.gmra.mxu2 %v5631_v19  ;;  %3246 = vmatmul.bf16.vlgmr.msrb.gmra.mxu3 %v5633_v4 }
 0x2bb   :  { %v3037_v20 = vpop.f32.mrf.mxu0  ;;  %v3051_v21 = vpop.f32.mrf.mxu1 }
 0x2bc   :  { %v3052_v23 = vadd.f32 %v3051_v21, %v3037_v20 }
 0x2c2   :  { %v3065_v24 = vpop.f32.mrf.mxu2  ;;  %v3079_v25 = vpop.f32.mrf.mxu3 }
 0x2c3   :  { %v3066_v22 = vadd.f32 %v3065_v24, %v3052_v23  ;;  %v3039_v27 = vpop.f32.mrf.mxu0  ;;  %v3053_v28 = vpop.f32.mrf.mxu1  ;;  %v3276_v23 = vlaneseq  ;;  %v2217_v24 = vmul.f32 0.5, %v2216_v36 }
 0x2c4   :  { %v3054_v35 = vadd.f32 %v3053_v28, %v3039_v27 }
 0x2c5   :  { %v3080_v32 = vadd.f32 %v3079_v25, %v3066_v22  ;;  %v2207_v25 = vmul.f32 %v5304_v6, %v2206_v10  ;;  %v3277_v22 = vand.u32 127, %v3276_v23 }
 0x2c7   :  { %v4890_v34 = vclamps-f32 %v3080_v32, 1.0 }
 0x2c9   :  { %v3268_v31 = vmul.f32 64.0, %v4890_v34  ;;  %v2218_v34 = vsub.f32 1.5, %v2217_v24 }
 0x2ca   :  { %v3067_v39 = vpop.f32.mrf.mxu2  ;;  %v3081_v15 = vpop.f32.mrf.mxu3 }
 0x2cb   :  { %3293 = vst [vmem:[#allocation11] sm:$0xff] %v3268_v31  ;;  %v3068_v1 = vadd.f32 %v3067_v39, %v3054_v35  ;;  %v3093_v5 = vpop.f32.mrf.mxu0  ;;  %v3107_v19 = vpop.f32.mrf.mxu1  ;;  %v2208_v35 = vmul.f32 %v2207_v25, %v5613_v44  ;;  %v3280_v39 = vadd.s32 384, %v3277_v22 }
 0x2cc   :  { %v3108_v37 = vadd.f32 %v3107_v19, %v3093_v5 }
 0x2cd   :  { %v3082_v53 = vadd.f32 %v3081_v15, %v3068_v1  ;;  %v2210_v19 = vsel %vm2209_vm6, %v5613_v44, %v2208_v35  ;;  %vm3284_vm7 = vcmp.lt.s32.totalorder %v3280_v39, 440 }
 0x2cf   :  { %v4894_v4 = vclamps-f32 %v3082_v53, 1.0 }
 0x2d1   :  { %v3272_v43 = vmul.f32 64.0, %v4894_v4  ;;  %v2219_v4 = vmul.f32 %v5306_v3, %v2218_v34 }
 0x2d2   :  { %v3121_v57 = vpop.f32.mrf.mxu2  ;;  %v3135_v26 = vpop.f32.mrf.mxu3 }
 0x2d3   :  { %3297 = vst [vmem:[#allocation11 + $0x20] sm:$0xff] %v3272_v43  ;;  %v3122_v38 = vadd.f32 %v3121_v57, %v3108_v37  ;;  %v3095_v40 = vpop.f32.mrf.mxu0  ;;  %v3109_v41 = vpop.f32.mrf.mxu1  ;;  %v2212_v43 = vand.u32 2147483648, %v5613_v44  ;;  %v2224_v44 = vand.u32 2147483648, %v5616_v47 }
 0x2d4   :  { %v3110_v49 = vadd.f32 %v3109_v41, %v3095_v40 }
 0x2d5   :  { %v3136_v42 = vadd.f32 %v3135_v26, %v3122_v38  ;;  %v2213_v26 = vsel %vm2211_vm8, %v2212_v43, %v2210_v19 }
 0x2d7   :  { %v4891_v29 = vclamps-f32 %v3136_v42, 1.0  ;;  %v2220_v42 = vmul.f32 %v2219_v4, %v5616_v47 }
 0x2d9   :  { %v3269_v45 = vmul.f32 64.0, %v4891_v29 }
 0x2da   :  { %v3123_v50 = vpop.f32.mrf.mxu2  ;;  %v3137_v52 = vpop.f32.mrf.mxu3 }
 0x2db   :  { %3294 = vst [vmem:[#allocation11 + $0x8] sm:$0xff] %v3269_v45  ;;  %v3124_v54 = vadd.f32 %v3123_v50, %v3110_v49  ;;  %v2222_v49 = vsel %vm2221_vm9, %v5616_v47, %v2220_v42 }
 0x2dc   :  { %v3149_v55 = vpop.f32.mrf.mxu0  ;;  %v3163_v56 = vpop.f32.mrf.mxu1 }
 0x2dd   :  { %v3138_v63 = vadd.f32 %v3137_v52, %v3124_v54  ;;  %v3164_v0 = vadd.f32 %v3163_v56, %v3149_v55  ;;  %v2225_v54 = vsel %vm2223_vm10, %v2224_v44, %v2222_v49 }
 0x2df   :  { %v4895_v60 = vclamps-f32 %v3138_v63, 1.0 }
 0x2e1   :  { %v3273_v62 = vmul.f32 64.0, %v4895_v60 }
 0x2e3   :  { %3298 = vst [vmem:[#allocation11 + $0x28] sm:$0xff] %v3273_v62 }
 0x2e4   :  { %v3151_v61 = vpop.f32.mrf.mxu0  ;;  %v3165_v59 = vpop.f32.mrf.mxu1 }
 0x2e5   :  { %v3177_v33 = vpop.f32.mrf.mxu2  ;;  %v3191_v9 = vpop.f32.mrf.mxu3  ;;  %v3166_v30 = vadd.f32 %v3165_v59, %v3151_v61 }
 0x2e6   :  { %v3178_v13 = vadd.f32 %v3177_v33, %v3164_v0 }
 0x2e8   :  { %v3192_v2 = vadd.f32 %v3191_v9, %v3178_v13 }
 0x2ea   :  { %v4892_v48 = vclamps-f32 %v3192_v2, 1.0 }
 0x2ec   :  { %v3270_v8 = vmul.f32 64.0, %v4892_v48 }
 0x2ed   :  { %v3179_v46 = vpop.f32.mrf.mxu2  ;;  %v3193_v14 = vpop.f32.mrf.mxu3 }
 0x2ee   :  { %3295 = vst [vmem:[#allocation11 + $0x10] sm:$0xff] %v3270_v8  ;;  %v3180_v51 = vadd.f32 %v3179_v46, %v3166_v30 }
 0x2f0   :  { %v3194_v17 = vadd.f32 %v3193_v14, %v3180_v51 }
 0x2f2   :  { %v4896_v7 = vclamps-f32 %v3194_v17, 1.0 }
 0x2f4   :  { %v3274_v18 = vmul.f32 64.0, %v4896_v7 }
 0x2f6   :  { %3299 = vst [vmem:[#allocation11 + $0x30] sm:$0xff] %v3274_v18 }
 0x2fc   :  { %v3205_v20 = vpop.f32.mrf.mxu0  ;;  %v3219_v21 = vpop.f32.mrf.mxu1 }
 0x2fd   :  { %v3220_v27 = vadd.f32 %v3219_v21, %v3205_v20 }
 0x303   :  { %v3233_v28 = vpop.f32.mrf.mxu2  ;;  %v3247_v32 = vpop.f32.mrf.mxu3 }
 0x304   :  { %v3234_v31 = vadd.f32 %v3233_v28, %v3220_v27  ;;  %v3207_v1 = vpop.f32.mrf.mxu0  ;;  %v3221_v5 = vpop.f32.mrf.mxu1 }
 0x305   :  { %v3222_v57 = vadd.f32 %v3221_v5, %v3207_v1 }
 0x306   :  { %v3248_v15 = vadd.f32 %v3247_v32, %v3234_v31 }
 0x308   :  { %v4893_v53 = vclamps-f32 %v3248_v15, 1.0 }
 0x30a   :  { %v3271_v37 = vmul.f32 64.0, %v4893_v53 }
 0x30b   :  { %v3235_v38 = vpop.f32.mrf.mxu2  ;;  %v3249_v29 = vpop.f32.mrf.mxu3 }
 0x30c   :  { %v3288_v40 = vsel %vm3284_vm7, %v3271_v37, %v2213_v26  ;;  %v3236_v41 = vadd.f32 %v3235_v38, %v3222_v57 }
 0x30d   :  { %3296 = vst [vmem:[#allocation11 + $0x18] sm:$0xff] %v3288_v40 }
 0x30e   :  { %v3250_v45 = vadd.f32 %v3249_v29, %v3236_v41 }
 0x310   :  { %v4897_v50 = vclamps-f32 %v3250_v45, 1.0 }
 0x312   :  { %v3275_v52 = vmul.f32 64.0, %v4897_v50 }
 0x314   :  { %v3292_v63 = vsel %vm3284_vm7, %v3275_v52, %v2225_v54 }
 0x315   :  { %3300 = vst [vmem:[#allocation11 + $0x38] sm:$0xff] %v3292_v63 }
 0x316   :  { %3313 = dma.vmem_to_hbm [thread:$0]  %s3306_s3, 1024, %s3308_s13, [#allocation5], %s5439_s27, %s5439_s27, %s5440_s28  }
 0x317   :  { %5433 = dma.done.wait [#allocation5], 1024  }
 0x318   :  { %5434 = vsyncadd [#allocation5], 4294966272 }
 0x319   :  { %3318 = vsyncpa [#allocation4], 1 }
 0x31a   :  { %3319 = vsyncpa [#allocation7], 1 }
 0x31b   :  { %3320 = vsyncpa [#allocation10], 1 }
 0x31c   :  { %3321 = vsyncpa [#allocation5], 1 }

</bundles_post_ra>
